<compile_context>
chip_gen: v6e
topology: v6e:2x2x1
jax: 0.10.0
libtpu: 0.0.40
codegen_flags: <defaults>
</compile_context>

<pallas_src>
from functools import partial

import jax
import jax.numpy as jnp
import numpy as np
from jax import lax
from jax.experimental import pallas as pl
from jax.experimental.pallas import tpu as pltpu

LN_EPS = 1e-5  # nn.LayerNorm default


# ---------------------------------------------------------------------------
# Pallas kernel: fused (conv s2 + LN) + (conv s1 over folded-DWT bands + LN) + add
# ---------------------------------------------------------------------------
def _fused_conv_ln_kernel(x_ref, w_ref, p_ref, o_ref, *, th, wo, out_dim):
    """One (image, row-chunk) per grid step.

    x_ref : (1, P_pad, 4C) bf16  flattened, zero-padded 'corner' rows of this chunk,
                                  P_pad >= (th+2)*(wo+2) + 2
    w_ref : (9, 4C, 2*out_dim) bf16  per-tap stacked weights [stride-2 branch | DWT branch]
    p_ref : (6, out_dim) f32      rows = [b1, g1, t1, b2, g2, t2]
    o_ref : (1, th*wo, out_dim)   output rows for this chunk
    """
    wp = wo + 2                 # padded row width in the corner layout
    rows = th * wp              # contiguous "wide rows" processed per tap

    # 9 taps, unrolled at trace time.  Each tap is a contiguous row window of the
    # flattened padded tile -> no strided relayout copies; accumulate in a traced value.
    acc = jnp.dot(x_ref[0, 0:rows, :], w_ref[0], preferred_element_type=jnp.float32)
    for tap in range(1, 9):
        start = (tap // 3) * wp + (tap % 3)
        acc = acc + jnp.dot(x_ref[0, start:start + rows, :], w_ref[tap],
                            preferred_element_type=jnp.float32)

    # Drop the 2 junk columns per output row introduced by the wide-row windows.
    y = acc.reshape(th, wp, 2 * out_dim)[:, :wo, :].reshape(th * wo, 2 * out_dim)

    y1 = y[:, :out_dim] + p_ref[0:1, :]   # stride-2 conv branch (+ bias)
    y2 = y[:, out_dim:] + p_ref[3:4, :]   # folded-DWT conv branch (+ bias)

    def layernorm(v, g, t):
        # one-pass stats: var = E[v^2] - mu^2 ; rsqrt runs on the EUP
        mu = jnp.mean(v, axis=-1, keepdims=True)
        var = jnp.mean(v * v, axis=-1, keepdims=True) - mu * mu
        return (v - mu) * lax.rsqrt(var + LN_EPS) * g + t

    out = layernorm(y2, p_ref[4:5, :], p_ref[5:6, :]) + \
          layernorm(y1, p_ref[1:2, :], p_ref[2:3, :])
    # TODO(synk): when out_dim < 128 this store is a masked (lane-sparse) vst; at
    # production widths (out_dim >= 128) it is lane-dense.
    o_ref[0] = out.astype(o_ref.dtype)


# ---------------------------------------------------------------------------
# Parameter packing: fold Haar DWT into w2, re-express w1 in the 2x2 corner basis
# ---------------------------------------------------------------------------
def _pack_fused_weights(w1_oihw, w2_oihw, dtype=jnp.bfloat16):
    """Build the per-tap stacked weight wc of shape (9, 4C, 2*out_dim).

    Tap t = ty*3 + tx addresses the zero-padded corner array at offset (ty, tx) from the
    output pixel.  Channel order per tap is corner-major: [a(C) | b(C) | c(C) | d(C)].
    """
    out_dim, C = w1_oihw.shape[0], w1_oihw.shape[1]

    # Branch 1 (3x3 stride-2, pad 1 over x): kernel row ky maps to
    #   ky=0 -> corner-block offset 0, corner row 1
    #   ky=1 -> corner-block offset 1, corner row 0
    #   ky=2 -> corner-block offset 1, corner row 1           (same for columns)
    w1f = jnp.zeros((3, 3, 2, 2, C, out_dim), jnp.float32)
    kmap = ((0, 1), (1, 0), (1, 1))  # ky -> (tap offset ty, corner row ry)
    for ky, (ty, ry) in enumerate(kmap):
        for kx, (tx, rx) in enumerate(kmap):
            w1f = w1f.at[ty, tx, ry, rx].set(jnp.transpose(w1_oihw[:, :, ky, kx], (1, 0)))
    w1f = w1f.reshape(3, 3, 4 * C, out_dim)

    # Branch 2: Haar DWT (J=1, mode='zero') folded into the 3x3 stride-1 conv weights.
    #   DWT band k at a 2x2 block = sum_j haar[k, j] * corner_j, corners (a, b, c, d).
    haar = 0.5 * jnp.array([[1., 1., 1., 1.],
                            [1., 1., -1., -1.],
                            [1., -1., 1., -1.],
                            [1., -1., -1., 1.]], jnp.float32)
    w2r = w2_oihw.reshape(out_dim, 4, C, 3, 3)            # (O, band, C, ky, kx)
    w2f = jnp.einsum("kj,okcyx->yxjco", haar, w2r)        # (3, 3, corner, C, O)
    w2f = w2f.reshape(3, 3, 4 * C, out_dim)

    wc = jnp.concatenate([w1f, w2f], axis=-1)             # (3, 3, 4C, 2*O)
    return wc.reshape(9, 4 * C, 2 * out_dim).astype(dtype)


def init_params(key, dim, out_dim):
    """Deterministic synthetic parameters (same shapes as the torch module)."""
    ks = jax.random.split(key, 8)
    w1 = 0.1 * jax.random.normal(ks[0], (out_dim, dim, 3, 3), jnp.float32)      # conv.0 (OIHW)
    b1 = 0.1 * jax.random.normal(ks[1], (out_dim,), jnp.float32)
    g1 = 1.0 + 0.1 * jax.random.normal(ks[2], (out_dim,), jnp.float32)          # conv.2 LN
    t1 = 0.1 * jax.random.normal(ks[3], (out_dim,), jnp.float32)
    w2 = 0.1 * jax.random.normal(ks[4], (out_dim, 4 * dim, 3, 3), jnp.float32)  # conv_bn_relu.0
    b2 = 0.1 * jax.random.normal(ks[5], (out_dim,), jnp.float32)
    g2 = 1.0 + 0.1 * jax.random.normal(ks[6], (out_dim,), jnp.float32)          # conv_bn_relu.2 LN
    t2 = 0.1 * jax.random.normal(ks[7], (out_dim,), jnp.float32)

    return {
        # raw params (used by the pure-JAX reference)
        "w1_oihw": w1, "b1_vec": b1, "g1_vec": g1, "t1_vec": t1,
        "w2_oihw": w2, "b2_vec": b2, "g2_vec": g2, "t2_vec": t2,
        # kernel params: DWT + corner-basis folded, bf16 matmul operands
        "wc": _pack_fused_weights(w1, w2, jnp.bfloat16),
        # single packed (6, out_dim) f32 array: [b1, g1, t1, b2, g2, t2]
        "bgt": jnp.stack([b1, g1, t1, b2, g2, t2], axis=0),
    }


# ---------------------------------------------------------------------------
# VMEM budgeting helpers (generation aware)
# ---------------------------------------------------------------------------
def _vmem_limit_bytes():
    # ~75% of physical VMEM: 128 MiB on v5e/v6e, 64 MiB on v7x.
    try:
        cap = int(pltpu.get_tpu_info().vmem_capacity_bytes)
    except Exception:
        cap = 64 * 1024 * 1024  # conservative fallback if the query is unavailable
    return (cap * 3) // 4


def _choose_row_chunk(Ho, Wo, c4, out_dim, out_itemsize, budget_bytes):
    """Largest divisor TH of Ho whose per-grid-step footprint fits the budget."""
    def step_bytes(th):
        p_pad = (((th + 2) * (Wo + 2) + 2) + 7) // 8 * 8
        rows = th * (Wo + 2)
        b = 2 * p_pad * c4 * 2                      # bf16 input block, double-buffered
        b += 2 * 9 * c4 * 2 * out_dim * 2           # bf16 stacked weights (2 buffers)
        b += rows * 2 * out_dim * 4                 # traced f32 accumulator
        b += 2 * th * Wo * out_dim * out_itemsize   # output block, double-buffered
        return b + (2 << 20)                        # headroom (params, compiler scratch)

    for th in sorted((d for d in range(1, Ho + 1) if Ho % d == 0), reverse=True):
        if step_bytes(th) <= budget_bytes:
            return th
    return 1


# ---------------------------------------------------------------------------
# Forward: one pallas_call for both inputs (shared weights)
# ---------------------------------------------------------------------------
def _forward_impl(x1, x2, params, row_chunk=None):
    out_dim = params["bgt"].shape[-1]
    n1 = x1.shape[0]
    x = jnp.concatenate([x1, x2], axis=0)                 # (B, H, W, C)
    B, H, W, C = x.shape
    assert H % 2 == 0 and W % 2 == 0, "even spatial dims required"
    Ho, Wo = H // 2, W // 2
    c4 = 4 * C

    # NHWC -> 'corner' layout (B, Ho, Wo, 4C): per 2x2 block, channels = [a | b | c | d],
    # then zero pad (1,1) spatially (covers both convs' padding) and cast to bf16.
    # TODO(synk): for thin-channel memory-bound configs this is one extra activation-sized
    # HBM pass; could be moved in-kernel (stride-2 pl.ds slices of the raw NHWC tile).
    xc = x.reshape(B, Ho, 2, Wo, 2, C).transpose(0, 1, 3, 2, 4, 5).reshape(B, Ho, Wo, c4)
    xcp = jnp.pad(xc, ((0, 0), (1, 1), (1, 1), (0, 0))).astype(jnp.bfloat16)

    vmem_limit = _vmem_limit_bytes()
    out_itemsize = np.dtype(x.dtype).itemsize
    th = row_chunk if row_chunk is not None else \
        _choose_row_chunk(Ho, Wo, c4, out_dim, out_itemsize, int(vmem_limit * 0.7))
    assert Ho % th == 0, "row chunk must divide Ho"
    n_chunks = Ho // th

    # Row chunks with duplicated 1-row halos -> disjoint, non-overlapping BlockSpec blocks.
    if n_chunks == 1:
        xch = xcp[:, None]                                             # (B, 1, Ho+2, Wo+2, 4C)
    else:
        xch = jnp.stack([xcp[:, c * th: c * th + th + 2]
                         for c in range(n_chunks)], axis=1)            # (B, nc, th+2, Wo+2, 4C)

    G = B * n_chunks
    p_rows = (th + 2) * (Wo + 2)
    p_pad = ((p_rows + 2) + 7) // 8 * 8          # +2 rows so the (2,2)-tap window stays in-bounds
    xg = xch.reshape(G, p_rows, c4)              # contiguous merge -> free reshape
    xg = jnp.pad(xg, ((0, 0), (0, p_pad - p_rows), (0, 0)))

    kernel = partial(_fused_conv_ln_kernel, th=th, wo=Wo, out_dim=out_dim)

    out = pl.pallas_call(
        kernel,
        out_shape=jax.ShapeDtypeStruct((G, th * Wo, out_dim), x.dtype),
        grid_spec=pltpu.PrefetchScalarGridSpec(
            num_scalar_prefetch=0,
            grid=(G,),  # one (image, row-chunk) per step; blocks auto double-buffered
            in_specs=[
                pl.BlockSpec((1, p_pad, c4), lambda g: (g, 0, 0)),
                pl.BlockSpec((9, c4, 2 * out_dim), lambda g: (0, 0, 0)),   # VMEM-resident
                pl.BlockSpec((6, out_dim), lambda g: (0, 0)),              # packed b/g/t
            ],
            out_specs=pl.BlockSpec((1, th * Wo, out_dim), lambda g: (g, 0, 0)),
        ),
        compiler_params=pltpu.CompilerParams(
            # TODO(synk): on v7x, pltpu.CORE_PARALLEL / pl.core_map gives a real 2-TC split;
            # "parallel" is kept here because it lowers cleanly on every generation.
            dimension_semantics=("parallel",),
            vmem_limit_bytes=int(vmem_limit),
        ),
    )(xg, params["wc"], params["bgt"])

    out = out.reshape(B, n_chunks, th, Wo, out_dim).reshape(B, Ho, Wo, out_dim)
    return out[:n1], out[n1:]


make_downsample_v4_forward = jax.jit(_forward_impl, static_argnames=("row_chunk",))


# ---------------------------------------------------------------------------
# Pure-JAX reference (mirrors the torch forward exactly) for validation
# ---------------------------------------------------------------------------
def _ref_branch(x, p):
    xn = jnp.transpose(x, (0, 3, 1, 2))  # NCHW

    def conv(z, w, b, stride):
        y = lax.conv_general_dilated(z, w, (stride, stride), ((1, 1), (1, 1)),
                                     dimension_numbers=("NCHW", "OIHW", "NCHW"))
        return y + b[None, :, None, None]

    def ln(y, g, t):
        mu = jnp.mean(y, -1, keepdims=True)
        var = jnp.mean((y - mu) ** 2, -1, keepdims=True)
        return (y - mu) / jnp.sqrt(var + LN_EPS) * g + t

    c = jnp.transpose(conv(xn, p["w1_oihw"], p["b1_vec"], 2), (0, 2, 3, 1))
    c = ln(c, p["g1_vec"], p["t1_vec"])

    a = xn[:, :, 0::2, 0::2]
    b = xn[:, :, 0::2, 1::2]
    cc = xn[:, :, 1::2, 0::2]
    d = xn[:, :, 1::2, 1::2]
    xcat = jnp.concatenate([0.5 * (a + b + cc + d), 0.5 * (a + b - cc - d),
                            0.5 * (a - b + cc - d), 0.5 * (a - b - cc + d)], axis=1)
    e = jnp.transpose(conv(xcat, p["w2_oihw"], p["b2_vec"], 1), (0, 2, 3, 1))
    e = ln(e, p["g2_vec"], p["t2_vec"])
    return e + c


if __name__ == "__main__":
    N, H, W, dim, out_dim = 2, 16, 16, 4, 8
    key = jax.random.PRNGKey(0)
    kx1, kx2, kp = jax.random.split(key, 3)
    x1 = jax.random.normal(kx1, (N, H, W, dim), jnp.float32)
    x2 = jax.random.normal(kx2, (N, H, W, dim), jnp.float32)
    params = init_params(kp, dim, out_dim)

    # default path (auto row-chunking -> single chunk at this size)
    y1, y2 = make_downsample_v4_forward(x1, x2, params)
    jax.block_until_ready((y1, y2))

    assert y1.shape == (N, H // 2, W // 2, out_dim)
    assert y2.shape == (N, H // 2, W // 2, out_dim)
    assert y1.dtype == x1.dtype

    r1 = _ref_branch(x1, params)
    r2 = _ref_branch(x2, params)
    # tolerance reflects bf16 MXU operands (reference is pure f32)
    np.testing.assert_allclose(np.asarray(y1), np.asarray(r1), rtol=5e-2, atol=5e-2)
    np.testing.assert_allclose(np.asarray(y2), np.asarray(r2), rtol=5e-2, atol=5e-2)

    # also exercise the spatial-chunking (halo) path used on v7x for large images
    z1, z2 = make_downsample_v4_forward(x1, x2, params, row_chunk=2)
    jax.block_until_ready((z1, z2))
    np.testing.assert_allclose(np.asarray(z1), np.asarray(r1), rtol=5e-2, atol=5e-2)
    np.testing.assert_allclose(np.asarray(z2), np.asarray(r2), rtol=5e-2, atol=5e-2)

    print("KERNEL_OK")
</pallas_src>

<mosaic_0001>
module attributes {stable_mosaic.version = 11 : i64} {
  func.func @_fused_conv_ln_kernel(%arg0: i32, %arg1: memref<1x104x16xbf16, #tpu.memory_space<vmem>>, %arg2: memref<9x16x16xbf16, #tpu.memory_space<vmem>>, %arg3: memref<6x8xf32, #tpu.memory_space<vmem>>, %arg4: memref<1x64x8xf32, #tpu.memory_space<vmem>>) attributes {dimension_semantics = [#tpu.dimension_semantics<parallel>], iteration_bounds = array<i64: 4>, scalar_prefetch = 0 : i64, scratch_operands = 0 : i64, tpu.core_type = #tpu.core_type<tc>, window_params = [{transform_indices = @transform_0, window_bounds = array<i64: 1, 104, 16>}, {pipeline_mode = #tpu.pipeline_mode<synchronous>, transform_indices = @transform_1, window_bounds = array<i64: 9, 16, 16>}, {pipeline_mode = #tpu.pipeline_mode<synchronous>, transform_indices = @transform_2, window_bounds = array<i64: 6, 8>}, {transform_indices = @transform_3, window_bounds = array<i64: 1, 64, 8>}]} {
    %c0 = arith.constant 0 : index
    %c0_0 = arith.constant 0 : index
    %c0_1 = arith.constant 0 : index
    %0 = vector.load %arg1[%c0, %c0_0, %c0_1] : memref<1x104x16xbf16, #tpu.memory_space<vmem>>, vector<1x80x16xbf16>
    %1 = vector.shape_cast %0 : vector<1x80x16xbf16> to vector<80x16xbf16>
    %c0_2 = arith.constant 0 : index
    %c0_3 = arith.constant 0 : index
    %c0_4 = arith.constant 0 : index
    %2 = vector.load %arg2[%c0_2, %c0_3, %c0_4] : memref<9x16x16xbf16, #tpu.memory_space<vmem>>, vector<1x16x16xbf16>
    %3 = vector.shape_cast %2 : vector<1x16x16xbf16> to vector<16x16xbf16>
    %cst = arith.constant dense<0.000000e+00> : vector<80x16xf32>
    %4 = tpu.matmul %1, %3, %cst {dimension_numbers = #tpu.dot_dimension_numbers<[1], [0], [0], [1], [0, 0, 1, 1], [], []>} : vector<80x16xbf16>, vector<16x16xbf16>, vector<80x16xf32> -> vector<80x16xf32>
    %c0_5 = arith.constant 0 : index
    %c1 = arith.constant 1 : index
    %c0_6 = arith.constant 0 : index
    %5 = vector.load %arg1[%c0_5, %c1, %c0_6] : memref<1x104x16xbf16, #tpu.memory_space<vmem>>, vector<1x80x16xbf16>
    %6 = vector.shape_cast %5 : vector<1x80x16xbf16> to vector<80x16xbf16>
    %c1_7 = arith.constant 1 : index
    %c0_8 = arith.constant 0 : index
    %c0_9 = arith.constant 0 : index
    %7 = vector.load %arg2[%c1_7, %c0_8, %c0_9] : memref<9x16x16xbf16, #tpu.memory_space<vmem>>, vector<1x16x16xbf16>
    %8 = vector.shape_cast %7 : vector<1x16x16xbf16> to vector<16x16xbf16>
    %cst_10 = arith.constant dense<0.000000e+00> : vector<80x16xf32>
    %9 = tpu.matmul %6, %8, %cst_10 {dimension_numbers = #tpu.dot_dimension_numbers<[1], [0], [0], [1], [0, 0, 1, 1], [], []>} : vector<80x16xbf16>, vector<16x16xbf16>, vector<80x16xf32> -> vector<80x16xf32>
    %10 = arith.addf %4, %9 : vector<80x16xf32>
    %c0_11 = arith.constant 0 : index
    %c2 = arith.constant 2 : index
    %c0_12 = arith.constant 0 : index
    %11 = vector.load %arg1[%c0_11, %c2, %c0_12] : memref<1x104x16xbf16, #tpu.memory_space<vmem>>, vector<1x80x16xbf16>
    %12 = vector.shape_cast %11 : vector<1x80x16xbf16> to vector<80x16xbf16>
    %c2_13 = arith.constant 2 : index
    %c0_14 = arith.constant 0 : index
    %c0_15 = arith.constant 0 : index
    %13 = vector.load %arg2[%c2_13, %c0_14, %c0_15] : memref<9x16x16xbf16, #tpu.memory_space<vmem>>, vector<1x16x16xbf16>
    %14 = vector.shape_cast %13 : vector<1x16x16xbf16> to vector<16x16xbf16>
    %cst_16 = arith.constant dense<0.000000e+00> : vector<80x16xf32>
    %15 = tpu.matmul %12, %14, %cst_16 {dimension_numbers = #tpu.dot_dimension_numbers<[1], [0], [0], [1], [0, 0, 1, 1], [], []>} : vector<80x16xbf16>, vector<16x16xbf16>, vector<80x16xf32> -> vector<80x16xf32>
    %16 = arith.addf %10, %15 : vector<80x16xf32>
    %c0_17 = arith.constant 0 : index
    %c10 = arith.constant 10 : index
    %c0_18 = arith.constant 0 : index
    %17 = vector.load %arg1[%c0_17, %c10, %c0_18] : memref<1x104x16xbf16, #tpu.memory_space<vmem>>, vector<1x80x16xbf16>
    %18 = vector.shape_cast %17 : vector<1x80x16xbf16> to vector<80x16xbf16>
    %c3 = arith.constant 3 : index
    %c0_19 = arith.constant 0 : index
    %c0_20 = arith.constant 0 : index
    %19 = vector.load %arg2[%c3, %c0_19, %c0_20] : memref<9x16x16xbf16, #tpu.memory_space<vmem>>, vector<1x16x16xbf16>
    %20 = vector.shape_cast %19 : vector<1x16x16xbf16> to vector<16x16xbf16>
    %cst_21 = arith.constant dense<0.000000e+00> : vector<80x16xf32>
    %21 = tpu.matmul %18, %20, %cst_21 {dimension_numbers = #tpu.dot_dimension_numbers<[1], [0], [0], [1], [0, 0, 1, 1], [], []>} : vector<80x16xbf16>, vector<16x16xbf16>, vector<80x16xf32> -> vector<80x16xf32>
    %22 = arith.addf %16, %21 : vector<80x16xf32>
    %c0_22 = arith.constant 0 : index
    %c11 = arith.constant 11 : index
    %c0_23 = arith.constant 0 : index
    %23 = vector.load %arg1[%c0_22, %c11, %c0_23] : memref<1x104x16xbf16, #tpu.memory_space<vmem>>, vector<1x80x16xbf16>
    %24 = vector.shape_cast %23 : vector<1x80x16xbf16> to vector<80x16xbf16>
    %c4 = arith.constant 4 : index
    %c0_24 = arith.constant 0 : index
    %c0_25 = arith.constant 0 : index
    %25 = vector.load %arg2[%c4, %c0_24, %c0_25] : memref<9x16x16xbf16, #tpu.memory_space<vmem>>, vector<1x16x16xbf16>
    %26 = vector.shape_cast %25 : vector<1x16x16xbf16> to vector<16x16xbf16>
    %cst_26 = arith.constant dense<0.000000e+00> : vector<80x16xf32>
    %27 = tpu.matmul %24, %26, %cst_26 {dimension_numbers = #tpu.dot_dimension_numbers<[1], [0], [0], [1], [0, 0, 1, 1], [], []>} : vector<80x16xbf16>, vector<16x16xbf16>, vector<80x16xf32> -> vector<80x16xf32>
    %28 = arith.addf %22, %27 : vector<80x16xf32>
    %c0_27 = arith.constant 0 : index
    %c12 = arith.constant 12 : index
    %c0_28 = arith.constant 0 : index
    %29 = vector.load %arg1[%c0_27, %c12, %c0_28] : memref<1x104x16xbf16, #tpu.memory_space<vmem>>, vector<1x80x16xbf16>
    %30 = vector.shape_cast %29 : vector<1x80x16xbf16> to vector<80x16xbf16>
    %c5 = arith.constant 5 : index
    %c0_29 = arith.constant 0 : index
    %c0_30 = arith.constant 0 : index
    %31 = vector.load %arg2[%c5, %c0_29, %c0_30] : memref<9x16x16xbf16, #tpu.memory_space<vmem>>, vector<1x16x16xbf16>
    %32 = vector.shape_cast %31 : vector<1x16x16xbf16> to vector<16x16xbf16>
    %cst_31 = arith.constant dense<0.000000e+00> : vector<80x16xf32>
    %33 = tpu.matmul %30, %32, %cst_31 {dimension_numbers = #tpu.dot_dimension_numbers<[1], [0], [0], [1], [0, 0, 1, 1], [], []>} : vector<80x16xbf16>, vector<16x16xbf16>, vector<80x16xf32> -> vector<80x16xf32>
    %34 = arith.addf %28, %33 : vector<80x16xf32>
    %c0_32 = arith.constant 0 : index
    %c20 = arith.constant 20 : index
    %c0_33 = arith.constant 0 : index
    %35 = vector.load %arg1[%c0_32, %c20, %c0_33] : memref<1x104x16xbf16, #tpu.memory_space<vmem>>, vector<1x80x16xbf16>
    %36 = vector.shape_cast %35 : vector<1x80x16xbf16> to vector<80x16xbf16>
    %c6 = arith.constant 6 : index
    %c0_34 = arith.constant 0 : index
    %c0_35 = arith.constant 0 : index
    %37 = vector.load %arg2[%c6, %c0_34, %c0_35] : memref<9x16x16xbf16, #tpu.memory_space<vmem>>, vector<1x16x16xbf16>
    %38 = vector.shape_cast %37 : vector<1x16x16xbf16> to vector<16x16xbf16>
    %cst_36 = arith.constant dense<0.000000e+00> : vector<80x16xf32>
    %39 = tpu.matmul %36, %38, %cst_36 {dimension_numbers = #tpu.dot_dimension_numbers<[1], [0], [0], [1], [0, 0, 1, 1], [], []>} : vector<80x16xbf16>, vector<16x16xbf16>, vector<80x16xf32> -> vector<80x16xf32>
    %40 = arith.addf %34, %39 : vector<80x16xf32>
    %c0_37 = arith.constant 0 : index
    %c21 = arith.constant 21 : index
    %c0_38 = arith.constant 0 : index
    %41 = vector.load %arg1[%c0_37, %c21, %c0_38] : memref<1x104x16xbf16, #tpu.memory_space<vmem>>, vector<1x80x16xbf16>
    %42 = vector.shape_cast %41 : vector<1x80x16xbf16> to vector<80x16xbf16>
    %c7 = arith.constant 7 : index
    %c0_39 = arith.constant 0 : index
    %c0_40 = arith.constant 0 : index
    %43 = vector.load %arg2[%c7, %c0_39, %c0_40] : memref<9x16x16xbf16, #tpu.memory_space<vmem>>, vector<1x16x16xbf16>
    %44 = vector.shape_cast %43 : vector<1x16x16xbf16> to vector<16x16xbf16>
    %cst_41 = arith.constant dense<0.000000e+00> : vector<80x16xf32>
    %45 = tpu.matmul %42, %44, %cst_41 {dimension_numbers = #tpu.dot_dimension_numbers<[1], [0], [0], [1], [0, 0, 1, 1], [], []>} : vector<80x16xbf16>, vector<16x16xbf16>, vector<80x16xf32> -> vector<80x16xf32>
    %46 = arith.addf %40, %45 : vector<80x16xf32>
    %c0_42 = arith.constant 0 : index
    %c22 = arith.constant 22 : index
    %c0_43 = arith.constant 0 : index
    %47 = vector.load %arg1[%c0_42, %c22, %c0_43] : memref<1x104x16xbf16, #tpu.memory_space<vmem>>, vector<1x80x16xbf16>
    %48 = vector.shape_cast %47 : vector<1x80x16xbf16> to vector<80x16xbf16>
    %c8 = arith.constant 8 : index
    %c0_44 = arith.constant 0 : index
    %c0_45 = arith.constant 0 : index
    %49 = vector.load %arg2[%c8, %c0_44, %c0_45] : memref<9x16x16xbf16, #tpu.memory_space<vmem>>, vector<1x16x16xbf16>
    %50 = vector.shape_cast %49 : vector<1x16x16xbf16> to vector<16x16xbf16>
    %cst_46 = arith.constant dense<0.000000e+00> : vector<80x16xf32>
    %51 = tpu.matmul %48, %50, %cst_46 {dimension_numbers = #tpu.dot_dimension_numbers<[1], [0], [0], [1], [0, 0, 1, 1], [], []>} : vector<80x16xbf16>, vector<16x16xbf16>, vector<80x16xf32> -> vector<80x16xf32>
    %52 = arith.addf %46, %51 : vector<80x16xf32>
    %53 = vector.shape_cast %52 : vector<80x16xf32> to vector<8x10x16xf32>
    %54 = vector.extract_strided_slice %53 {offsets = [0, 0, 0], sizes = [8, 8, 16], strides = [1, 1, 1]} : vector<8x10x16xf32> to vector<8x8x16xf32>
    %55 = vector.shape_cast %54 : vector<8x8x16xf32> to vector<64x16xf32>
    %56 = vector.extract_strided_slice %55 {offsets = [0, 0], sizes = [64, 8], strides = [1, 1]} : vector<64x16xf32> to vector<64x8xf32>
    %c0_47 = arith.constant 0 : index
    %c0_48 = arith.constant 0 : index
    %57 = vector.load %arg3[%c0_47, %c0_48] : memref<6x8xf32, #tpu.memory_space<vmem>>, vector<1x8xf32>
    %58 = vector.broadcast %57 : vector<1x8xf32> to vector<64x8xf32>
    %59 = arith.addf %56, %58 : vector<64x8xf32>
    %60 = vector.extract_strided_slice %55 {offsets = [0, 8], sizes = [64, 8], strides = [1, 1]} : vector<64x16xf32> to vector<64x8xf32>
    %c3_49 = arith.constant 3 : index
    %c0_50 = arith.constant 0 : index
    %61 = vector.load %arg3[%c3_49, %c0_50] : memref<6x8xf32, #tpu.memory_space<vmem>>, vector<1x8xf32>
    %62 = vector.broadcast %61 : vector<1x8xf32> to vector<64x8xf32>
    %63 = arith.addf %60, %62 : vector<64x8xf32>
    %c4_51 = arith.constant 4 : index
    %c0_52 = arith.constant 0 : index
    %64 = vector.load %arg3[%c4_51, %c0_52] : memref<6x8xf32, #tpu.memory_space<vmem>>, vector<1x8xf32>
    %c5_53 = arith.constant 5 : index
    %c0_54 = arith.constant 0 : index
    %65 = vector.load %arg3[%c5_53, %c0_54] : memref<6x8xf32, #tpu.memory_space<vmem>>, vector<1x8xf32>
    %cst_55 = arith.constant dense<0.000000e+00> : vector<64xf32>
    %66 = vector.multi_reduction <add>, %63, %cst_55 [1] : vector<64x8xf32> to vector<64xf32>
    %67 = vector.shape_cast %66 : vector<64xf32> to vector<64x1xf32>
    %cst_56 = arith.constant 8.000000e+00 : f32
    %68 = vector.broadcast %cst_56 : f32 to vector<64x1xf32>
    %69 = arith.divf %67, %68 : vector<64x1xf32>
    %70 = arith.mulf %63, %63 : vector<64x8xf32>
    %cst_57 = arith.constant dense<0.000000e+00> : vector<64xf32>
    %71 = vector.multi_reduction <add>, %70, %cst_57 [1] : vector<64x8xf32> to vector<64xf32>
    %72 = vector.shape_cast %71 : vector<64xf32> to vector<64x1xf32>
    %cst_58 = arith.constant 8.000000e+00 : f32
    %73 = vector.broadcast %cst_58 : f32 to vector<64x1xf32>
    %74 = arith.divf %72, %73 : vector<64x1xf32>
    %75 = arith.mulf %69, %69 : vector<64x1xf32>
    %76 = arith.subf %74, %75 : vector<64x1xf32>
    %77 = vector.broadcast %69 : vector<64x1xf32> to vector<64x8xf32>
    %78 = arith.subf %63, %77 : vector<64x8xf32>
    %cst_59 = arith.constant 9.99999974E-6 : f32
    %79 = vector.broadcast %cst_59 : f32 to vector<64x1xf32>
    %80 = arith.addf %76, %79 : vector<64x1xf32>
    %81 = math.rsqrt %80 : vector<64x1xf32>
    %82 = vector.broadcast %81 : vector<64x1xf32> to vector<64x8xf32>
    %83 = arith.mulf %78, %82 : vector<64x8xf32>
    %84 = vector.broadcast %64 : vector<1x8xf32> to vector<64x8xf32>
    %85 = arith.mulf %83, %84 : vector<64x8xf32>
    %86 = vector.broadcast %65 : vector<1x8xf32> to vector<64x8xf32>
    %87 = arith.addf %85, %86 : vector<64x8xf32>
    %c1_60 = arith.constant 1 : index
    %c0_61 = arith.constant 0 : index
    %88 = vector.load %arg3[%c1_60, %c0_61] : memref<6x8xf32, #tpu.memory_space<vmem>>, vector<1x8xf32>
    %c2_62 = arith.constant 2 : index
    %c0_63 = arith.constant 0 : index
    %89 = vector.load %arg3[%c2_62, %c0_63] : memref<6x8xf32, #tpu.memory_space<vmem>>, vector<1x8xf32>
    %cst_64 = arith.constant dense<0.000000e+00> : vector<64xf32>
    %90 = vector.multi_reduction <add>, %59, %cst_64 [1] : vector<64x8xf32> to vector<64xf32>
    %91 = vector.shape_cast %90 : vector<64xf32> to vector<64x1xf32>
    %cst_65 = arith.constant 8.000000e+00 : f32
    %92 = vector.broadcast %cst_65 : f32 to vector<64x1xf32>
    %93 = arith.divf %91, %92 : vector<64x1xf32>
    %94 = arith.mulf %59, %59 : vector<64x8xf32>
    %cst_66 = arith.constant dense<0.000000e+00> : vector<64xf32>
    %95 = vector.multi_reduction <add>, %94, %cst_66 [1] : vector<64x8xf32> to vector<64xf32>
    %96 = vector.shape_cast %95 : vector<64xf32> to vector<64x1xf32>
    %cst_67 = arith.constant 8.000000e+00 : f32
    %97 = vector.broadcast %cst_67 : f32 to vector<64x1xf32>
    %98 = arith.divf %96, %97 : vector<64x1xf32>
    %99 = arith.mulf %93, %93 : vector<64x1xf32>
    %100 = arith.subf %98, %99 : vector<64x1xf32>
    %101 = vector.broadcast %93 : vector<64x1xf32> to vector<64x8xf32>
    %102 = arith.subf %59, %101 : vector<64x8xf32>
    %cst_68 = arith.constant 9.99999974E-6 : f32
    %103 = vector.broadcast %cst_68 : f32 to vector<64x1xf32>
    %104 = arith.addf %100, %103 : vector<64x1xf32>
    %105 = math.rsqrt %104 : vector<64x1xf32>
    %106 = vector.broadcast %105 : vector<64x1xf32> to vector<64x8xf32>
    %107 = arith.mulf %102, %106 : vector<64x8xf32>
    %108 = vector.broadcast %88 : vector<1x8xf32> to vector<64x8xf32>
    %109 = arith.mulf %107, %108 : vector<64x8xf32>
    %110 = vector.broadcast %89 : vector<1x8xf32> to vector<64x8xf32>
    %111 = arith.addf %109, %110 : vector<64x8xf32>
    %112 = arith.addf %87, %111 : vector<64x8xf32>
    %c0_69 = arith.constant 0 : index
    %c0_70 = arith.constant 0 : index
    %c0_71 = arith.constant 0 : index
    %113 = vector.load %arg4[%c0_69, %c0_70, %c0_71] : memref<1x64x8xf32, #tpu.memory_space<vmem>>, vector<1x64x8xf32>
    %114 = vector.shape_cast %113 : vector<1x64x8xf32> to vector<64x8xf32>
    %115 = vector.shape_cast %112 : vector<64x8xf32> to vector<1x64x8xf32>
    tpu.vector_store %arg4[%c0_69, %c0_70, %c0_71], %115 {strides = array<i32>} : memref<1x64x8xf32, #tpu.memory_space<vmem>>, vector<1x64x8xf32>,
    return
  }
  func.func @transform_0(%arg0: i32) -> (i32, i32, i32) {
    %c0_i32 = arith.constant 0 : i32
    %c0_i32_0 = arith.constant 0 : i32
    %c0_i32_1 = arith.constant 0 : i32
    return %arg0, %c0_i32, %c0_i32_0 : i32, i32, i32
  }
  func.func @transform_1(%arg0: i32) -> (i32, i32, i32) {
    %c0_i32 = arith.constant 0 : i32
    %c0_i32_0 = arith.constant 0 : i32
    %c0_i32_1 = arith.constant 0 : i32
    %c0_i32_2 = arith.constant 0 : i32
    return %c0_i32, %c0_i32_0, %c0_i32_1 : i32, i32, i32
  }
  func.func @transform_2(%arg0: i32) -> (i32, i32) {
    %c0_i32 = arith.constant 0 : i32
    %c0_i32_0 = arith.constant 0 : i32
    %c0_i32_1 = arith.constant 0 : i32
    return %c0_i32, %c0_i32_0 : i32, i32
  }
  func.func @transform_3(%arg0: i32) -> (i32, i32, i32) {
    %c0_i32 = arith.constant 0 : i32
    %c0_i32_0 = arith.constant 0 : i32
    %c0_i32_1 = arith.constant 0 : i32
    return %arg0, %c0_i32, %c0_i32_0 : i32, i32, i32
  }
}

</mosaic_0001>

<bundles_post_ra>
// kernel: _forward_impl.1
= control target key start
LH: loop header
LB: loop body
LE: loop exit
PB: predicated region body
PF: predicated region fallthrough
CT: control target
= control target key end

     0   :  { %s5120_s12 = smov 0   ;;  %s6877_s0 = inlined_call_operand.vmem [shape: bf16[4,104,16], index: 0, kind: input, shape index: {}]   ;;  %s6878_s1 = inlined_call_operand.vmem [shape: bf16[9,16,16], index: 1, kind: input, shape index: {}]   ;;  %s6879_s2 = inlined_call_operand.vmem [shape: f32[6,8], index: 2, kind: input, shape index: {}]   ;;  %s6880_s3 = inlined_call_operand.vmem [shape: f32[4,64,8], index: 3, kind: output, shape index: {}]  }
   0x1 LB: > { %s4637_s13 = sadd.s32 4294967295, %s5089_s12   ;;  %p4641_p0 = scmp.ge.s32.totalorder %s5089_s12, 1  ;;  %s5089_s12 = sphi %s5120_s12, %s13_s12  }
   0x2   : > { %p137_p1 = scmp.lt.s32.totalorder %s5089_s12, 5 }
   0x4   : > { %p138_p2 = pnand %p4641_p0, %p137_p1 }
   0x6   : > { %141 = sbr.rel (%p138_p2) target bundleno = 1042 (0x412), region = 32 }
   0xb   : > { %v5019_v0 = vld [vmem:[%s6878_s1 + $0x8] sm:$0xff]   ;;  %v5091_v1 = vmov 0.0   ;;  %p161_p3 = scmp.lt.s32.totalorder %s4637_s13, 3  ;;  %vm5092_vm0 = vmmov 0   ;;  %vm216_vm1 = vsmask.f32 7424 }
   0xc   : > { %4801 = vmatprep.subr.bf16.mxu0 %v5091_v1  ;;  %4999 = vmatprep.subr.bf16.mxu1 %v5091_v1  ;;  %vm267_vm2 = vcmask 130048   ;;  %v5024_v20 = vld [vmem:[%s6878_s1 + $0x10] sm:$0xff]   ;;  %v5025_v24 = vld [vmem:[%s6878_s1] sm:$0xff]   ;;  %vm452_vm3 = vcmask 1046528   ;;  %v5028_v46 = vld [vmem:[%s6878_s1 + $0x18] sm:$0xff]   ;;  %vm897_vm5 = vcmask 1045504  }
   0xd   : > { %4802 = vmatpush3.bf16.msra.mxu0 %v5019_v0  ;;  %5000 = vmatpush3.bf16.msra.mxu1 %v5019_v0  ;;  %s7012_s13 = smov (!%p161_p3, %s4637_s13), 3  ;;  %v5030_v50 = vld [vmem:[%s6878_s1 + $0x20] sm:$0xff]   ;;  %vm732_vm4 = vsmask.f32 6400  ;;  %s5094_s9 = smov 8   ;;  %vm1342_vm7 = vcmask 1044480  }
   0xe   : > { %4803 = vmatprep.mubr.msk.bf16.mxu0 %vm5092_vm0, %v5091_v1  ;;  %4815 = vmatprep.mubr.msk.bf16.mxu1 %vm5092_vm0, %v5091_v1  ;;  %s5001_s16 = smul.u32 52, %s7012_s13  ;;  %vm1177_vm6 = vsmask.f32 5376  ;;  %s5095_s20 = smov 120   ;;  %vm1986_vm8 = vcmask 64512  }
   0xf   : > { %4845 = vmatprep.subr.bf16.mxu0 %v5091_v1  ;;  %4823 = vmatprep.subr.bf16.mxu1 %v5091_v1  ;;  %s4746_s25 = sshll.u32 %s7012_s13, 6 }
  0x10   : > { %s5145_s19 = scalar_lea.vmem %s6877_s0, %s5001_s16  ;;  %s170_s28 = scalar_lea.vmem %s6880_s3, %s4746_s25 }
  0x11   : > { %v172_v2 = vld [vmem:[%s5145_s19] sm:$0xf]  ;;  %v173_v3 = vld [vmem:[%s5145_s19 + $0x4] sm:$0xf]  ;;  %v5150_v5 = vld [vmem:[%s5145_s19 + $0x8] sm:$0xff]  }
  0x12   : > { %v4647_v4 = vcombine.low %v172_v2, %v173_v3  ;;  %v225_v8 = vshll.u32 %v5150_v5, 16  ;;  %v5154_v9 = vld [vmem:[%s5145_s19 + $0x18] sm:$0xff]   ;;  %v5157_v10 = vld [vmem:[%s5145_s19 + $0x20] sm:$0xff]   ;;  %v5160_v11 = vld [vmem:[%s5145_s19 + $0x10] sm:$0xff]   ;;  %v229_v21 = vshrl.u32 %v5150_v5, 16  ;;  %v454_v48 = vrot.slane %v5150_v5, 1 }
  0x13   : > { %v241_v14 = vshll.u32 %v5154_v9, 16  ;;  %v245_v15 = vshrl.u32 %v5154_v9, 16  ;;  %v249_v16 = vshll.u32 %v5157_v10, 16  ;;  %v5166_v17 = vld [vmem:[%s5145_s19 + $0x28] ss:$0 sps:$4 sm:$0x11]  }
  0x14   : > { %v218_v6 = vshrl.u32 %v4647_v4, 16  ;;  %v220_v7 = vshll.u32 %v4647_v4, 16  ;;  %v227_v13 = vrot.slane %v225_v8, 1  ;;  %v233_v22 = vshll.u32 %v5160_v11, 16  ;;  %v5191_v36 = vld [vmem:[%s5145_s19 + $0x24] sm:$0xff]   ;;  %v5258_v60 = vld [vmem:[%s5145_s19 + $0xc] sm:$0xff]  }
  0x15   : > { %v243_v19 = vrot.slane %v241_v14, 1  ;;  %v251_v23 = vrot.slane %v249_v16, 1  ;;  %v253_v27 = vshrl.u32 %v5157_v10, 16  ;;  %v257_v28 = vshll.u32 %v5166_v17, 16  ;;  %v445_v40 = vld [vmem:[%s5145_s19] sm:$0xe] }
  0x16   : > { %v222_v12 = vrot.slane %v220_v7, 1  ;;  %v231_v30 = vor.u32 %v229_v21, %v227_v13  ;;  %v235_v31 = vrot.slane %v233_v22, 1  ;;  %v237_v35 = vshrl.u32 %v5160_v11, 16  ;;  %v5038_v37 = vld [vmem:[%s5145_s19 + $0x2c] ss:$0 sps:$4 sm:$0x11]  }
  0x17   : > { %v247_v26 = vor.u32 %v245_v15, %v243_v19  ;;  %v255_v32 = vor.u32 %v253_v27, %v251_v23  ;;  %v259_v33 = vrot.slane %v257_v28, 1  ;;  %v617_v41 = vrot.slane %v5191_v36, 1  ;;  %v568_v56 = vld [vmem:[%s5145_s19 + $0x4] sm:$0xe]  ;;  %v5253_v57 = vld [vmem:[%s5145_s19 + $0x8] sm:$0xf] }
  0x18   : > { %v223_v18 = vor.u32 %v222_v12, %v218_v6  ;;  %v236_v34 = vsel %vm216_vm1, %v231_v30, %v235_v31  ;;  %v239_v39 = vor.u32 %v237_v35, %v235_v31  ;;  %v619_v42 = vrot.slane %v5038_v37, 1  ;;  %v5033_v12 = vld [vmem:[%s6878_s1 + $0x28] sm:$0xff]  }
  0x19   : > { %v252_v29 = vsel %vm216_vm1, %v247_v26, %v251_v23  ;;  %v260_v38 = vsel %vm216_vm1, %v255_v32, %v259_v33  ;;  %v4667_v45 = vcombine.low %v445_v40, %v173_v3  ;;  %v456_v51 = vrot.slane %v5160_v11, 1  ;;  %v5295_v23 = vld [vmem:[%s5145_s19 + $0x1c] sm:$0xff]  }
  0x1a   : > { %v228_v25 = vsel %vm216_vm1, %v223_v18, %v227_v13  ;;  %4816 = vmatmul.mubr.msk.bf16.vlgmr.msra.gmra.mxu1 %vm267_vm2, %v252_v29  ;;  %v5206_v43 = vsel %vm452_vm3, %v617_v41, %v619_v42  ;;  %v244_v44 = vsel %vm216_vm1, %v239_v39, %v243_v19  ;;  %v458_v53 = vrot.slane %v5154_v9, 1  ;;  %v5277_v13 = vld [vmem:[%s5145_s19 + $0x14] sm:$0xff]   ;;  %v5319_v39 = vld [vmem:[%s5145_s19 + $0x2c] ss:$0 sps:$4 sm:$0x33]  }
  0x1b   : > { %4804 = vmatmul.mubr.msk.bf16.vlgmr.msra.gmra.mxu0 %vm267_vm2, %v228_v25  ;;  %4824 = vmatpush3.bf16.msra.mxu1 %v5025_v24  ;;  %v453_v47 = vrot.slane %v4667_v45, 1  ;;  %v457_v52 = vsel %vm452_vm3, %v454_v48, %v456_v51  ;;  %v460_v55 = vrot.slane %v5157_v10, 1  ;;  %v4676_v59 = vcombine.low %v568_v56, %v5253_v57  ;;  %v5035_v19 = vld [vmem:[%s6878_s1 + $0x30] sm:$0xff]  }
  0x1c   : > { %4846 = vmatpush3.bf16.msra.mxu0 %v5024_v20  ;;  %4807 = vmatprep.mubr.msk.bf16.mxu0 %vm5092_vm0, %v5091_v1  ;;  %v459_v54 = vsel %vm452_vm3, %v456_v51, %v458_v53  ;;  %v462_v61 = vrot.slane %v5166_v17, 1  ;;  %v742_v0 = vshrl.u32 %v5258_v60, 16  ;;  %v745_v2 = vshll.u32 %v5258_v60, 16  ;;  %v1013_v51 = vld [vmem:[%s5145_s19 + $0x8] sm:$0xc] }
  0x1d   : > { %4889 = vmatprep.subr.bf16.mxu0 %v5091_v1  ;;  %4819 = vmatprep.mubr.msk.bf16.mxu1 %vm5092_vm0, %v5091_v1  ;;  %v455_v49 = vsel %vm452_vm3, %v453_v47, %v454_v48  ;;  %v461_v58 = vsel %vm452_vm3, %v458_v53, %v460_v55  ;;  %v734_v62 = vshrl.u32 %v4676_v59, 16  ;;  %v737_v63 = vshll.u32 %v4676_v59, 16 }
  0x1e   : > { %4867 = vmatprep.subr.bf16.mxu1 %v5091_v1  ;;  %v610_v3 = vrot.slane %v4676_v59, 1  ;;  %v744_v8 = vrot.slane %v742_v0, 1  ;;  %v751_v15 = vshrl.u32 %v5277_v13, 16  ;;  %v754_v16 = vshll.u32 %v5277_v13, 16 }
  0x1f   : > { %v736_v6 = vrot.slane %v734_v62, 1  ;;  %v739_v7 = vrot.slane %v737_v63, 2  ;;  %v613_v17 = vrot.slane %v5277_v13, 1  ;;  %v760_v25 = vshrl.u32 %v5295_v23, 16 }
  0x20   : > { %v753_v20 = vrot.slane %v751_v15, 1  ;;  %v756_v21 = vrot.slane %v754_v16, 2  ;;  %v763_v26 = vshll.u32 %v5295_v23, 16  ;;  %v615_v27 = vrot.slane %v5295_v23, 1 }
  0x21   : > { %v762_v29 = vrot.slane %v760_v25, 1  ;;  %v769_v33 = vshrl.u32 %v5191_v36, 16  ;;  %v781_v45 = vshll.u32 %v5319_v39, 16  ;;  %v903_v16 = vrot.slane %v5295_v23, 2  ;;  %v5412_v23 = vld [vmem:[%s5145_s19 + $0x28] sm:$0xff]  }
  0x22   : > { %4820 = vmatmul.mubr.msk.bf16.gmra.mxu1 %vm267_vm2, %v260_v38  ;;  %v757_v24 = vor.u32 %v756_v21, %v753_v20  ;;  %v765_v30 = vrot.slane %v763_v26, 2  ;;  %v616_v31 = vsel %vm452_vm3, %v613_v17, %v615_v27  ;;  %v618_v40 = vsel %vm452_vm3, %v615_v27, %v617_v41 }
  0x23   : > { %4808 = vmatmul.mubr.msk.bf16.gmra.mxu0 %vm267_vm2, %v236_v34  ;;  %4825 = vmatprep.mubr.msk.bf16.mxu1 %vm5092_vm0, %v5091_v1  ;;  %v772_v34 = vshll.u32 %v5191_v36, 16  ;;  %v771_v37 = vrot.slane %v769_v33, 1  ;;  %v783_v48 = vrot.slane %v781_v45, 2  ;;  %v905_v21 = vrot.slane %v5191_v36, 2 }
  0x24   : > { %4811 = vmatprep.mubr.msk.bf16.mxu0 %vm5092_vm0, %v5091_v1  ;;  %v766_v32 = vor.u32 %v765_v30, %v762_v29  ;;  %v1062_v25 = vrot.slane %v5412_v23, 2  ;;  %v907_v26 = vrot.slane %v5319_v39, 2 }
  0x25   : > { %v774_v38 = vrot.slane %v772_v34, 2 }
  0x26   : > { %v767_v35 = vsel %vm732_vm4, %v757_v24, %v766_v32 }
  0x27   : > { %v775_v42 = vor.u32 %v774_v38, %v771_v37 }
  0x29   : > { %v776_v41 = vsel %vm732_vm4, %v766_v32, %v775_v42  ;;  %v908_v32 = vsel %vm897_vm5, %v905_v21, %v907_v26 }
  0x2a   : > { %4826 = vmatmul.mubr.msk.bf16.vlgmr.msra.gmra.mxu1 %vm267_vm2, %v4647_v4  ;;  %v611_v4 = vrot.slane %v5258_v60, 1 }
  0x2b   : > { %4812 = vmatmul.mubr.msk.bf16.gmra.mxu0 %vm267_vm2, %v244_v44  ;;  %4868 = vmatpush3.bf16.msra.mxu1 %v5028_v46  ;;  %v778_v44 = vshrl.u32 %v5319_v39, 16  ;;  %v890_v46 = vld [vmem:[%s5145_s19 + $0x4] sm:$0xc]  ;;  %v1335_v39 = vld [vmem:[%s5145_s19 + $0x8] sm:$0x8] }
  0x2c   : > { %4847 = vmatprep.mubr.msk.bf16.mxu0 %vm5092_vm0, %v5091_v1  ;;  %4829 = vmatprep.mubr.msk.bf16.mxu1 %vm5092_vm0, %v5091_v1  ;;  %v614_v22 = vsel %vm452_vm3, %v611_v4, %v613_v17 }
  0x2d   : > { %4911 = vmatprep.subr.bf16.mxu1 %v5091_v1  ;;  %v780_v47 = vrot.slane %v778_v44, 1 }
  0x32   : > { %4830 = vmatmul.mubr.msk.bf16.gmra.mxu1 %vm267_vm2, %v5150_v5  ;;  %v463_v5 = vsel %vm452_vm3, %v460_v55, %v462_v61  ;;  %v5093_v55 = vmov 1983009808   ;;  %v5352_v61 = vld [vmem:[%s5145_s19 + $0x10] sm:$0xff]  }
  0x33   : > { %4848 = vmatmul.mubr.msk.bf16.vlgmr.msra.gmra.mxu0 %vm267_vm2, %v455_v49  ;;  %4833 = vmatprep.mubr.msk.bf16.mxu1 %vm5092_vm0, %v5091_v1  ;;  %v4699_v49 = vcombine.low %v890_v46, %v5253_v57  ;;  %v1470_v56 = vunpack.c.l.s4 %v5093_v55  ;;  %v1472_v57 = vlaneseq  ;;  %v1190_v29 = vshll.u32 %v5352_v61, 16 }
  0x34   : > { %4890 = vmatpush3.bf16.msra.mxu0 %v5030_v50  ;;  %4851 = vmatprep.mubr.msk.bf16.mxu0 %vm5092_vm0, %v5091_v1  ;;  %v784_v50 = vor.u32 %v783_v48, %v780_v47 }
  0x35   : > { %4933 = vmatprep.subr.bf16.mxu0 %v5091_v1  ;;  %v898_v53 = vrot.slane %v4699_v49, 2  ;;  %v5354_v62 = vshrl.u32 %v1472_v57, 7  ;;  %v1192_v37 = vrot.slane %v1190_v29, 3 }
  0x3a   : > { %4834 = vmatmul.mubr.msk.bf16.gmra.mxu1 %vm267_vm2, %v5160_v11  ;;  %v612_v11 = vsel %vm452_vm3, %v610_v3, %v611_v4  ;;  %v1056_v4 = vrot.slane %v5352_v61, 2 }
  0x3b   : > { %4852 = vmatmul.mubr.msk.bf16.gmra.mxu0 %vm267_vm2, %v457_v52  ;;  %4837 = vmatprep.mubr.msk.bf16.mxu1 %vm5092_vm0, %v5091_v1  ;;  %v5342_v52 = vld [vmem:[%s5145_s19 + $0xc] sm:$0xf] }
  0x3c   : > { %4855 = vmatprep.mubr.msk.bf16.mxu0 %vm5092_vm0, %v5091_v1  ;;  %v5349_v59 = vcombine.low %v1013_v51, %v5342_v52  ;;  %v1344_v51 = vrot.slane %v5352_v61, 3 }
  0x3e   : > { %v1055_v3 = vrot.slane %v5349_v59, 2  ;;  %v1179_v36 = vshrl.u32 %v5349_v59, 16  ;;  %v1182_v27 = vshll.u32 %v5349_v59, 16 }
  0x40   : > { %v1181_v33 = vrot.slane %v1179_v36, 2  ;;  %v1184_v34 = vrot.slane %v1182_v27, 3 }
  0x42   : > { %4838 = vmatmul.mubr.msk.bf16.gmra.mxu1 %vm267_vm2, %v5154_v9  ;;  %v747_v9 = vrot.slane %v745_v2, 2  ;;  %v4739_v2 = vld [vmem:[%s6879_s2 + $0x3] ss:$0 sm:$0xff] }
  0x43   : > { %4856 = vmatmul.mubr.msk.bf16.gmra.mxu0 %vm267_vm2, %v459_v54  ;;  %4841 = vmatprep.mubr.msk.bf16.mxu1 %vm5092_vm0, %v5091_v1  ;;  %v899_v54 = vrot.slane %v5258_v60, 2  ;;  %v5041_v60 = vld [vmem:[%s6878_s1 + $0x38] sm:$0xff]  }
  0x44   : > { %4859 = vmatprep.mubr.msk.bf16.mxu0 %vm5092_vm0, %v5091_v1  ;;  %v748_v14 = vor.u32 %v747_v9, %v744_v8 }
  0x45   : > { %v900_v63 = vsel %vm897_vm5, %v898_v53, %v899_v54 }
  0x46   : > { %v758_v28 = vsel %vm732_vm4, %v748_v14, %v757_v24  ;;  %v906_v24 = vsel %vm897_vm5, %v903_v16, %v905_v21 }
  0x4a   : > { %4842 = vmatmul.mubr.msk.bf16.gmra.mxu1 %vm267_vm2, %v5157_v10  ;;  %v740_v10 = vor.u32 %v739_v7, %v736_v6  ;;  %v1731_v6 = vcombine.high %v4739_v2, %v4739_v2  ;;  %v901_v7 = vrot.slane %v5277_v13, 2 }
  0x4b   : > { %4860 = vmatmul.mubr.msk.bf16.gmra.mxu0 %vm267_vm2, %v461_v58  ;;  %4869 = vmatprep.mubr.msk.bf16.mxu1 %vm5092_vm0, %v5091_v1  ;;  %v785_v58 = vsel %vm732_vm4, %v775_v42, %v784_v50 }
  0x4c   : > { %4863 = vmatprep.mubr.msk.bf16.mxu0 %vm5092_vm0, %v5091_v1  ;;  %v749_v18 = vsel %vm732_vm4, %v740_v10, %v748_v14  ;;  %v5383_v10 = vld [vmem:[%s5145_s19 + $0x18] sm:$0xff]   ;;  %v902_v13 = vsel %vm897_vm5, %v899_v54, %v901_v7 }
  0x4d   : > { %v1058_v15 = vrot.slane %v5383_v10, 2  ;;  %v1196_v44 = vshrl.u32 %v5383_v10, 16  ;;  %v1199_v45 = vshll.u32 %v5383_v10, 16  ;;  %v1346_v59 = vrot.slane %v5383_v10, 3 }
  0x4f   : > { %v1059_v17 = vsel %vm897_vm5, %v1056_v4, %v1058_v15  ;;  %v1198_v48 = vrot.slane %v1196_v44, 2  ;;  %v1201_v49 = vrot.slane %v1199_v45, 3 }
  0x51   : > { %v1202_v53 = vor.u32 %v1201_v49, %v1198_v48 }
  0x52   : > { %4870 = vmatmul.mubr.msk.bf16.vlgmr.msra.gmra.mxu1 %vm267_vm2, %v612_v11  ;;  %v1057_v11 = vsel %vm897_vm5, %v1055_v3, %v1056_v4 }
  0x53   : > { %4864 = vmatmul.mubr.msk.bf16.gmra.mxu0 %vm267_vm2, %v463_v5  ;;  %4912 = vmatpush3.bf16.msra.mxu1 %v5033_v12  ;;  %v5044_v12 = vld [vmem:[%s6878_s1 + $0x40] sm:$0xff]  }
  0x54   : > { %4891 = vmatprep.mubr.msk.bf16.mxu0 %vm5092_vm0, %v5091_v1  ;;  %4873 = vmatprep.mubr.msk.bf16.mxu1 %vm5092_vm0, %v5091_v1 }
  0x55   : > { %4955 = vmatprep.subr.bf16.mxu1 %v5091_v1 }
  0x5a   : > { %4874 = vmatmul.mubr.msk.bf16.gmra.mxu1 %vm267_vm2, %v614_v22 }
  0x5b   : > { %4892 = vmatmul.mubr.msk.bf16.vlgmr.msra.gmra.mxu0 %vm267_vm2, %v749_v18  ;;  %4877 = vmatprep.mubr.msk.bf16.mxu1 %vm5092_vm0, %v5091_v1  ;;  %v5399_v18 = vld [vmem:[%s5145_s19 + $0x20] sm:$0xff]  }
  0x5c   : > { %4934 = vmatpush3.bf16.msra.mxu0 %v5035_v19  ;;  %4895 = vmatprep.mubr.msk.bf16.mxu0 %vm5092_vm0, %v5091_v1  ;;  %v904_v19 = vsel %vm897_vm5, %v901_v7, %v903_v16  ;;  %v1060_v20 = vrot.slane %v5399_v18, 2  ;;  %v1208_v54 = vshll.u32 %v5399_v18, 16 }
  0x5d   : > { %4977 = vmatprep.subr.bf16.mxu0 %v5091_v1 }
  0x5e   : > { %v1061_v22 = vsel %vm897_vm5, %v1058_v15, %v1060_v20  ;;  %v1063_v30 = vsel %vm897_vm5, %v1060_v20, %v1062_v25  ;;  %v4740_v20 = vld [vmem:[%s6879_s2 + $0x4] ss:$0 sm:$0xff] }
  0x62   : > { %4878 = vmatmul.mubr.msk.bf16.gmra.mxu1 %vm267_vm2, %v616_v31  ;;  %v5048_v31 = vld [vmem:[%s5145_s19 + $0x30] ss:$0 sps:$4 sm:$0x33]  }
  0x63   : > { %4896 = vmatmul.mubr.msk.bf16.gmra.mxu0 %vm267_vm2, %v758_v28  ;;  %4881 = vmatprep.mubr.msk.bf16.mxu1 %vm5092_vm0, %v5091_v1  ;;  %v1187_v28 = vshrl.u32 %v5352_v61, 16  ;;  %v1064_v38 = vrot.slane %v5048_v31, 2 }
  0x64   : > { %4899 = vmatprep.mubr.msk.bf16.mxu0 %vm5092_vm0, %v5091_v1 }
  0x65   : > { %v1065_v46 = vsel %vm897_vm5, %v1062_v25, %v1064_v38 }
  0x6a   : > { %4882 = vmatmul.mubr.msk.bf16.gmra.mxu1 %vm267_vm2, %v618_v40  ;;  %v1185_v40 = vor.u32 %v1184_v34, %v1181_v33 }
  0x6b   : > { %4900 = vmatmul.mubr.msk.bf16.gmra.mxu0 %vm267_vm2, %v767_v35  ;;  %4885 = vmatprep.mubr.msk.bf16.mxu1 %vm5092_vm0, %v5091_v1  ;;  %v1189_v35 = vrot.slane %v1187_v28, 2 }
  0x6c   : > { %4903 = vmatprep.mubr.msk.bf16.mxu0 %vm5092_vm0, %v5091_v1 }
  0x6d   : > { %v1193_v42 = vor.u32 %v1192_v37, %v1189_v35 }
  0x6f   : > { %v1194_v47 = vsel %vm1177_vm6, %v1185_v40, %v1193_v42 }
  0x72   : > { %4886 = vmatmul.mubr.msk.bf16.gmra.mxu1 %vm267_vm2, %v5206_v43  ;;  %v1471_v43 = vunpack.c.0.s8 %v1470_v56  ;;  %v1203_v56 = vsel %vm1177_vm6, %v1193_v42, %v1202_v53 }
  0x73   : > { %4904 = vmatmul.mubr.msk.bf16.gmra.mxu0 %vm267_vm2, %v776_v41  ;;  %4913 = vmatprep.mubr.msk.bf16.mxu1 %vm5092_vm0, %v5091_v1  ;;  %v4731_v41 = vcombine.low %v1335_v39, %v5342_v52  ;;  %v1205_v52 = vshrl.u32 %v5399_v18, 16 }
  0x74   : > { %4907 = vmatprep.mubr.msk.bf16.mxu0 %vm5092_vm0, %v5091_v1  ;;  %v5361_v0 = vsub.s32 %v1471_v43, %v5354_v62  ;;  %v1214_v43 = vshrl.u32 %v5412_v23, 16 }
  0x75   : > { %v1343_v50 = vrot.slane %v4731_v41, 3  ;;  %v1207_v57 = vrot.slane %v1205_v52, 2 }
  0x76   : > { %v1738_v5 = vrot.slane %v4739_v2, %v5361_v0  ;;  %v1745_v8 = vrot.slane %v1731_v6, %v5361_v0  ;;  %v1216_v3 = vrot.slane %v1214_v43, 2  ;;  %v1348_v6 = vrot.slane %v5399_v18, 3 }
  0x77   : > { %v1345_v55 = vsel %vm1342_vm7, %v1343_v50, %v1344_v51  ;;  %v2912_v21 = vrot.slane %v4740_v20, %v5361_v0 }
  0x78   : > { %1748 = vrot.lane.b32.xlu0 %v1738_v5, %s5094_s9  ;;  %v1746_v9 = vcombine.high %v1738_v5, %v1738_v5  ;;  %1752 = vrot.lane.b32.xlu1 %v1745_v8, %s5094_s9  ;;  %v1747_v14 = vcombine.high %v1745_v8, %v1745_v8  ;;  %v5050_v5 = vld [vmem:[%s5145_s19 + $0x30] ss:$0 sps:$4 sm:$0x77]  }
  0x79   : > { %v1223_v8 = vshrl.u32 %v5050_v5, 16  ;;  %v1352_v18 = vrot.slane %v5050_v5, 3 }
  0x7a   : > { %4914 = vmatmul.mubr.msk.bf16.vlgmr.msra.gmra.mxu1 %vm267_vm2, %v900_v63  ;;  %v1217_v63 = vshll.u32 %v5412_v23, 16 }
  0x7b   : > { %4908 = vmatmul.mubr.msk.bf16.gmra.mxu0 %vm267_vm2, %v785_v58  ;;  %4956 = vmatpush3.bf16.msra.mxu1 %v5041_v60  ;;  %v1210_v58 = vrot.slane %v1208_v54, 3  ;;  %v1347_v60 = vsel %vm1342_vm7, %v1344_v51, %v1346_v59  ;;  %v1225_v10 = vrot.slane %v1223_v8, 2 }
  0x7c   : > { %4935 = vmatprep.mubr.msk.bf16.mxu0 %vm5092_vm0, %v5091_v1  ;;  %4917 = vmatprep.mubr.msk.bf16.mxu1 %vm5092_vm0, %v5091_v1  ;;  %v1219_v4 = vrot.slane %v1217_v63, 3 }
  0x7d   : > { %1750 = vrot.lane.b32.xlu0 %v1746_v9, %s5094_s9  ;;  %1754 = vrot.lane.b32.xlu1 %v1747_v14, %s5094_s9  ;;  %v1211_v61 = vor.u32 %v1210_v58, %v1207_v57  ;;  %v1226_v9 = vshll.u32 %v5050_v5, 16 }
  0x7e   : > { %v1220_v7 = vor.u32 %v1219_v4, %v1216_v3 }
  0x7f   : > { %v1212_v2 = vsel %vm1177_vm6, %v1202_v53, %v1211_v61  ;;  %v1228_v14 = vrot.slane %v1226_v9, 3 }
  0x81   : > { %v1229_v15 = vor.u32 %v1228_v14, %v1225_v10  ;;  %2922 = vrot.lane.b32.xlu1 %v2912_v21, %s5094_s9 }
  0x82   : > { %4918 = vmatmul.mubr.msk.bf16.gmra.mxu1 %vm267_vm2, %v902_v13  ;;  %v1350_v13 = vrot.slane %v5412_v23, 3 }
  0x83   : > { %4936 = vmatmul.mubr.msk.bf16.vlgmr.msra.gmra.mxu0 %vm267_vm2, %v1057_v11  ;;  %4921 = vmatprep.mubr.msk.bf16.mxu1 %vm5092_vm0, %v5091_v1  ;;  %v1349_v11 = vsel %vm1342_vm7, %v1346_v59, %v1348_v6 }
  0x84   : > { %4978 = vmatpush3.bf16.msra.mxu0 %v5044_v12  ;;  %4939 = vmatprep.mubr.msk.bf16.mxu0 %vm5092_vm0, %v5091_v1  ;;  %v1221_v12 = vsel %vm1177_vm6, %v1211_v61, %v1220_v7  ;;  %v1351_v16 = vsel %vm1342_vm7, %v1348_v6, %v1350_v13 }
  0x8a   : > { %4922 = vmatmul.mubr.msk.bf16.gmra.mxu1 %vm267_vm2, %v904_v19  ;;  %v1353_v19 = vsel %vm1342_vm7, %v1350_v13, %v1352_v18 }
  0x8b   : > { %4940 = vmatmul.mubr.msk.bf16.gmra.mxu0 %vm267_vm2, %v1059_v17  ;;  %4925 = vmatprep.mubr.msk.bf16.mxu1 %vm5092_vm0, %v5091_v1  ;;  %v1230_v17 = vsel %vm1177_vm6, %v1220_v7, %v1229_v15 }
  0x8c   : > { %4943 = vmatprep.mubr.msk.bf16.mxu0 %vm5092_vm0, %v5091_v1 }
  0x92   : > { %4926 = vmatmul.mubr.msk.bf16.gmra.mxu1 %vm267_vm2, %v906_v24  ;;  %v4741_v24 = vld [vmem:[%s6879_s2 + $0x5] ss:$0 sm:$0xff] }
  0x93   : > { %4944 = vmatmul.mubr.msk.bf16.gmra.mxu0 %vm267_vm2, %v1061_v22  ;;  %4929 = vmatprep.mubr.msk.bf16.mxu1 %vm5092_vm0, %v5091_v1  ;;  %v2905_v22 = vcombine.high %v4740_v20, %v4740_v20  ;;  %v2978_v25 = vrot.slane %v4741_v24, %v5361_v0  ;;  %v2971_v36 = vcombine.high %v4741_v24, %v4741_v24 }
  0x94   : > { %4947 = vmatprep.mubr.msk.bf16.mxu0 %vm5092_vm0, %v5091_v1 }
  0x95   : > { %v2919_v23 = vrot.slane %v2905_v22, %v5361_v0  ;;  %v2986_v26 = vcombine.high %v2978_v25, %v2978_v25  ;;  %v2985_v27 = vrot.slane %v2971_v36, %v5361_v0 }
  0x97   : > { %2926 = vrot.lane.b32.xlu1 %v2919_v23, %s5094_s9  ;;  %v2987_v28 = vcombine.high %v2985_v27, %v2985_v27 }
  0x9a   : > { %4930 = vmatmul.mubr.msk.bf16.gmra.mxu1 %vm267_vm2, %v908_v32 }
  0x9b   : > { %4948 = vmatmul.mubr.msk.bf16.gmra.mxu0 %vm267_vm2, %v1063_v30  ;;  %4957 = vmatprep.mubr.msk.bf16.mxu1 %vm5092_vm0, %v5091_v1 }
  0x9c   : > { %4951 = vmatprep.mubr.msk.bf16.mxu0 %vm5092_vm0, %v5091_v1 }
  0xa2   : > { %4958 = vmatmul.mubr.msk.bf16.vlgmr.msra.gmra.mxu1 %vm267_vm2, %v1194_v47 }
  0xa3   : > { %4952 = vmatmul.mubr.msk.bf16.gmra.mxu0 %vm267_vm2, %v1065_v46  ;;  %4961 = vmatprep.mubr.msk.bf16.mxu1 %vm5092_vm0, %v5091_v1 }
  0xa4   : > { %4979 = vmatprep.mubr.msk.bf16.mxu0 %vm5092_vm0, %v5091_v1 }
  0xaa   : > { %4962 = vmatmul.mubr.msk.bf16.gmra.mxu1 %vm267_vm2, %v1203_v56 }
  0xab   : > { %4980 = vmatmul.mubr.msk.bf16.vlgmr.msra.gmra.mxu0 %vm267_vm2, %v1345_v55  ;;  %4965 = vmatprep.mubr.msk.bf16.mxu1 %vm5092_vm0, %v5091_v1  ;;  %v2920_v55 = vcombine.high %v2912_v21, %v2912_v21 }
  0xac   : > { %4983 = vmatprep.mubr.msk.bf16.mxu0 %vm5092_vm0, %v5091_v1 }
  0xad   : > { %2924 = vrot.lane.b32.xlu0 %v2920_v55, %s5094_s9 }
  0xb1   : > { %2988 = vrot.lane.b32.xlu0 %v2978_v25, %s5094_s9 }
  0xb2   : > { %4966 = vmatmul.mubr.msk.bf16.gmra.mxu1 %vm267_vm2, %v1212_v2 }
  0xb3   : > { %4984 = vmatmul.mubr.msk.bf16.gmra.mxu0 %vm267_vm2, %v1347_v60  ;;  %4969 = vmatprep.mubr.msk.bf16.mxu1 %vm5092_vm0, %v5091_v1 }
  0xb4   : > { %4987 = vmatprep.mubr.msk.bf16.mxu0 %vm5092_vm0, %v5091_v1 }
  0xb5   : > { %2992 = vrot.lane.b32.xlu0 %v2985_v27, %s5094_s9 }
  0xba   : > { %4970 = vmatmul.mubr.msk.bf16.gmra.mxu1 %vm267_vm2, %v1221_v12 }
  0xbb   : > { %4988 = vmatmul.mubr.msk.bf16.gmra.mxu0 %vm267_vm2, %v1349_v11  ;;  %4973 = vmatprep.mubr.msk.bf16.mxu1 %vm5092_vm0, %v5091_v1 }
  0xbc   : > { %4991 = vmatprep.mubr.msk.bf16.mxu0 %vm5092_vm0, %v5091_v1 }
  0xc2   : > { %4974 = vmatmul.mubr.msk.bf16.gmra.mxu1 %vm267_vm2, %v1230_v17 }
  0xc3   : > { %4992 = vmatmul.mubr.msk.bf16.gmra.mxu0 %vm267_vm2, %v1351_v16 }
  0xc4   : > { %4995 = vmatprep.mubr.msk.bf16.mxu0 %vm5092_vm0, %v5091_v1  ;;  %v2921_v1 = vcombine.high %v2919_v23, %v2919_v23 }
  0xc6   : > { %2928 = vrot.lane.b32.xlu1 %v2921_v1, %s5094_s9 }
  0xca   : > { %2990 = vrot.lane.b32.xlu1 %v2986_v26, %s5094_s9 }
  0xcb   : > { %4996 = vmatmul.mubr.msk.bf16.gmra.mxu0 %vm267_vm2, %v1353_v19 }
  0xce   : > { %2994 = vrot.lane.b32.xlu1 %v2987_v28, %s5094_s9 }
  0xda   : > { %v341_v30 = vpop.f32.mrf.mxu1 }
  0xdb   : > { %v317_v29 = vpop.f32.mrf.mxu0 }
  0xdc   : > { %v4817_v32 = vpop.f32.mrf.mxu1 }
  0xdd   : > { %v4805_v31 = vpop.f32.mrf.mxu0 }
  0xde   : > { %v344_v34 = vpop.f32.mrf.mxu1 }
  0xdf   : > { %v320_v33 = vpop.f32.mrf.mxu0 }
  0xe0   : > { %v4818_v37 = vpop.f32.mrf.mxu1 }
  0xe1   : > { %v4806_v35 = vpop.f32.mrf.mxu0 }
  0xe2   : > { %v349_v39 = vpop.f32.mrf.mxu1 }
  0xe3   : > { %v325_v38 = vpop.f32.mrf.mxu0 }
  0xe4   : > { %v4821_v42 = vpop.f32.mrf.mxu1 }
  0xe5   : > { %v4809_v40 = vpop.f32.mrf.mxu0 }
  0xe6   : > { %v5504_v45 = vpop.f32.mrf.mxu1 }
  0xe7   : > { %v328_v44 = vpop.f32.mrf.mxu0 }
  0xe8   : > { %v4822_v41 = vpop.f32.mrf.mxu1 }
  0xe9   : > { %v4810_v46 = vpop.f32.mrf.mxu0 }
  0xea   : > { %v406_v48 = vpop.f32.mrf.mxu1 }
  0xeb   : > { %v333_v47 = vpop.f32.mrf.mxu0  ;;  %v407_v50 = vadd.f32 %v406_v48, %v317_v29 }
  0xec   : > { %v4827_v51 = vpop.f32.mrf.mxu1 }
  0xed   : > { %v4813_v49 = vpop.f32.mrf.mxu0 }
  0xee   : > { %v409_v52 = vpop.f32.mrf.mxu1 }
  0xef   : > { %v336_v53 = vpop.f32.mrf.mxu0  ;;  %v410_v56 = vadd.f32 %v409_v52, %v320_v33 }
  0xf0   : > { %v4828_v57 = vpop.f32.mrf.mxu1 }
  0xf1   : > { %v4814_v54 = vpop.f32.mrf.mxu0 }
  0xf2   : > { %v414_v61 = vpop.f32.mrf.mxu1 }
  0xf3   : > { %v519_v58 = vpop.f32.mrf.mxu0  ;;  %v415_v63 = vadd.f32 %v414_v61, %v325_v38 }
  0xf4   : > { %v558_v59 = vadd.f32 %v519_v58, %v407_v50  ;;  %v4831_v60 = vpop.f32.mrf.mxu1 }
  0xf5   : > { %v4849_v43 = vpop.f32.mrf.mxu0 }
  0xf6   : > { %v417_v4 = vpop.f32.mrf.mxu1 }
  0xf7   : > { %v522_v2 = vpop.f32.mrf.mxu0  ;;  %v418_v6 = vadd.f32 %v417_v4, %v328_v44 }
  0xf8   : > { %v559_v3 = vadd.f32 %v522_v2, %v410_v56  ;;  %v4832_v7 = vpop.f32.mrf.mxu1 }
  0xf9   : > { %v4850_v5 = vpop.f32.mrf.mxu0 }
  0xfa   : > { %v422_v11 = vpop.f32.mrf.mxu1 }
  0xfb   : > { %v527_v8 = vpop.f32.mrf.mxu0  ;;  %v423_v10 = vadd.f32 %v422_v11, %v333_v47 }
  0xfc   : > { %v560_v9 = vadd.f32 %v527_v8, %v415_v63  ;;  %v4835_v14 = vpop.f32.mrf.mxu1 }
  0xfd   : > { %v4853_v12 = vpop.f32.mrf.mxu0 }
  0xfe   : > { %v425_v16 = vpop.f32.mrf.mxu1 }
  0xff   : > { %v530_v13 = vpop.f32.mrf.mxu0  ;;  %v426_v18 = vadd.f32 %v425_v16, %v336_v53 }
 0x100   : > { %v561_v15 = vadd.f32 %v530_v13, %v418_v6  ;;  %v4836_v19 = vpop.f32.mrf.mxu1 }
 0x101   : > { %v4854_v17 = vpop.f32.mrf.mxu0 }
 0x102   : > { %v430_v22 = vpop.f32.mrf.mxu1 }
 0x103   : > { %v535_v20 = vpop.f32.mrf.mxu0  ;;  %v431_v1 = vadd.f32 %v430_v22, %v341_v30 }
 0x104   : > { %v562_v21 = vadd.f32 %v535_v20, %v423_v10  ;;  %v4839_v24 = vpop.f32.mrf.mxu1 }
 0x105   : > { %v4857_v23 = vpop.f32.mrf.mxu0 }
 0x106   : > { %v433_v36 = vpop.f32.mrf.mxu1 }
 0x107   : > { %v538_v25 = vpop.f32.mrf.mxu0  ;;  %v434_v28 = vadd.f32 %v433_v36, %v344_v34 }
 0x108   : > { %v563_v26 = vadd.f32 %v538_v25, %v426_v18  ;;  %v4840_v29 = vpop.f32.mrf.mxu1 }
 0x109   : > { %v4858_v27 = vpop.f32.mrf.mxu0 }
 0x10a   : > { %v438_v33 = vpop.f32.mrf.mxu1 }
 0x10b   : > { %v543_v31 = vpop.f32.mrf.mxu0  ;;  %v439_v37 = vadd.f32 %v438_v33, %v349_v39 }
 0x10c   : > { %v564_v32 = vadd.f32 %v543_v31, %v431_v1  ;;  %v4843_v38 = vpop.f32.mrf.mxu1 }
 0x10d   : > { %v4861_v35 = vpop.f32.mrf.mxu0 }
 0x10e   : > { %v441_v44 = vpop.f32.mrf.mxu1 }
 0x10f   : > { %v546_v40 = vpop.f32.mrf.mxu0  ;;  %v442_v41 = vadd.f32 %v441_v44, %v5504_v45 }
 0x110   : > { %v565_v42 = vadd.f32 %v546_v40, %v434_v28  ;;  %v4844_v30 = vpop.f32.mrf.mxu1 }
 0x111   : > { %v4862_v46 = vpop.f32.mrf.mxu0 }
 0x112   : > { %v676_v49 = vpop.f32.mrf.mxu1 }
 0x113   : > { %v551_v47 = vpop.f32.mrf.mxu0  ;;  %v715_v51 = vadd.f32 %v676_v49, %v558_v59 }
 0x114   : > { %v566_v48 = vadd.f32 %v551_v47, %v439_v37  ;;  %v4871_v34 = vpop.f32.mrf.mxu1 }
 0x115   : > { %v4865_v50 = vpop.f32.mrf.mxu0 }
 0x116   : > { %v679_v54 = vpop.f32.mrf.mxu1 }
 0x117   : > { %v554_v53 = vpop.f32.mrf.mxu0  ;;  %v716_v56 = vadd.f32 %v679_v54, %v559_v3 }
 0x118   : > { %v567_v52 = vadd.f32 %v554_v53, %v442_v41  ;;  %v4872_v39 = vpop.f32.mrf.mxu1 }
 0x119   : > { %v4866_v55 = vpop.f32.mrf.mxu0 }
 0x11a   : > { %v684_v61 = vpop.f32.mrf.mxu1 }
 0x11b   : > { %v841_v57 = vpop.f32.mrf.mxu0  ;;  %v717_v63 = vadd.f32 %v684_v61, %v560_v9 }
 0x11c   : > { %v5510_v58 = vadd.f32 %v841_v57, %v715_v51  ;;  %v4875_v45 = vpop.f32.mrf.mxu1 }
 0x11d   : > { %v4893_v43 = vpop.f32.mrf.mxu0 }
 0x11e   : > { %v687_v4 = vpop.f32.mrf.mxu1 }
 0x11f   : > { %v844_v60 = vpop.f32.mrf.mxu0  ;;  %v718_v6 = vadd.f32 %v687_v4, %v561_v15 }
 0x120   : > { %v881_v2 = vadd.f32 %v844_v60, %v716_v56  ;;  %v4876_v59 = vpop.f32.mrf.mxu1 }
 0x121   : > { %v4894_v5 = vpop.f32.mrf.mxu0 }
 0x122   : > { %v692_v11 = vpop.f32.mrf.mxu1 }
 0x123   : > { %v849_v7 = vpop.f32.mrf.mxu0  ;;  %v719_v10 = vadd.f32 %v692_v11, %v562_v21 }
 0x124   : > { %v882_v8 = vadd.f32 %v849_v7, %v717_v63  ;;  %v4879_v3 = vpop.f32.mrf.mxu1 }
 0x125   : > { %v4897_v12 = vpop.f32.mrf.mxu0 }
 0x126   : > { %v695_v16 = vpop.f32.mrf.mxu1 }
 0x127   : > { %v852_v14 = vpop.f32.mrf.mxu0  ;;  %v720_v18 = vadd.f32 %v695_v16, %v563_v26 }
 0x128   : > { %v883_v13 = vadd.f32 %v852_v14, %v718_v6  ;;  %v4880_v19 = vpop.f32.mrf.mxu1 }
 0x129   : > { %v4898_v17 = vpop.f32.mrf.mxu0 }
 0x12a   : > { %v700_v22 = vpop.f32.mrf.mxu1 }
 0x12b   : > { %v857_v9 = vpop.f32.mrf.mxu0  ;;  %v721_v1 = vadd.f32 %v700_v22, %v564_v32 }
 0x12c   : > { %v884_v20 = vadd.f32 %v857_v9, %v719_v10  ;;  %v4883_v24 = vpop.f32.mrf.mxu1 }
 0x12d   : > { %v4901_v23 = vpop.f32.mrf.mxu0 }
 0x12e   : > { %v703_v36 = vpop.f32.mrf.mxu1 }
 0x12f   : > { %v860_v15 = vpop.f32.mrf.mxu0  ;;  %v722_v28 = vadd.f32 %v703_v36, %v565_v42 }
 0x130   : > { %v885_v25 = vadd.f32 %v860_v15, %v720_v18  ;;  %v4884_v29 = vpop.f32.mrf.mxu1 }
 0x131   : > { %v4902_v27 = vpop.f32.mrf.mxu0 }
 0x132   : > { %v708_v33 = vpop.f32.mrf.mxu1 }
 0x133   : > { %v865_v21 = vpop.f32.mrf.mxu0  ;;  %v723_v37 = vadd.f32 %v708_v33, %v566_v48 }
 0x134   : > { %v886_v31 = vadd.f32 %v865_v21, %v721_v1  ;;  %v4887_v38 = vpop.f32.mrf.mxu1 }
 0x135   : > { %v4905_v35 = vpop.f32.mrf.mxu0 }
 0x136   : > { %v711_v44 = vpop.f32.mrf.mxu1 }
 0x137   : > { %v868_v26 = vpop.f32.mrf.mxu0  ;;  %v724_v41 = vadd.f32 %v711_v44, %v567_v52 }
 0x138   : > { %v887_v40 = vadd.f32 %v868_v26, %v722_v28  ;;  %v4888_v30 = vpop.f32.mrf.mxu1 }
 0x139   : > { %v4906_v46 = vpop.f32.mrf.mxu0 }
 0x13a   : > { %v964_v49 = vpop.f32.mrf.mxu1 }
 0x13b   : > { %v873_v32 = vpop.f32.mrf.mxu0  ;;  %v1003_v30 = vadd.f32 %v964_v49, %v5510_v58 }
 0x13c   : > { %v888_v47 = vadd.f32 %v873_v32, %v723_v37  ;;  %v4915_v51 = vpop.f32.mrf.mxu1 }
 0x13d   : > { %v4909_v50 = vpop.f32.mrf.mxu0 }
 0x13e   : > { %v967_v53 = vpop.f32.mrf.mxu1 }
 0x13f   : > { %v876_v34 = vpop.f32.mrf.mxu0  ;;  %v5512_v55 = vadd.f32 %v967_v53, %v881_v2 }
 0x140   : > { %v889_v42 = vadd.f32 %v876_v34, %v724_v41  ;;  %v4916_v56 = vpop.f32.mrf.mxu1 }
 0x141   : > { %v4910_v54 = vpop.f32.mrf.mxu0  ;;  %v5538_v56 = vpop.permute.xlu0 %1748 }
 0x142   : > { %v972_v39 = vpop.f32.mrf.mxu1  ;;  %v4738_v54 = vld [vmem:[%s6879_s2] ss:$0 sm:$0xff] }
 0x143   : > { %v1121_v48 = vpop.f32.mrf.mxu0  ;;  %v5514_v61 = vadd.f32 %v972_v39, %v882_v8  ;;  %v5540_v39 = vpop.permute.xlu1 %1752  ;;  %v1672_v58 = vcombine.high %v4738_v54, %v4738_v54 }
 0x144   : > { %v4919_v43 = vpop.f32.mrf.mxu1  ;;  %v1160_v51 = vadd.f32 %v1121_v48, %v1003_v30 }
 0x145   : > { %v4937_v57 = vpop.f32.mrf.mxu0 }
 0x146   : > { %v975_v63 = vpop.f32.mrf.mxu1 }
 0x147   : > { %v5516_v52 = vpop.f32.mrf.mxu0  ;;  %v1006_v60 = vadd.f32 %v975_v63, %v883_v13 }
 0x148   : > { %v4920_v4 = vpop.f32.mrf.mxu1 }
 0x149   : > { %v4938_v45 = vpop.f32.mrf.mxu0  ;;  %v5544_v4 = vrot.slane %v4738_v54, %v5361_v0 }
 0x14a   : > { %v980_v6 = vpop.f32.mrf.mxu1 }
 0x14b   : > { %v5518_v5 = vpop.f32.mrf.mxu0  ;;  %v1007_v7 = vadd.f32 %v980_v6, %v884_v20 }
 0x14c   : > { %v4923_v2 = vpop.f32.mrf.mxu1 }
 0x14d   : > { %v4941_v59 = vpop.f32.mrf.mxu0 }
 0x14e   : > { %v983_v10 = vpop.f32.mrf.mxu1 }
 0x14f   : > { %v1132_v11 = vpop.f32.mrf.mxu0  ;;  %v1008_v8 = vadd.f32 %v983_v10, %v885_v25  ;;  %v5550_v10 = vpop.permute.xlu0 %1750 }
 0x150   : > { %v5520_v12 = vadd.f32 %v1132_v11, %v1006_v60  ;;  %v4924_v14 = vpop.f32.mrf.mxu1  ;;  %v5548_v11 = vrot.slane %v1672_v58, %v5361_v0 }
 0x151   : > { %v4942_v3 = vpop.f32.mrf.mxu0 }
 0x152   : > { %v988_v18 = vpop.f32.mrf.mxu1  ;;  %v5552_v3 = vpop.permute.xlu1 %1754 }
 0x153   : > { %v1137_v16 = vpop.f32.mrf.mxu0  ;;  %v1009_v13 = vadd.f32 %v988_v18, %v886_v31  ;;  %v5558_v18 = vcombine.high %v5544_v4, %v5544_v4 }
 0x154   : > { %v5522_v17 = vadd.f32 %v1137_v16, %v1007_v7  ;;  %v4927_v9 = vpop.f32.mrf.mxu1 }
 0x155   : > { %v4945_v19 = vpop.f32.mrf.mxu0 }
 0x156   : > { %v991_v1 = vpop.f32.mrf.mxu1 }
 0x157   : > { %v1140_v22 = vpop.f32.mrf.mxu0  ;;  %v1010_v24 = vadd.f32 %v991_v1, %v887_v40  ;;  %v5568_v1 = vcombine.high %v5548_v11, %v5548_v11 }
 0x158   : > { %v5524_v23 = vadd.f32 %v1140_v22, %v1008_v8  ;;  %v4928_v15 = vpop.f32.mrf.mxu1 }
 0x159   : > { %v4946_v20 = vpop.f32.mrf.mxu0  ;;  %v1161_v15 = vadd.f32 %v5516_v52, %v5512_v55 }
 0x15a   : > { %v996_v28 = vpop.f32.mrf.mxu1 }
 0x15b   : > { %v1145_v36 = vpop.f32.mrf.mxu0  ;;  %v1011_v29 = vadd.f32 %v996_v28, %v888_v47 }
 0x15c   : > { %v5526_v27 = vadd.f32 %v1145_v36, %v1009_v13  ;;  %v4931_v21 = vpop.f32.mrf.mxu1 }
 0x15d   : > { %v4949_v25 = vpop.f32.mrf.mxu0 }
 0x15e   : > { %v999_v37 = vpop.f32.mrf.mxu1 }
 0x15f   : > { %v1148_v33 = vpop.f32.mrf.mxu0  ;;  %v1012_v38 = vadd.f32 %v999_v37, %v889_v42 }
 0x160   : > { %v5528_v35 = vadd.f32 %v1148_v33, %v1010_v24  ;;  %v4932_v26 = vpop.f32.mrf.mxu1 }
 0x161   : > { %v4950_v31 = vpop.f32.mrf.mxu0 }
 0x162   : > { %v1286_v41 = vpop.f32.mrf.mxu1 }
 0x163   : > { %v1153_v44 = vpop.f32.mrf.mxu0  ;;  %v1325_v42 = vadd.f32 %v1286_v41, %v1160_v51 }
 0x164   : > { %v5530_v46 = vadd.f32 %v1153_v44, %v1011_v29  ;;  %v4959_v32 = vpop.f32.mrf.mxu1 }
 0x165   : > { %v4953_v40 = vpop.f32.mrf.mxu0 }
 0x166   : > { %v1289_v47 = vpop.f32.mrf.mxu1 }
 0x167   : > { %v1156_v50 = vpop.f32.mrf.mxu0  ;;  %v1326_v33 = vadd.f32 %v1289_v47, %v1161_v15 }
 0x168   : > { %v5533_v34 = vadd.f32 %v1156_v50, %v1012_v38  ;;  %v4960_v57 = vpop.f32.mrf.mxu1 }
 0x169   : > { %v4954_v53 = vpop.f32.mrf.mxu0  ;;  %v1162_v57 = vadd.f32 %v5518_v5, %v5514_v61 }
 0x16a   : > { %v1294_v49 = vpop.f32.mrf.mxu1 }
 0x16b   : > { %v1409_v43 = vpop.f32.mrf.mxu0 }
 0x16c   : > { %v1448_v63 = vadd.f32 %v1409_v43, %v1325_v42  ;;  %v4963_v6 = vpop.f32.mrf.mxu1 }
 0x16d   : > { %v4981_v45 = vpop.f32.mrf.mxu0  ;;  %v1327_v6 = vadd.f32 %v1294_v49, %v1162_v57 }
 0x16e   : > { %v1468_v48 = vcombine.high %v1448_v63, %v1448_v63  ;;  %v1475_v60 = vrot.slane %v1448_v63, %v5361_v0  ;;  %v5554_v8 = vpop.f32.mrf.mxu1 }
 0x16f   : > { %v1412_v59 = vpop.f32.mrf.mxu0 }
 0x170   : > { %v1482_v7 = vrot.slane %v1468_v48, %v5361_v0  ;;  %v1483_v2 = vcombine.high %v1475_v60, %v1475_v60  ;;  %v4964_v19 = vpop.f32.mrf.mxu1  ;;  %v5561_v9 = vadd.f32 %v5538_v56, %v1475_v60  ;;  %v5592_v55 = vadd.f32 %v5544_v4, %v1475_v60 }
 0x171   : > { %v4982_v14 = vpop.f32.mrf.mxu0  ;;  %v1449_v52 = vadd.f32 %v1412_v59, %v1326_v33 }
 0x172   : > { %v1484_v16 = vcombine.high %v1482_v7, %v1482_v7  ;;  %6924 = vst [vmem:[#allocation2_spill] sm:$0xff] %v5561_v9  ;;  %v5564_v22 = vadd.f32 %v5550_v10, %v1483_v2  ;;  %v5571_v20 = vadd.f32 %v5540_v39, %v1482_v7  ;;  %v1302_v36 = vpop.f32.mrf.mxu1  ;;  %v5584_v37 = vadd.f32 %v5558_v18, %v1483_v2 }
 0x173   : > { %v1417_v13 = vpop.f32.mrf.mxu0  ;;  %v1329_v29 = vadd.f32 %v1302_v36, %v5522_v17  ;;  %v5597_v30 = vadd.f32 %v5548_v11, %v1482_v7  ;;  %v1485_v43 = vcombine.high %v1449_v52, %v1449_v52  ;;  %v1492_v33 = vrot.slane %v1449_v52, %v5361_v0 }
 0x174   : > { %6925 = vst [vmem:[#allocation3_spill] sm:$0xff] %v5564_v22  ;;  %6926 = vst [vmem:[#allocation4_spill] sm:$0xff] %v5571_v20  ;;  %v5574_v24 = vadd.f32 %v5552_v3, %v1484_v16  ;;  %v1826_v25 = vcombine.low %v5561_v9, %v5564_v22  ;;  %v4967_v31 = vpop.f32.mrf.mxu1  ;;  %v5589_v26 = vadd.f32 %v5568_v1, %v1484_v16 }
 0x175   : > { %v4985_v28 = vpop.f32.mrf.mxu0  ;;  %v3066_v53 = vcombine.low %v5592_v55, %v5584_v37  ;;  %v1499_v49 = vrot.slane %v1485_v43, %v5361_v0 }
 0x176   : > { %6927 = vst [vmem:[#allocation5_spill] sm:$0xff] %v5574_v24  ;;  %v1827_v21 = vcombine.low %v5571_v20, %v5574_v24  ;;  %v1305_v44 = vpop.f32.mrf.mxu1  ;;  %v1834_v17 = vrot.slane %v1826_v25, %v5361_v0  ;;  %v3067_v42 = vcombine.low %v5597_v30, %v5589_v26  ;;  %v2023_v52 = vmul.f32 %v5574_v24, %v5574_v24 }
 0x177   : > { %v5586_v38 = vpop.f32.mrf.mxu0  ;;  %v1330_v32 = vadd.f32 %v1305_v44, %v5524_v23  ;;  %v3074_v7 = vrot.slane %v3066_v53, %v5361_v0 }
 0x178   : > { %v1841_v40 = vrot.slane %v1827_v21, %v5361_v0  ;;  %v4968_v50 = vpop.f32.mrf.mxu1  ;;  %v3081_v60 = vrot.slane %v3067_v42, %v5361_v0 }
 0x179   : > { %v4986_v41 = vpop.f32.mrf.mxu0 }
 0x17a   : > { %v1842_v47 = vcombine.low %v1834_v17, %v1841_v40  ;;  %v1310_v63 = vpop.f32.mrf.mxu1  ;;  %v3082_v14 = vcombine.low %v3074_v7, %v3081_v60  ;;  %v1501_v40 = vcombine.high %v1499_v49, %v1499_v49  ;;  %v2020_v60 = vmul.f32 %v5561_v9, %v5561_v9 }
 0x17b   : > { %v1425_v51 = vpop.f32.mrf.mxu0  ;;  %v1331_v23 = vadd.f32 %v1310_v63, %v5526_v27  ;;  %v5620_v27 = vadd.f32 %v1417_v13, %v1327_v6 }
 0x17c   : > { %v1452_v54 = vadd.f32 %v1425_v51, %v1329_v29  ;;  %1962 = vrot.lane.b32.xlu0 %v1842_v47, %s5095_s20  ;;  %v4971_v59 = vpop.f32.mrf.mxu1  ;;  %v3210_v28 = vsel %vm1986_vm8, %v3082_v14, 0.0 }
 0x17d   : > { %v4989_v58 = vpop.f32.mrf.mxu0  ;;  %3211 = vadd.xlane.f32.xlu1 %v3210_v28  ;;  %v1509_v44 = vrot.slane %v5620_v27, %v5361_v0 }
 0x17e   : > { %v1535_v45 = vcombine.high %v1452_v54, %v1452_v54  ;;  %v5609_v48 = vrot.slane %v1452_v54, %v5361_v0  ;;  %v1313_v16 = vpop.f32.mrf.mxu1  ;;  %v1500_v54 = vcombine.high %v1492_v33, %v1492_v33  ;;  %v2021_v58 = vmul.f32 %v5564_v22, %v5564_v22 }
 0x17f   : > { %v1428_v2 = vpop.f32.mrf.mxu0  ;;  %v1332_v25 = vadd.f32 %v1313_v16, %v5528_v35 }
 0x180   : > { %v5614_v61 = vrot.slane %v1535_v45, %v5361_v0  ;;  %v5618_v5 = vadd.f32 %v5550_v10, %v5609_v48  ;;  %v5622_v19 = vadd.f32 %v1428_v2, %v1330_v32  ;;  %v4972_v13 = vpop.f32.mrf.mxu1  ;;  %v5664_v45 = vadd.f32 %v5552_v3, %v1509_v44 }
 0x181   : > { %v4990_v15 = vpop.f32.mrf.mxu0  ;;  %v5677_v28 = vadd.f32 %v5538_v56, %v1500_v54 }
 0x182   : > { %6928 = vst [vmem:[#allocation6_spill] sm:$0xff] %v5618_v5  ;;  %v5627_v36 = vadd.f32 %v5568_v1, %v5614_v61  ;;  %v5633_v29 = vrot.slane %v5622_v19, %v5361_v0  ;;  %v1318_v17 = vpop.f32.mrf.mxu1  ;;  %6932 = vst [vmem:[#allocation10_spill] sm:$0xff] %v5664_v45 }
 0x183   : > { %v1433_v21 = vpop.f32.mrf.mxu0  ;;  %v1333_v32 = vadd.f32 %v1318_v17, %v5530_v46  ;;  %v2022_v46 = vmul.f32 %v5571_v20, %v5571_v20  ;;  %6934 = vst [vmem:[#allocation12_spill] sm:$0xff] %v5677_v28  ;;  %v5689_v17 = vadd.f32 %v5550_v10, %v1499_v49 }
 0x184   : > { %6929 = vst [vmem:[#allocation7_spill] sm:$0xff] %v5627_v36  ;;  %v5636_v31 = vadd.f32 %v1433_v21, %v1331_v23  ;;  %v5642_v41 = vcombine.high %v5633_v29, %v5633_v29  ;;  %v4975_v47 = vpop.f32.mrf.mxu1  ;;  %v5661_v23 = vadd.f32 %v5540_v39, %v1501_v40 }
 0x185   : > { %v4993_v35 = vpop.f32.mrf.mxu0  ;;  %v2085_v6 = vcombine.low %v2022_v46, %v2023_v52  ;;  %6935 = vst [vmem:[#allocation13_spill] sm:$0xff] %v5689_v17 }
 0x186   : > { %v1568_v50 = vcombine.high %v5636_v31, %v5636_v31  ;;  %v5651_v51 = vadd.f32 %v5550_v10, %v5642_v41  ;;  %v1321_v43 = vpop.f32.mrf.mxu1  ;;  %6931 = vst [vmem:[#allocation9_spill] sm:$0xff] %v5661_v23  ;;  %v1844_v47 = vcombine.low %v5661_v23, %v5664_v45 }
 0x187   : > { %v1436_v53 = vpop.f32.mrf.mxu0  ;;  %v1334_v7 = vadd.f32 %v1321_v43, %v5533_v34  ;;  %v2084_v34 = vcombine.low %v2020_v60, %v2021_v58  ;;  %v1843_v58 = vcombine.low %v5677_v28, %v5689_v17 }
 0x188   : > { %6930 = vst [vmem:[#allocation8_spill] sm:$0xff] %v5651_v51  ;;  %v5654_v42 = vrot.slane %v1568_v50, %v5361_v0  ;;  %v1455_v57 = vadd.f32 %v1436_v53, %v1332_v25  ;;  %v4976_v15 = vpop.f32.mrf.mxu1  ;;  %v2099_v50 = vrot.slane %v2085_v6, %v5361_v0  ;;  %v5703_v53 = vadd.f32 %v5544_v4, %v1500_v54 }
 0x189   : > { %v4994_v63 = vpop.f32.mrf.mxu0  ;;  %v2092_v43 = vrot.slane %v2084_v34, %v5361_v0  ;;  %v5717_v6 = vadd.f32 %v5558_v18, %v1499_v49  ;;  %v1858_v34 = vrot.slane %v1844_v47, %v5361_v0  ;;  %v5732_v49 = vadd.f32 %v5568_v1, %v1509_v44 }
 0x18a   : > { %v5670_v59 = vadd.f32 %v5550_v10, %v5654_v42  ;;  %v1585_v2 = vcombine.high %v1455_v57, %v1455_v57  ;;  %v5674_v14 = vrot.slane %v1455_v57, %v5361_v0  ;;  %6936 = vst [vmem:[#allocation14_spill] sm:$0xff] %v5703_v53  ;;  %v1851_v47 = vrot.slane %v1843_v58, %v5361_v0 }
 0x18b   : > { %v1441_v16 = vpop.f32.mrf.mxu0  ;;  %v2100_v15 = vcombine.low %v2092_v43, %v2099_v50  ;;  %6938 = vst [vmem:[#allocation16_spill] sm:$0xff] %v5732_v49  ;;  %v3083_v9 = vcombine.low %v5703_v53, %v5717_v6 }
 0x18c   : > { %6933 = vst [vmem:[#allocation11_spill] sm:$0xff] %v5670_v59  ;;  %v5679_v25 = vadd.f32 %v1441_v16, %v1333_v32  ;;  %v5682_v13 = vrot.slane %v1585_v2, %v5361_v0  ;;  %v5686_v21 = vadd.f32 %v5568_v1, %v5674_v14  ;;  %v3242_v2 = vmul.f32 %v5592_v55, %v5592_v55 }
 0x18d   : > { %v4997_v33 = vpop.f32.mrf.mxu0  ;;  %v3243_v16 = vmul.f32 %v5584_v37, %v5584_v37 }
 0x18e   : > { %v5693_v35 = vrot.slane %v5679_v25, %v5361_v0  ;;  %v5697_v32 = vcombine.high %v5682_v13, %v5682_v13  ;;  %2220 = vrot.lane.b32.xlu1 %v2100_v15, %s5095_s20 }
 0x18f   : > { %v1444_v52 = vpop.f32.mrf.mxu0  ;;  %v3306_v20 = vcombine.low %v3242_v2, %v3243_v16  ;;  %v1859_v16 = vcombine.low %v1851_v47, %v1858_v34  ;;  %v1328_v34 = vadd.f32 %v5554_v8, %v5520_v12  ;;  %v2027_v8 = vmul.f32 %v5664_v45, %v5664_v45 }
 0x190   : > { %v5707_v57 = vcombine.high %v5693_v35, %v5693_v35  ;;  %v5711_v46 = vadd.f32 %v5550_v10, %v5697_v32  ;;  %v1457_v63 = vadd.f32 %v1444_v52, %v1334_v7  ;;  %v3244_v52 = vmul.f32 %v5597_v30, %v5597_v30 }
 0x191   : > { %v4998_v60 = vpop.f32.mrf.mxu0  ;;  %v3314_v15 = vrot.slane %v3306_v20, %v5361_v0  ;;  %v1551_v20 = vcombine.high %v5622_v19, %v5622_v19 }
 0x192   : > { %6937 = vst [vmem:[#allocation15_spill] sm:$0xff] %v5711_v46  ;;  %v5721_v54 = vadd.f32 %v5568_v1, %v5707_v57  ;;  %v1618_v33 = vcombine.high %v1457_v63, %v1457_v63  ;;  %v5728_v7 = vrot.slane %v1457_v63, %v5361_v0  ;;  %v3245_v60 = vmul.f32 %v5589_v26, %v5589_v26 }
 0x193   : > { %v5748_v63 = vadd.f32 %v5548_v11, %v1501_v40  ;;  %1964 = vrot.lane.b32.xlu1 %v1859_v16, %s5095_s20  ;;  %v3091_v40 = vrot.slane %v3083_v9, %v5361_v0  ;;  %v1502_v9 = vcombine.high %v5620_v27, %v5620_v27  ;;  %v2024_v27 = vmul.f32 %v5677_v28, %v5677_v28 }
 0x194   : > { %v5740_v50 = vrot.slane %v1618_v33, %v5361_v0  ;;  %v5744_v43 = vadd.f32 %v5550_v10, %v5728_v7  ;;  %v3307_v44 = vcombine.low %v3244_v52, %v3245_v60 }
 0x195   : > { %6940 = vst [vmem:[#allocation18_spill] sm:$0xff] %v5748_v63  ;;  %v3084_v24 = vcombine.low %v5748_v63, %v5732_v49 }
 0x196   : > { %6939 = vst [vmem:[#allocation17_spill] sm:$0xff] %v5744_v43  ;;  %v5754_v2 = vadd.f32 %v5568_v1, %v5740_v50  ;;  %v3321_v33 = vrot.slane %v3307_v44, %v5361_v0  ;;  %v1451_v44 = vadd.f32 %v5586_v38, %v1328_v34  ;;  %v2026_v38 = vmul.f32 %v5661_v23, %v5661_v23 }
 0x197   : > { %v3098_v52 = vrot.slane %v3084_v24, %v5361_v0  ;;  %v5773_v24 = vrot.slane %v1551_v20, %v5361_v0  ;;  %v3246_v20 = vmul.f32 %v5703_v53, %v5703_v53 }
 0x198   : > { %v3322_v58 = vcombine.low %v3314_v15, %v3321_v33  ;;  %v1525_v16 = vrot.slane %v1451_v44, %v5361_v0  ;;  %v1516_v15 = vrot.slane %v1502_v9, %v5361_v0  ;;  %v2025_v33 = vmul.f32 %v5689_v17, %v5689_v17 }
 0x199   : > { %v3099_v22 = vcombine.low %v3091_v40, %v3098_v52  ;;  %v5779_v12 = vcombine.high %v5773_v24, %v5773_v24  ;;  %v3248_v40 = vmul.f32 %v5748_v63, %v5748_v63  ;;  %v3249_v52 = vmul.f32 %v5732_v49, %v5732_v49 }
 0x19a   : > { %v3450_v60 = vsel %vm1986_vm8, %v3322_v58, 0.0  ;;  %v1517_v19 = vcombine.high %v1516_v15, %v1516_v15  ;;  %v2102_v34 = vcombine.low %v2026_v38, %v2027_v8  ;;  %v5808_v23 = vadd.f32 %v5540_v39, %v1525_v16 }
 0x19b   : > { %3451 = vadd.xlane.f32.xlu0 %v3450_v60  ;;  %v3213_v47 = vsel %vm1986_vm8, %v3099_v22, 0.0  ;;  %v1533_v22 = vcombine.high %v1525_v16, %v1525_v16  ;;  %v5791_v58 = vadd.f32 %v5568_v1, %v5779_v12  ;;  %v2101_v28 = vcombine.low %v2024_v27, %v2025_v33 }
 0x19c   : > { %v5805_v9 = vadd.f32 %v5550_v10, %v1517_v19  ;;  %6943 = vst [vmem:[#allocation21_spill] sm:$0xff] %v5808_v23  ;;  %v3324_v17 = vcombine.low %v3248_v40, %v3249_v52  ;;  %v5814_v63 = vadd.f32 %v5538_v56, %v1516_v15  ;;  %v2116_v8 = vrot.slane %v2102_v34, %v5361_v0 }
 0x19d   : > { %v5798_v60 = vadd.f32 %v5552_v3, %v1533_v22  ;;  %v5811_v45 = vadd.f32 %v5568_v1, %v1533_v22  ;;  %v5820_v53 = vadd.f32 %v5548_v11, %v1525_v16  ;;  %v5823_v49 = vadd.f32 %v5558_v18, %v1517_v19 }
 0x19e   : > { %6942 = vst [vmem:[#allocation20_spill] sm:$0xff] %v5805_v9  ;;  %6944 = vst [vmem:[#allocation22_spill] sm:$0xff] %v5814_v63  ;;  %v2109_v27 = vrot.slane %v2101_v28, %v5361_v0  ;;  %v1860_v1 = vcombine.low %v5814_v63, %v5805_v9  ;;  %v5829_v22 = vadd.f32 %v5544_v4, %v1516_v15 }
 0x19f   : > { %3214 = vadd.xlane.f32.xlu0 %v3213_v47  ;;  %6941 = vst [vmem:[#allocation19_spill] sm:$0xff] %v5798_v60  ;;  %v3247_v47 = vmul.f32 %v5717_v6, %v5717_v6  ;;  %v1861_v38 = vcombine.low %v5808_v23, %v5798_v60  ;;  %v3338_v33 = vrot.slane %v3324_v17, %v5361_v0 }
 0x1a0   : > { %v3101_v40 = vcombine.low %v5820_v53, %v5811_v45  ;;  %v2117_v52 = vcombine.low %v2109_v27, %v2116_v8  ;;  %v3100_v19 = vcombine.low %v5829_v22, %v5823_v49  ;;  %v1868_v28 = vrot.slane %v1860_v1, %v5361_v0 }
 0x1a1   : > { %v3323_v10 = vcombine.low %v3246_v20, %v3247_v47  ;;  %v1875_v16 = vrot.slane %v1861_v38, %v5361_v0  ;;  %v1550_v1 = vcombine.high %v5609_v48, %v5609_v48 }
 0x1a2   : > { %v3115_v15 = vrot.slane %v3101_v40, %v5361_v0  ;;  %v3108_v17 = vrot.slane %v3100_v19, %v5361_v0  ;;  %v5859_v19 = vadd.f32 %v5552_v3, %v5614_v61 }
 0x1a3   : > { %v3331_v34 = vrot.slane %v3323_v10, %v5361_v0  ;;  %v1876_v47 = vcombine.low %v1868_v28, %v1875_v16  ;;  %v1518_v10 = vcombine.high %v1451_v44, %v1451_v44  ;;  %v2029_v16 = vmul.f32 %v5805_v9, %v5805_v9 }
 0x1a4   : > { %v3116_v38 = vcombine.low %v3108_v17, %v3115_v15  ;;  %v5855_v44 = vadd.f32 %v5540_v39, %v1550_v1  ;;  %6946 = vst [vmem:[#allocation24_spill] sm:$0xff] %v5859_v19  ;;  %v2028_v28 = vmul.f32 %v5814_v63, %v5814_v63  ;;  %v3253_v15 = vmul.f32 %v5811_v45, %v5811_v45 }
 0x1a5   : > { %v3339_v20 = vcombine.low %v3331_v34, %v3338_v33  ;;  %v2031_v33 = vmul.f32 %v5798_v60, %v5798_v60  ;;  %v2030_v34 = vmul.f32 %v5808_v23, %v5808_v23 }
 0x1a6   : > { %v3216_v27 = vsel %vm1986_vm8, %v3116_v38, 0.0  ;;  %6945 = vst [vmem:[#allocation23_spill] sm:$0xff] %v5855_v44  ;;  %v2118_v17 = vcombine.low %v2028_v28, %v2029_v16  ;;  %v3252_v38 = vmul.f32 %v5820_v53, %v5820_v53  ;;  %v3250_v16 = vmul.f32 %v5829_v22, %v5829_v22 }
 0x1a7   : > { %v3453_v8 = vsel %vm1986_vm8, %v3339_v20, 0.0  ;;  %v2119_v20 = vcombine.low %v2030_v34, %v2031_v33  ;;  %v5880_v33 = vadd.f32 %v5548_v11, %v1550_v1  ;;  %v5896_v1 = vadd.f32 %v5558_v18, %v5609_v48 }
 0x1a8   : > { %v3341_v34 = vcombine.low %v3252_v38, %v3253_v15  ;;  %v2126_v28 = vrot.slane %v2118_v17, %v5361_v0 }
 0x1a9   : > { %v2133_v61 = vrot.slane %v2119_v20, %v5361_v0  ;;  %6948 = vst [vmem:[#allocation26_spill] sm:$0xff] %v5880_v33 }
 0x1aa   : > { %v3355_v60 = vrot.slane %v3341_v34, %v5361_v0 }
 0x1ab   : > { %v2134_v15 = vcombine.low %v2126_v28, %v2133_v61 }
 0x1b5   : > { %2222 = vrot.lane.b32.xlu0 %v2117_v52, %s5095_s20  ;;  %v1532_v52 = vrot.slane %v1518_v10, %v5361_v0  ;;  %v1878_v10 = vcombine.low %v5855_v44, %v5859_v19 }
 0x1b7   : > { %3454 = vadd.xlane.f32.xlu1 %v3453_v8  ;;  %v1534_v40 = vcombine.high %v1532_v52, %v1532_v52  ;;  %v3251_v8 = vmul.f32 %v5823_v49, %v5823_v49  ;;  %v2035_v52 = vmul.f32 %v5859_v19, %v5859_v19  ;;  %v1892_v17 = vrot.slane %v1878_v10, %v5361_v0 }
 0x1b9   : > { %1966 = vrot.lane.b32.xlu0 %v1876_v47, %s5095_s20  ;;  %v5866_v47 = vadd.f32 %v5538_v56, %v1534_v40  ;;  %v5892_v19 = vadd.f32 %v5544_v4, %v1534_v40  ;;  %v3340_v63 = vcombine.low %v3250_v16, %v3251_v8  ;;  %v3257_v40 = vmul.f32 %v5627_v36, %v5627_v36 }
 0x1bb   : > { %3217 = vadd.xlane.f32.xlu1 %v3216_v27  ;;  %6947 = vst [vmem:[#allocation25_spill] sm:$0xff] %v5866_v47  ;;  %v2034_v27 = vmul.f32 %v5855_v44, %v5855_v44  ;;  %v1877_v20 = vcombine.low %v5866_v47, %v5618_v5  ;;  %v2032_v23 = vmul.f32 %v5866_v47, %v5866_v47  ;;  %6949 = vst [vmem:[#allocation27_spill] sm:$0xff] %v5892_v19 }
 0x1bc   : > { %v2033_v44 = vmul.f32 %v5618_v5, %v5618_v5  ;;  %v3118_v47 = vcombine.low %v5880_v33, %v5627_v36  ;;  %v3256_v5 = vmul.f32 %v5880_v33, %v5880_v33  ;;  %v3348_v61 = vrot.slane %v3340_v63, %v5361_v0 }
 0x1bd   : > { %v2136_v38 = vcombine.low %v2034_v27, %v2035_v52  ;;  %v1885_v48 = vrot.slane %v1877_v20, %v5361_v0  ;;  %v3117_v10 = vcombine.low %v5892_v19, %v5896_v1  ;;  %v3254_v27 = vmul.f32 %v5892_v19, %v5892_v19 }
 0x1be   : > { %v2135_v8 = vcombine.low %v2032_v23, %v2033_v44  ;;  %v3255_v52 = vmul.f32 %v5896_v1, %v5896_v1  ;;  %v3356_v28 = vcombine.low %v3348_v61, %v3355_v60  ;;  %v3358_v9 = vcombine.low %v3256_v5, %v3257_v40 }
 0x1bf   : > { %v1893_v16 = vcombine.low %v1885_v48, %v1892_v17  ;;  %v2150_v34 = vrot.slane %v2136_v38, %v5361_v0  ;;  %v3125_v63 = vrot.slane %v3117_v10, %v5361_v0  ;;  %v5928_v38 = vadd.f32 %v5552_v3, %v5779_v12 }
 0x1c0   : > { %v2143_v23 = vrot.slane %v2135_v8, %v5361_v0  ;;  %v3357_v44 = vcombine.low %v3254_v27, %v3255_v52  ;;  %v3456_v33 = vsel %vm1986_vm8, %v3356_v28, 0.0  ;;  %v3372_v36 = vrot.slane %v3358_v9, %v5361_v0 }
 0x1c1   : > { %6950 = vst [vmem:[#allocation28_spill] sm:$0xff] %v5928_v38  ;;  %v5932_v40 = vadd.f32 %v5540_v39, %v5773_v24  ;;  %v5936_v9 = vadd.f32 %v5538_v56, %v5633_v29  ;;  %v5948_v12 = vadd.f32 %v5548_v11, %v5773_v24  ;;  %v2037_v8 = vmul.f32 %v5651_v51, %v5651_v51 }
 0x1c2   : > { %v2151_v20 = vcombine.low %v2143_v23, %v2150_v34  ;;  %v3365_v60 = vrot.slane %v3357_v44, %v5361_v0  ;;  %v5958_v10 = vadd.f32 %v5544_v4, %v5633_v29  ;;  %v3261_v24 = vmul.f32 %v5791_v58, %v5791_v58 }
 0x1c3   : > { %6951 = vst [vmem:[#allocation29_spill] sm:$0xff] %v5932_v40  ;;  %6952 = vst [vmem:[#allocation30_spill] sm:$0xff] %v5936_v9  ;;  %v1894_v48 = vcombine.low %v5936_v9, %v5651_v51  ;;  %v2038_v61 = vmul.f32 %v5932_v40, %v5932_v40  ;;  %v2036_v52 = vmul.f32 %v5936_v9, %v5936_v9 }
 0x1c4   : > { %v3260_v29 = vmul.f32 %v5948_v12, %v5948_v12  ;;  %v3258_v44 = vmul.f32 %v5958_v10, %v5958_v10 }
 0x1c5   : > { %v2152_v23 = vcombine.low %v2036_v52, %v2037_v8  ;;  %v1584_v52 = vcombine.high %v5654_v42, %v5654_v42 }
 0x1cc   : > { %2224 = vrot.lane.b32.xlu1 %v2134_v15, %s5095_s20  ;;  %v3132_v15 = vrot.slane %v3118_v47, %v5361_v0  ;;  %v3373_v47 = vcombine.low %v3365_v60, %v3372_v36  ;;  %v2039_v36 = vmul.f32 %v5928_v38, %v5928_v38 }
 0x1ce   : > { %v3133_v19 = vcombine.low %v3125_v63, %v3132_v15  ;;  %v3459_v17 = vsel %vm1986_vm8, %v3373_v47, 0.0  ;;  %v1902_v15 = vrot.slane %v1894_v48, %v5361_v0 }
 0x1d0   : > { %1968 = vrot.lane.b32.xlu1 %v1893_v16, %s5095_s20  ;;  %v3219_v5 = vsel %vm1986_vm8, %v3133_v19, 0.0  ;;  %v1895_v19 = vcombine.low %v5932_v40, %v5928_v38  ;;  %v2153_v16 = vcombine.low %v2038_v61, %v2039_v36 }
 0x1d2   : > { %v1909_v27 = vrot.slane %v1895_v19, %v5361_v0  ;;  %v2160_v19 = vrot.slane %v2152_v23, %v5361_v0 }
 0x1d4   : > { %2226 = vrot.lane.b32.xlu1 %v2151_v20, %s5095_s20  ;;  %v3375_v20 = vcombine.low %v3260_v29, %v3261_v24  ;;  %v1910_v60 = vcombine.low %v1902_v15, %v1909_v27  ;;  %v1575_v27 = vrot.slane %v5636_v31, %v5361_v0  ;;  %v5993_v29 = vadd.f32 %v5540_v39, %v1584_v52 }
 0x1d5   : > { %v5997_v15 = vadd.f32 %v5552_v3, %v5674_v14 }
 0x1d6   : > { %v3389_v48 = vrot.slane %v3375_v20, %v5361_v0  ;;  %6953 = vst [vmem:[#allocation31_spill] sm:$0xff] %v5993_v29 }
 0x1d7   : > { %6954 = vst [vmem:[#allocation32_spill] sm:$0xff] %v5997_v15  ;;  %v2043_v31 = vmul.f32 %v5997_v15, %v5997_v15 }
 0x1d8   : > { %3457 = vadd.xlane.f32.xlu0 %v3456_v33  ;;  %v5944_v33 = vadd.f32 %v5558_v18, %v5642_v41  ;;  %v3135_v41 = vcombine.low %v5948_v12, %v5791_v58 }
 0x1da   : > { %v3134_v34 = vcombine.low %v5958_v10, %v5944_v33  ;;  %v3259_v28 = vmul.f32 %v5944_v33, %v5944_v33  ;;  %v3149_v63 = vrot.slane %v3135_v41, %v5361_v0 }
 0x1dc   : > { %3220 = vadd.xlane.f32.xlu0 %v3219_v5  ;;  %v2167_v5 = vrot.slane %v2153_v16, %v5361_v0  ;;  %v3142_v47 = vrot.slane %v3134_v34, %v5361_v0  ;;  %v1583_v34 = vcombine.high %v1575_v27, %v1575_v27 }
 0x1de   : > { %v3150_v36 = vcombine.low %v3142_v47, %v3149_v63  ;;  %v2168_v8 = vcombine.low %v2160_v19, %v2167_v5  ;;  %v6000_v23 = vadd.f32 %v5538_v56, %v1583_v34  ;;  %v1912_v63 = vcombine.low %v5993_v29, %v5997_v15 }
 0x1df   : > { %v2041_v47 = vmul.f32 %v5670_v59, %v5670_v59  ;;  %v6024_v19 = vadd.f32 %v5558_v18, %v5654_v42 }
 0x1e0   : > { %3460 = vadd.xlane.f32.xlu0 %v3459_v17  ;;  %v3374_v17 = vcombine.low %v3258_v44, %v3259_v28  ;;  %v3222_v41 = vsel %vm1986_vm8, %v3150_v36, 0.0  ;;  %v5990_v28 = vpop.permute.xlu1 %2922  ;;  %6955 = vst [vmem:[#allocation33_spill] sm:$0xff] %v6000_v23  ;;  %v2042_v44 = vmul.f32 %v5993_v29, %v5993_v29  ;;  %v2040_v14 = vmul.f32 %v6000_v23, %v6000_v23 }
 0x1e1   : > { %v1911_v5 = vcombine.low %v6000_v23, %v5670_v59  ;;  %v1926_v36 = vrot.slane %v1912_v63, %v5361_v0 }
 0x1e2   : > { %v3382_v61 = vrot.slane %v3374_v17, %v5361_v0  ;;  %v6020_v17 = vadd.f32 %v5544_v4, %v1583_v34  ;;  %v2169_v27 = vcombine.low %v2040_v14, %v2041_v47 }
 0x1e4   : > { %v3390_v24 = vcombine.low %v3382_v61, %v3389_v48  ;;  %v6008_v20 = vpop.permute.xlu1 %2926  ;;  %v2170_v48 = vcombine.low %v2042_v44, %v2043_v31  ;;  %v3151_v42 = vcombine.low %v6020_v17, %v6024_v19  ;;  %v3262_v34 = vmul.f32 %v6020_v17, %v6020_v17 }
 0x1e5   : > { %6956 = vst [vmem:[#allocation34_spill] sm:$0xff] %v6008_v20  ;;  %v3263_v31 = vmul.f32 %v6024_v19, %v6024_v19  ;;  %v2177_v14 = vrot.slane %v2169_v27, %v5361_v0 }
 0x1e6   : > { %v3462_v16 = vsel %vm1986_vm8, %v3390_v24, 0.0  ;;  %v1919_v24 = vrot.slane %v1911_v5, %v5361_v0  ;;  %v2184_v44 = vrot.slane %v2170_v48, %v5361_v0  ;;  %v3159_v47 = vrot.slane %v3151_v42, %v5361_v0 }
 0x1e7   : > { %v3391_v15 = vcombine.low %v3262_v34, %v3263_v31 }
 0x1e8   : > { %v1927_v63 = vcombine.low %v1919_v24, %v1926_v36  ;;  %v2185_v23 = vcombine.low %v2177_v14, %v2184_v44  ;;  %v6088_v14 = vadd.f32 %v5538_v56, %v5682_v13 }
 0x1e9   : > { %v3399_v48 = vrot.slane %v3391_v15, %v5361_v0 }
 0x1ea   : > { %6963 = vst [vmem:[#allocation41_spill] sm:$0xff] %v6088_v14 }
 0x1f6   : > { %1970 = vrot.lane.b32.xlu0 %v1910_v60, %s5095_s20  ;;  %v6011_v60 = vadd.f32 %v5548_v11, %v1584_v52  ;;  %v6034_v52 = vpop.permute.xlu1 %2928 }
 0x1f8   : > { %3223 = vadd.xlane.f32.xlu1 %v3222_v41  ;;  %v3264_v61 = vmul.f32 %v6011_v60, %v6011_v60  ;;  %v3265_v41 = vmul.f32 %v5686_v21, %v5686_v21 }
 0x1fa   : > { %2228 = vrot.lane.b32.xlu0 %v2168_v8, %s5095_s20  ;;  %v3152_v8 = vcombine.low %v6011_v60, %v5686_v21  ;;  %v3392_v5 = vcombine.low %v3264_v61, %v3265_v41  ;;  %v6049_v59 = vpop.permute.xlu1 %2990 }
 0x1fb   : > { %6957 = vst [vmem:[#allocation35_spill] sm:$0xff] %v6049_v59 }
 0x1fc   : > { %3463 = vadd.xlane.f32.xlu1 %v3462_v16  ;;  %v6036_v16 = vpop.permute.xlu0 %2924  ;;  %v3166_v29 = vrot.slane %v3152_v8, %v5361_v0  ;;  %v3406_v36 = vrot.slane %v3392_v5, %v5361_v0  ;;  %v6080_v5 = vadd.f32 %v5558_v18, %v5697_v32 }
 0x1fe   : > { %v3167_v9 = vcombine.low %v3159_v47, %v3166_v29  ;;  %v3407_v61 = vcombine.low %v3399_v48, %v3406_v36  ;;  %v6057_v41 = vpop.permute.xlu1 %2994  ;;  %v6092_v47 = vadd.f32 %v5548_v11, %v5693_v35  ;;  %v5096_v48 = vmov 842150450  }
 0x1ff   : > { %6959 = vst [vmem:[#allocation37_spill] sm:$0xff] %v6057_v41 }
 0x200   : > { %v6051_v40 = vpop.permute.xlu0 %2988  ;;  %v3225_v8 = vsel %vm1986_vm8, %v3167_v9, 0.0  ;;  %v3465_v27 = vsel %vm1986_vm8, %v3407_v61, 0.0  ;;  %v6072_v9 = vadd.f32 %v5540_v39, %v5693_v35  ;;  %v5097_v61 = vmov 1987475062  }
 0x201   : > { %6958 = vst [vmem:[#allocation36_spill] sm:$0xff] %v6051_v40 }
 0x202   : > { %6962 = vst [vmem:[#allocation40_spill] sm:$0xff] %v6072_v9 }
 0x204   : > { %v6059_v24 = vpop.permute.xlu0 %2992 }
 0x205   : > { %6960 = vst [vmem:[#allocation38_spill] sm:$0xff] %v6059_v24 }
 0x206   : > { %v3212_v42 = vpop.xlane.xlu1 %3211 }
 0x207   : > { %v6064_v29 = vmul.f32 0.125, %v3212_v42  ;;  %v5098_v42 = vmov 269488144  }
 0x208   : > { %v6062_v34 = vpop.permute.xlu0 %1962  ;;  %v2301_v32 = vunpack.c.l.s4 %v5098_v42 }
 0x20d   : > { %1972 = vrot.lane.b32.xlu1 %v1927_v63, %s5095_s20  ;;  %v3482_v63 = vmul.f32 %v6064_v29, %v6064_v29 }
 0x211   : > { %2230 = vrot.lane.b32.xlu1 %v2185_v23, %s5095_s20  ;;  %v6068_v23 = vadd.f32 %v5552_v3, %v5707_v57  ;;  %v6084_v57 = vadd.f32 %v5544_v4, %v5682_v13  ;;  %v1928_v13 = vcombine.low %v6088_v14, %v5711_v46 }
 0x213   : > { %6961 = vst [vmem:[#allocation39_spill] sm:$0xff] %v6068_v23  ;;  %v1929_v44 = vcombine.low %v6072_v9, %v6068_v23  ;;  %v2047_v24 = vmul.f32 %v6068_v23, %v6068_v23  ;;  %v3168_v35 = vcombine.low %v6084_v57, %v6080_v5  ;;  %v2044_v23 = vmul.f32 %v6088_v14, %v6088_v14 }
 0x214   : > { %v1936_v20 = vrot.slane %v1928_v13, %v5361_v0 }
 0x215   : > { %v1943_v41 = vrot.slane %v1929_v44, %v5361_v0 }
 0x217   : > { %v1944_v13 = vcombine.low %v1936_v20, %v1943_v41 }
 0x219   : > { %3226 = vadd.xlane.f32.xlu0 %v3225_v8  ;;  %v2308_v8 = vunpack.c.l.s4 %v5096_v48  ;;  %v3269_v48 = vmul.f32 %v5721_v54, %v5721_v54 }
 0x21d   : > { %3466 = vadd.xlane.f32.xlu0 %v3465_v27  ;;  %v2322_v27 = vunpack.c.l.s4 %v5097_v61  ;;  %v2309_v61 = vunpack.c.0.s8 %v2308_v8  ;;  %v3266_v8 = vmul.f32 %v6084_v57, %v6084_v57 }
 0x21f   : > { %v2323_v42 = vunpack.c.0.s8 %v2322_v27 }
 0x224   : > { %v3452_v15 = vpop.xlane.xlu0 %3451 }
 0x225   : > { %v3474_v31 = vmul.f32 0.125, %v3452_v15  ;;  %v5099_v15 = vmov 1414812756  }
 0x226   : > { %v2315_v38 = vunpack.c.l.s4 %v5099_v15  ;;  %v2302_v15 = vunpack.c.0.s8 %v2301_v32 }
 0x227   : > { %v3490_v36 = vsub.f32 %v3474_v31, %v3482_v63  ;;  %v3169_v31 = vcombine.low %v6092_v47, %v5721_v54  ;;  %v2045_v63 = vmul.f32 %v5711_v46, %v5711_v46  ;;  %v3268_v46 = vmul.f32 %v6092_v47, %v6092_v47 }
 0x228   : > { %v2316_v44 = vunpack.c.0.s8 %v2315_v38  ;;  %v6120_v38 = vsub.s32 %v2309_v61, %v5354_v62  ;;  %v6126_v32 = vsub.s32 %v2302_v15, %v5354_v62 }
 0x229   : > { %v3794_v51 = vadd.f32 1e-05, %v3490_v36  ;;  %v2046_v36 = vmul.f32 %v6072_v9, %v6072_v9  ;;  %v3183_v9 = vrot.slane %v3169_v31, %v5361_v0  ;;  %v2186_v40 = vcombine.low %v2044_v23, %v2045_v63 }
 0x22a   : > { %v3409_v27 = vcombine.low %v3268_v46, %v3269_v48  ;;  %v3176_v31 = vrot.slane %v3168_v35, %v5361_v0  ;;  %v3512_v20 = vrot.slane %v6064_v29, %v6126_v32 }
 0x22b   : > { %5051 = vrsqrt.f32 %v3794_v51  ;;  %v2187_v59 = vcombine.low %v2046_v36, %v2047_v24  ;;  %v3267_v51 = vmul.f32 %v6080_v5, %v6080_v5  ;;  %v6123_v24 = vsub.s32 %v2323_v42, %v5354_v62 }
 0x22c   : > { %v6129_v36 = vsub.s32 %v2316_v44, %v5354_v62  ;;  %v3184_v46 = vcombine.low %v3176_v31, %v3183_v9  ;;  %v2194_v48 = vrot.slane %v2186_v40, %v5361_v0  ;;  %v3423_v61 = vrot.slane %v3409_v27, %v5361_v0 }
 0x22d   : > { %v2201_v23 = vrot.slane %v2187_v59, %v5361_v0  ;;  %v3408_v63 = vcombine.low %v3266_v8, %v3267_v51  ;;  %v3519_v42 = vrot.slane %v6064_v29, %v6120_v38  ;;  %v3533_v62 = vrot.slane %v6064_v29, %v6123_v24 }
 0x22e   : > { %v3526_v59 = vrot.slane %v6064_v29, %v6129_v36  ;;  %v1601_v40 = vcombine.high %v5679_v25, %v5679_v25  ;;  %v3228_v9 = vsel %vm1986_vm8, %v3184_v46, 0.0  ;;  %v3762_v27 = vsub.f32 %v5592_v55, %v3512_v20  ;;  %v6158_v46 = vpop.permute.xlu1 %2220 }
 0x22f   : > { %v2202_v41 = vcombine.low %v2194_v48, %v2201_v23  ;;  %v3416_v35 = vrot.slane %v3408_v63, %v5361_v0  ;;  %v3763_v51 = vsub.f32 %v5584_v37, %v3519_v42  ;;  %v3765_v8 = vsub.f32 %v5589_v26, %v3533_v62  ;;  %v3215_v62 = vpop.xlane.xlu0 %3214 }
 0x230   : > { %v3764_v29 = vsub.f32 %v5597_v30, %v3526_v59  ;;  %v1615_v63 = vrot.slane %v1601_v40, %v5361_v0  ;;  %v1633_v48 = vcombine.high %v5728_v7, %v5728_v7  ;;  %v6176_v59 = vadd.f32 %v5552_v3, %v5740_v50 }
 0x231   : > { %v3424_v15 = vcombine.low %v3416_v35, %v3423_v61  ;;  %v3235_v35 = vmul.f32 0.125, %v3215_v62 }
 0x232   : > { %v1617_v42 = vcombine.high %v1615_v63, %v1615_v63  ;;  %v6172_v20 = vadd.f32 %v5540_v39, %v1633_v48  ;;  %6965 = vst [vmem:[#allocation43_spill] sm:$0xff] %v6176_v59  ;;  %v2051_v3 = vmul.f32 %v6176_v59, %v6176_v59 }
 0x233   : > { %1974 = vrot.lane.b32.xlu0 %v1944_v13, %s5095_s20  ;;  %v3468_v61 = vsel %vm1986_vm8, %v3424_v15, 0.0 }
 0x234   : > { %6964 = vst [vmem:[#allocation42_spill] sm:$0xff] %v6172_v20  ;;  %v6181_v40 = vadd.f32 %v5538_v56, %v1617_v42  ;;  %v2050_v39 = vmul.f32 %v6172_v20, %v6172_v20  ;;  %v6193_v50 = vadd.f32 %v5544_v4, %v1617_v42  ;;  %v6197_v56 = vadd.f32 %v5558_v18, %v5728_v7 }
 0x235   : > { %3229 = vadd.xlane.f32.xlu1 %v3228_v9  ;;  %v6184_v9 = vadd.f32 %v5548_v11, %v1633_v48  ;;  %v3483_v11 = vmul.f32 %v3235_v35, %v3235_v35 }
 0x236   : > { %6966 = vst [vmem:[#allocation44_spill] sm:$0xff] %v6181_v40  ;;  %v2204_v7 = vcombine.low %v2050_v39, %v2051_v3  ;;  %v3270_v63 = vmul.f32 %v6193_v50, %v6193_v50  ;;  %v3271_v48 = vmul.f32 %v6197_v56, %v6197_v56  ;;  %v3185_v62 = vcombine.low %v6193_v50, %v6197_v56 }
 0x237   : > { %2232 = vrot.lane.b32.xlu0 %v2202_v41, %s5095_s20  ;;  %v6178_v41 = vpop.permute.xlu1 %1964  ;;  %v3272_v4 = vmul.f32 %v6184_v9, %v6184_v9 }
 0x238   : > { %v5052_v44 = vpop.eup %5051  ;;  %v2218_v39 = vrot.slane %v2204_v7, %v5361_v0  ;;  %v3540_v7 = vrot.slane %v3235_v35, %v6126_v32 }
 0x239   : > { %v3831_v13 = vrot.slane %v5052_v44, %v6120_v38  ;;  %v3845_v31 = vrot.slane %v5052_v44, %v6123_v24  ;;  %v3824_v25 = vrot.slane %v5052_v44, %v6126_v32  ;;  %v3838_v23 = vrot.slane %v5052_v44, %v6129_v36  ;;  %3469 = vadd.xlane.f32.xlu1 %v3468_v61 }
 0x23a   : > { %v1946_v44 = vcombine.low %v6172_v20, %v6176_v59 }
 0x23b   : > { %v6160_v37 = vmul.f32 %v3831_v13, %v3763_v51  ;;  %v6162_v26 = vmul.f32 %v3845_v31, %v3765_v8  ;;  %v6164_v55 = vmul.f32 %v3824_v25, %v3762_v27  ;;  %v6166_v30 = vmul.f32 %v3838_v23, %v3764_v29 }
 0x23c   : > { %v1945_v8 = vcombine.low %v6181_v40, %v5744_v43  ;;  %v2048_v27 = vmul.f32 %v6181_v40, %v6181_v40  ;;  %v2049_v29 = vmul.f32 %v5744_v43, %v5744_v43  ;;  %v3273_v31 = vmul.f32 %v5754_v2, %v5754_v2 }
 0x23d   : > { %v1960_v18 = vrot.slane %v1946_v44, %v5361_v0  ;;  %v3186_v23 = vcombine.low %v6184_v9, %v5754_v2 }
 0x23e   : > { %v1953_v61 = vrot.slane %v1945_v8, %v5361_v0  ;;  %v2203_v42 = vcombine.low %v2048_v27, %v2049_v29 }
 0x23f   : > { %v3200_v3 = vrot.slane %v3186_v23, %v5361_v0  ;;  %v3554_v23 = vrot.slane %v3235_v35, %v6129_v36 }
 0x240   : > { %v3455_v15 = vpop.xlane.xlu1 %3454  ;;  %v1961_v44 = vcombine.low %v1953_v61, %v1960_v18  ;;  %v3561_v18 = vrot.slane %v3235_v35, %v6123_v24 }
 0x241   : > { %v3475_v51 = vmul.f32 0.125, %v3455_v15  ;;  %v3426_v15 = vcombine.low %v3272_v4, %v3273_v31  ;;  %v3547_v31 = vrot.slane %v3235_v35, %v6120_v38 }
 0x243   : > { %v3491_v13 = vsub.f32 %v3475_v51, %v3483_v11  ;;  %v3425_v51 = vcombine.low %v3270_v63, %v3271_v48  ;;  %v2211_v11 = vrot.slane %v2203_v42, %v5361_v0  ;;  %v3440_v8 = vrot.slane %v3426_v15, %v5361_v0  ;;  %v2223_v48 = vpop.permute.xlu0 %2222 }
 0x244   : > { %v3767_v15 = vsub.f32 %v5717_v6, %v3547_v31 }
 0x245   : > { %v3795_v25 = vadd.f32 1e-05, %v3491_v13  ;;  %v3193_v13 = vrot.slane %v3185_v62, %v5361_v0  ;;  %v2219_v27 = vcombine.low %v2211_v11, %v2218_v39  ;;  %v3218_v62 = vpop.xlane.xlu1 %3217  ;;  %v6969_v11 = vld [vmem:[#allocation18_spill] sm:$0xff] }
 0x247   : > { %5053 = vrsqrt.f32 %v3795_v25  ;;  %v3201_v29 = vcombine.low %v3193_v13, %v3200_v3  ;;  %v3433_v25 = vrot.slane %v3425_v51, %v5361_v0  ;;  %v6968_v3 = vld [vmem:[#allocation14_spill] sm:$0xff]  ;;  %v3768_v13 = vsub.f32 %v6969_v11, %v3554_v23 }
 0x248   : > { %v3766_v51 = vsub.f32 %v6968_v3, %v3540_v7  ;;  %v1987_v7 = vsel %vm1986_vm8, %v6062_v34, 0.0  ;;  %v3236_v23 = vmul.f32 0.125, %v3218_v62  ;;  %v2247_v3 = vsel %vm1986_vm8, %v2223_v48, 0.0 }
 0x249   : > { %v3441_v4 = vcombine.low %v3433_v25, %v3440_v8  ;;  %v3231_v63 = vsel %vm1986_vm8, %v3201_v29, 0.0 }
 0x24a   : > { %1976 = vrot.lane.b32.xlu1 %v1961_v44, %s5095_s20  ;;  %v6967_v44 = vld [vmem:[#allocation16_spill] sm:$0xff] }
 0x24b   : > { %v3471_v61 = vsel %vm1986_vm8, %v3441_v4, 0.0  ;;  %v3769_v39 = vsub.f32 %v6967_v44, %v3561_v18  ;;  %v1967_v18 = vpop.permute.xlu0 %1966 }
 0x24e   : > { %2234 = vrot.lane.b32.xlu1 %v2219_v27, %s5095_s20 }
 0x254   : > { %v5054_v42 = vpop.eup %5053 }
 0x255   : > { %v3859_v8 = vrot.slane %v5054_v42, %v6120_v38  ;;  %v3873_v35 = vrot.slane %v5054_v42, %v6123_v24  ;;  %v3852_v27 = vrot.slane %v5054_v42, %v6126_v32  ;;  %v3866_v29 = vrot.slane %v5054_v42, %v6129_v36 }
 0x256   : > { %3232 = vadd.xlane.f32.xlu0 %v3231_v63  ;;  %v2225_v63 = vpop.permute.xlu1 %2224 }
 0x257   : > { %v6241_v25 = vmul.f32 %v3859_v8, %v3767_v15  ;;  %v6243_v4 = vmul.f32 %v3873_v35, %v3769_v39  ;;  %v6245_v6 = vmul.f32 %v3852_v27, %v3766_v51  ;;  %v6247_v31 = vmul.f32 %v3866_v29, %v3768_v13 }
 0x258   : > { %v1993_v51 = vsel %vm1986_vm8, %v1967_v18, 0.0  ;;  %v3589_v18 = vrot.slane %v3236_v23, %v6123_v24 }
 0x25a   : > { %3472 = vadd.xlane.f32.xlu0 %v3471_v61  ;;  %v3484_v61 = vmul.f32 %v3236_v23, %v3236_v23  ;;  %v1969_v15 = vpop.permute.xlu1 %1968 }
 0x25b   : > { %v1996_v34 = vsel %vm1986_vm8, %v1969_v15, 0.0  ;;  %v2244_v15 = vsel %vm1986_vm8, %v6158_v46, 0.0  ;;  %v1990_v46 = vsel %vm1986_vm8, %v6178_v41, 0.0  ;;  %v2250_v41 = vsel %vm1986_vm8, %v2225_v63, 0.0 }
 0x25e   : > { %1988 = vadd.xlane.f32.xlu0 %v1987_v7  ;;  %v2227_v62 = vpop.permute.xlu1 %2226 }
 0x25f   : > { %v2253_v7 = vsel %vm1986_vm8, %v2227_v62, 0.0 }
 0x261   : > { %v3458_v44 = vpop.xlane.xlu0 %3457 }
 0x262   : > { %v3476_v42 = vmul.f32 0.125, %v3458_v44  ;;  %2248 = vadd.xlane.f32.xlu0 %v2247_v3  ;;  %v3575_v3 = vrot.slane %v3236_v23, %v6120_v38 }
 0x264   : > { %v3492_v39 = vsub.f32 %v3476_v42, %v3484_v61  ;;  %v3568_v42 = vrot.slane %v3236_v23, %v6126_v32  ;;  %v3582_v61 = vrot.slane %v3236_v23, %v6129_v36 }
 0x265   : > { %v3221_v11 = vpop.xlane.xlu0 %3220 }
 0x266   : > { %v3796_v13 = vadd.f32 1e-05, %v3492_v39  ;;  %v3237_v8 = vmul.f32 0.125, %v3221_v11  ;;  %1994 = vadd.xlane.f32.xlu0 %v1993_v51  ;;  %v3771_v11 = vsub.f32 %v5823_v49, %v3575_v3  ;;  %v3773_v51 = vsub.f32 %v5811_v45, %v3589_v18 }
 0x268   : > { %5055 = vrsqrt.f32 %v3796_v13  ;;  %v3485_v27 = vmul.f32 %v3237_v8, %v3237_v8  ;;  %v3770_v13 = vsub.f32 %v5829_v22, %v3568_v42 }
 0x269   : > { %v3461_v35 = vpop.xlane.xlu0 %3460 }
 0x26a   : > { %v3477_v29 = vmul.f32 0.125, %v3461_v35  ;;  %1997 = vadd.xlane.f32.xlu0 %v1996_v34  ;;  %v3772_v35 = vsub.f32 %v5820_v53, %v3582_v61  ;;  %v3603_v53 = vrot.slane %v3237_v8, %v6120_v38  ;;  %v6970_v61 = vld [vmem:[#allocation7_spill] sm:$0xff] }
 0x26c   : > { %v3493_v48 = vsub.f32 %v3477_v29, %v3485_v27  ;;  %v3775_v42 = vsub.f32 %v5896_v1, %v3603_v53 }
 0x26d   : > { %v1971_v3 = vpop.permute.xlu0 %1970 }
 0x26e   : > { %v3797_v44 = vadd.f32 1e-05, %v3493_v48  ;;  %2254 = vadd.xlane.f32.xlu0 %v2253_v7  ;;  %v3617_v48 = vrot.slane %v3237_v8, %v6123_v24  ;;  %v3596_v7 = vrot.slane %v3237_v8, %v6126_v32 }
 0x270   : > { %5057 = vrsqrt.f32 %v3797_v44  ;;  %v3610_v44 = vrot.slane %v3237_v8, %v6129_v36 }
 0x271   : > { %v2229_v53 = vpop.permute.xlu0 %2228 }
 0x272   : > { %2245 = vadd.xlane.f32.xlu1 %v2244_v15  ;;  %v3777_v15 = vsub.f32 %v6970_v61, %v3617_v48 }
 0x275   : > { %v5056_v39 = vpop.eup %5055 }
 0x276   : > { %v3887_v34 = vrot.slane %v5056_v39, %v6120_v38  ;;  %v3901_v62 = vrot.slane %v5056_v39, %v6123_v24  ;;  %v3880_v27 = vrot.slane %v5056_v39, %v6126_v32  ;;  %v3894_v23 = vrot.slane %v5056_v39, %v6129_v36  ;;  %1991 = vadd.xlane.f32.xlu1 %v1990_v46  ;;  %v6971_v39 = vld [vmem:[#allocation27_spill] sm:$0xff] }
 0x277   : > { %v1999_v46 = vsel %vm1986_vm8, %v1971_v3, 0.0 }
 0x278   : > { %v6271_v29 = vmul.f32 %v3887_v34, %v3771_v11  ;;  %v6273_v49 = vmul.f32 %v3901_v62, %v3773_v51  ;;  %v6275_v45 = vmul.f32 %v3880_v27, %v3770_v13  ;;  %v6277_v22 = vmul.f32 %v3894_v23, %v3772_v35  ;;  %v6972_v51 = vld [vmem:[#allocation26_spill] sm:$0xff] }
 0x279   : > { %v3774_v11 = vsub.f32 %v6971_v39, %v3596_v7  ;;  %v3776_v13 = vsub.f32 %v6972_v51, %v3610_v44  ;;  %v2256_v7 = vsel %vm1986_vm8, %v2229_v53, 0.0 }
 0x27a   : > { %2251 = vadd.xlane.f32.xlu1 %v2250_v41 }
 0x27d   : > { %v5058_v18 = vpop.eup %5057 }
 0x27e   : > { %v3915_v35 = vrot.slane %v5058_v18, %v6120_v38  ;;  %v3929_v34 = vrot.slane %v5058_v18, %v6123_v24  ;;  %v3908_v8 = vrot.slane %v5058_v18, %v6126_v32  ;;  %v3922_v62 = vrot.slane %v5058_v18, %v6129_v36  ;;  %2000 = vadd.xlane.f32.xlu1 %v1999_v46 }
 0x280   : > { %v6292_v27 = vmul.f32 %v3915_v35, %v3775_v42  ;;  %v6294_v63 = vmul.f32 %v3929_v34, %v3777_v15  ;;  %v6296_v1 = vmul.f32 %v3908_v8, %v3774_v11  ;;  %v6298_v23 = vmul.f32 %v3922_v62, %v3776_v13  ;;  %v4742_v35 = vld [vmem:[%s6879_s2 + $0x1] ss:$0 sm:$0xff]  ;;  %v4743_v34 = vld [vmem:[%s6879_s2 + $0x2] ss:$0 sm:$0xff] }
 0x281   : > { %v3224_v48 = vpop.xlane.xlu1 %3223  ;;  %v6313_v8 = vrot.slane %v4742_v35, %v5361_v0  ;;  %v4111_v62 = vcombine.high %v4742_v35, %v4742_v35  ;;  %v4169_v53 = vcombine.high %v4743_v34, %v4743_v34 }
 0x282   : > { %2257 = vadd.xlane.f32.xlu1 %v2256_v7  ;;  %v6315_v46 = vmul.f32 0.125, %v3224_v48 }
 0x285   : > { %v3464_v44 = vpop.xlane.xlu1 %3463 }
 0x286   : > { %v3478_v7 = vmul.f32 0.125, %v3464_v44 }
 0x289   : > { %v1973_v41 = vpop.permute.xlu1 %1972 }
 0x28a   : > { %v2002_v18 = vsel %vm1986_vm8, %v1973_v41, 0.0  ;;  %v6319_v41 = vcombine.high %v6313_v8, %v6313_v8 }
 0x28b   : > { %2003 = vadd.xlane.f32.xlu0 %v2002_v18  ;;  %v6322_v18 = vrot.slane %v4743_v34, %v5361_v0 }
 0x28c   : > { %v4133_v44 = vmul.f32 %v6319_v41, %v6160_v37  ;;  %v4137_v59 = vmul.f32 %v6319_v41, %v6241_v25 }
 0x28d   : > { %v2231_v42 = vpop.permute.xlu1 %2230 }
 0x28e   : > { %v2259_v61 = vsel %vm1986_vm8, %v2231_v42, 0.0  ;;  %v6325_v42 = vrot.slane %v4111_v62, %v5361_v0 }
 0x28f   : > { %2260 = vadd.xlane.f32.xlu0 %v2259_v61  ;;  %v3486_v61 = vmul.f32 %v6315_v46, %v6315_v46 }
 0x291   : > { %v3494_v48 = vsub.f32 %v3478_v7, %v3486_v61 }
 0x293   : > { %v3798_v34 = vadd.f32 1e-05, %v3494_v48 }
 0x295   : > { %5059 = vrsqrt.f32 %v3798_v34 }
 0x2a2   : > { %v3227_v15 = vpop.xlane.xlu0 %3226 }
 0x2a6   : > { %v3467_v39 = vpop.xlane.xlu0 %3466 }
 0x2a7   : > { %v3479_v62 = vmul.f32 0.125, %v3467_v39 }
 0x2aa   : > { %v1975_v11 = vpop.permute.xlu0 %1974 }
 0x2ab   : > { %v2005_v3 = vsel %vm1986_vm8, %v1975_v11, 0.0  ;;  %v6330_v11 = vrot.slane %v4169_v53, %v5361_v0 }
 0x2ac   : > { %2006 = vadd.xlane.f32.xlu1 %v2005_v3  ;;  %v6336_v3 = vcombine.high %v6322_v18, %v6322_v18 }
 0x2ad   : > { %v6346_v35 = vcombine.high %v6330_v11, %v6330_v11 }
 0x2ae   : > { %v2233_v51 = vpop.permute.xlu0 %2232  ;;  %v4191_v53 = vadd.f32 %v6336_v3, %v4133_v44 }
 0x2af   : > { %v2262_v13 = vsel %vm1986_vm8, %v2233_v51, 0.0  ;;  %v6340_v51 = vcombine.high %v6325_v42, %v6325_v42 }
 0x2b0   : > { %2263 = vadd.xlane.f32.xlu1 %v2262_v13  ;;  %v6342_v13 = vmul.f32 0.125, %v3227_v15 }
 0x2b1   : > { %v4135_v37 = vmul.f32 %v6340_v51, %v6162_v26  ;;  %v4139_v26 = vmul.f32 %v6340_v51, %v6243_v4 }
 0x2b2   : > { %v3487_v7 = vmul.f32 %v6342_v13, %v6342_v13 }
 0x2b3   : > { %v4193_v20 = vadd.f32 %v6346_v35, %v4135_v37  ;;  %v4197_v25 = vadd.f32 %v6346_v35, %v4139_v26  ;;  %v6375_v26 = vpop.eup %5059 }
 0x2b4   : > { %v3495_v15 = vsub.f32 %v3479_v62, %v3487_v7  ;;  %v4141_v7 = vmul.f32 %v6319_v41, %v6271_v29 }
 0x2b6   : > { %v3799_v44 = vadd.f32 1e-05, %v3495_v15  ;;  %v4199_v15 = vadd.f32 %v6336_v3, %v4141_v7 }
 0x2b8   : > { %5061 = vrsqrt.f32 %v3799_v44  ;;  %v4145_v44 = vmul.f32 %v6319_v41, %v6292_v27 }
 0x2be   : > { %v3230_v61 = vpop.xlane.xlu1 %3229 }
 0x2bf   : > { %v6357_v48 = vmul.f32 0.125, %v3230_v61 }
 0x2c1   : > { %4256 = vrot.lane.b32.xlu1 %v4191_v53, %s5094_s9  ;;  %v4195_v53 = vadd.f32 %v6336_v3, %v4137_v59  ;;  %v3488_v34 = vmul.f32 %v6357_v48, %v6357_v48 }
 0x2c2   : > { %v3470_v39 = vpop.xlane.xlu1 %3469 }
 0x2c3   : > { %v3480_v43 = vmul.f32 0.125, %v3470_v39  ;;  %v4143_v39 = vmul.f32 %v6340_v51, %v6273_v49 }
 0x2c5   : > { %4260 = vrot.lane.b32.xlu1 %v4193_v20, %s5094_s9  ;;  %v3496_v37 = vsub.f32 %v3480_v43, %v3488_v34  ;;  %v3631_v43 = vrot.slane %v6315_v46, %v6120_v38  ;;  %v4201_v29 = vadd.f32 %v6346_v35, %v4143_v39  ;;  %v3645_v34 = vrot.slane %v6315_v46, %v6123_v24  ;;  %v6394_v27 = vpop.eup %5061 }
 0x2c6   : > { %v1977_v62 = vpop.permute.xlu1 %1976  ;;  %v3673_v39 = vrot.slane %v6342_v13, %v6123_v24 }
 0x2c7   : > { %v2008_v20 = vsel %vm1986_vm8, %v1977_v62, 0.0  ;;  %v3800_v59 = vadd.f32 1e-05, %v3496_v37  ;;  %v3779_v49 = vsub.f32 %v5944_v33, %v3631_v43  ;;  %v4203_v62 = vadd.f32 %v6336_v3, %v4145_v44 }
 0x2c8   : > { %2009 = vadd.xlane.f32.xlu0 %v2008_v20  ;;  %v3957_v20 = vrot.slane %v6375_v26, %v6123_v24  ;;  %v3781_v7 = vsub.f32 %v5791_v58, %v3645_v34  ;;  %v3659_v33 = vrot.slane %v6342_v13, %v6120_v38 }
 0x2c9   : > { %4264 = vrot.lane.b32.xlu1 %v4195_v53, %s5094_s9  ;;  %5063 = vrsqrt.f32 %v3800_v59  ;;  %v3943_v53 = vrot.slane %v6375_v26, %v6120_v38 }
 0x2ca   : > { %v2235_v4 = vpop.permute.xlu1 %2234 }
 0x2cb   : > { %v2265_v61 = vsel %vm1986_vm8, %v2235_v4, 0.0  ;;  %v4091_v37 = vmul.f32 %v3943_v53, %v3779_v49  ;;  %v3985_v53 = vrot.slane %v6394_v27, %v6123_v24 }
 0x2cc   : > { %2266 = vadd.xlane.f32.xlu0 %v2265_v61  ;;  %v4093_v61 = vmul.f32 %v3957_v20, %v3781_v7 }
 0x2cd   : > { %4268 = vrot.lane.b32.xlu1 %v4197_v25, %s5094_s9  ;;  %v4147_v25 = vmul.f32 %v6340_v51, %v6294_v63  ;;  %v4149_v59 = vmul.f32 %v6319_v41, %v4091_v37  ;;  %v3971_v63 = vrot.slane %v6394_v27, %v6120_v38 }
 0x2cf   : > { %v4205_v4 = vadd.f32 %v6346_v35, %v4147_v25  ;;  %v4207_v58 = vadd.f32 %v6336_v3, %v4149_v59  ;;  %v3687_v25 = vrot.slane %v6357_v48, %v6120_v38 }
 0x2d1   : > { %4272 = vrot.lane.b32.xlu1 %v4199_v15, %s5094_s9  ;;  %v3783_v15 = vsub.f32 %v6024_v19, %v3659_v33  ;;  %v3785_v19 = vsub.f32 %v5686_v21, %v3673_v39  ;;  %v4134_v21 = vmul.f32 %v6325_v42, %v6166_v30 }
 0x2d3   : > { %v4095_v44 = vmul.f32 %v3971_v63, %v3783_v15  ;;  %v4097_v33 = vmul.f32 %v3985_v53, %v3785_v19  ;;  %v3787_v63 = vsub.f32 %v6080_v5, %v3687_v25  ;;  %v3701_v15 = vrot.slane %v6357_v48, %v6123_v24 }
 0x2d4   : > { %v4192_v30 = vadd.f32 %v6330_v11, %v4134_v21  ;;  %v4136_v5 = vmul.f32 %v6313_v8, %v6245_v6 }
 0x2d5   : > { %4276 = vrot.lane.b32.xlu1 %v4201_v29, %s5094_s9  ;;  %v4151_v29 = vmul.f32 %v6340_v51, %v4093_v61  ;;  %v4153_v7 = vmul.f32 %v6319_v41, %v4095_v44 }
 0x2d6   : > { %v6412_v49 = vpop.eup %5063 }
 0x2d7   : > { %v4209_v20 = vadd.f32 %v6346_v35, %v4151_v29  ;;  %v4013_v44 = vrot.slane %v6412_v49, %v6123_v24 }
 0x2d9   : > { %4280 = vrot.lane.b32.xlu1 %v4203_v62, %s5094_s9  ;;  %v4132_v62 = vmul.f32 %v6313_v8, %v6164_v55 }
 0x2db   : > { %v4190_v59 = vadd.f32 %v6322_v18, %v4132_v62  ;;  %v3789_v62 = vsub.f32 %v5721_v54, %v3701_v15 }
 0x2dd   : > { %4284 = vrot.lane.b32.xlu1 %v4205_v4, %s5094_s9  ;;  %v3999_v4 = vrot.slane %v6412_v49, %v6120_v38 }
 0x2df   : > { %v3233_v43 = vpop.xlane.xlu0 %3232  ;;  %v4099_v29 = vmul.f32 %v3999_v4, %v3787_v63  ;;  %v4140_v4 = vmul.f32 %v6313_v8, %v6275_v45  ;;  %v3624_v45 = vrot.slane %v6315_v46, %v6126_v32 }
 0x2e0   : > { %v6414_v34 = vmul.f32 0.125, %v3233_v43  ;;  %v4211_v43 = vadd.f32 %v6336_v3, %v4153_v7  ;;  %v4138_v7 = vmul.f32 %v6325_v42, %v6247_v31  ;;  %v4142_v31 = vmul.f32 %v6325_v42, %v6277_v22 }
 0x2e1   : > { %4288 = vrot.lane.b32.xlu1 %v4207_v58, %s5094_s9  ;;  %v4155_v58 = vmul.f32 %v6340_v51, %v4097_v33  ;;  %v4157_v25 = vmul.f32 %v6319_v41, %v4099_v29  ;;  %v4144_v22 = vmul.f32 %v6313_v8, %v6296_v1  ;;  %v3638_v1 = vrot.slane %v6315_v46, %v6129_v36 }
 0x2e2   : > { %v3489_v55 = vmul.f32 %v6414_v34, %v6414_v34  ;;  %4254 = vrot.lane.b32.xlu0 %v4190_v59, %s5094_s9  ;;  %v4196_v33 = vadd.f32 %v6330_v11, %v4138_v7  ;;  %v3729_v21 = vrot.slane %v6414_v34, %v6123_v24  ;;  %v4200_v15 = vadd.f32 %v6330_v11, %v4142_v31 }
 0x2e3   : > { %v3473_v37 = vpop.xlane.xlu0 %3472  ;;  %v4213_v19 = vadd.f32 %v6346_v35, %v4155_v58  ;;  %v4215_v6 = vadd.f32 %v6336_v3, %v4157_v25  ;;  %v3780_v46 = vsub.f32 %v5948_v12, %v3638_v1  ;;  %v3652_v7 = vrot.slane %v6342_v13, %v6126_v32 }
 0x2e4   : > { %v3481_v61 = vmul.f32 0.125, %v3473_v37  ;;  %v4101_v37 = vmul.f32 %v4013_v44, %v3789_v62  ;;  %v3793_v29 = vsub.f32 %v5754_v2, %v3729_v21  ;;  %v4202_v62 = vadd.f32 %v6322_v18, %v4144_v22 }
 0x2e5   : > { %4292 = vrot.lane.b32.xlu1 %v4209_v20, %s5094_s9  ;;  %v4194_v20 = vadd.f32 %v6322_v18, %v4136_v5  ;;  %v3666_v12 = vrot.slane %v6342_v13, %v6129_v36 }
 0x2e6   : > { %v3497_v39 = vsub.f32 %v3481_v61, %v3489_v55  ;;  %4258 = vrot.lane.b32.xlu0 %v4192_v30, %s5094_s9  ;;  %v4159_v54 = vmul.f32 %v6340_v51, %v4101_v37  ;;  %v4198_v55 = vadd.f32 %v6322_v18, %v4140_v4  ;;  %v3715_v61 = vrot.slane %v6414_v34, %v6120_v38 }
 0x2e7   : > { %v3778_v30 = vsub.f32 %v5958_v10, %v3624_v45  ;;  %v3950_v37 = vrot.slane %v6375_v26, %v6129_v36  ;;  %v3784_v4 = vsub.f32 %v6011_v60, %v3666_v12 }
 0x2e8   : > { %v3801_v53 = vadd.f32 1e-05, %v3497_v39  ;;  %v4217_v59 = vadd.f32 %v6346_v35, %v4159_v54  ;;  %v3936_v39 = vrot.slane %v6375_v26, %v6126_v32  ;;  %v3964_v26 = vrot.slane %v6394_v27, %v6126_v32 }
 0x2e9   : > { %4296 = vrot.lane.b32.xlu1 %v4211_v43, %s5094_s9  ;;  %v3791_v43 = vsub.f32 %v6197_v56, %v3715_v61  ;;  %v4146_v56 = vmul.f32 %v6325_v42, %v6298_v23 }
 0x2ea   : > { %5065 = vrsqrt.f32 %v3801_v53  ;;  %4262 = vrot.lane.b32.xlu0 %v4194_v20, %s5094_s9  ;;  %v4090_v2 = vmul.f32 %v3936_v39, %v3778_v30  ;;  %v3708_v39 = vrot.slane %v6414_v34, %v6126_v32 }
 0x2eb   : > { %v4204_v23 = vadd.f32 %v6330_v11, %v4146_v56 }
 0x2ed   : > { %4300 = vrot.lane.b32.xlu1 %v4213_v19, %s5094_s9 }
 0x2ee   : > { %4266 = vrot.lane.b32.xlu0 %v4196_v33, %s5094_s9  ;;  %v3978_v33 = vrot.slane %v6394_v27, %v6129_v36  ;;  %v3694_v27 = vrot.slane %v6357_v48, %v6129_v36 }
 0x2f0   : > { %v4096_v31 = vmul.f32 %v3978_v33, %v3784_v4  ;;  %v3788_v22 = vsub.f32 %v6092_v47, %v3694_v27 }
 0x2f1   : > { %4304 = vrot.lane.b32.xlu1 %v4215_v6, %s5094_s9 }
 0x2f2   : > { %4270 = vrot.lane.b32.xlu0 %v4198_v55, %s5094_s9  ;;  %v3992_v55 = vrot.slane %v6412_v49, %v6126_v32  ;;  %v4154_v21 = vmul.f32 %v6325_v42, %v4096_v31 }
 0x2f5   : > { %4308 = vrot.lane.b32.xlu1 %v4217_v59, %s5094_s9 }
 0x2f6   : > { %4274 = vrot.lane.b32.xlu0 %v4200_v15, %s5094_s9  ;;  %v4006_v15 = vrot.slane %v6412_v49, %v6129_v36  ;;  %v3722_v49 = vrot.slane %v6414_v34, %v6129_v36 }
 0x2f7   : > { %v6472_v63 = vpop.eup %5065 }
 0x2f8   : > { %v4027_v58 = vrot.slane %v6472_v63, %v6120_v38  ;;  %v4041_v44 = vrot.slane %v6472_v63, %v6123_v24  ;;  %v4034_v30 = vrot.slane %v6472_v63, %v6129_v36 }
 0x2fa   : > { %v4103_v53 = vmul.f32 %v4027_v58, %v3791_v43  ;;  %v4105_v5 = vmul.f32 %v4041_v44, %v3793_v29  ;;  %4278 = vrot.lane.b32.xlu0 %v4202_v62, %s5094_s9  ;;  %v4020_v58 = vrot.slane %v6472_v63, %v6126_v32  ;;  %v3790_v29 = vsub.f32 %v6193_v50, %v3708_v39 }
 0x2fb   : > { %v2246_v56 = vpop.xlane.xlu1 %2245 }
 0x2fc   : > { %v4161_v19 = vmul.f32 %v6319_v41, %v4103_v53  ;;  %v4163_v25 = vmul.f32 %v6340_v51, %v4105_v5  ;;  %v4148_v41 = vmul.f32 %v6313_v8, %v4090_v2  ;;  %v4092_v51 = vmul.f32 %v3950_v37, %v3780_v46 }
 0x2fd   : > { %v4102_v53 = vmul.f32 %v4020_v58, %v3790_v29  ;;  %v3792_v5 = vsub.f32 %v6184_v9, %v3722_v49 }
 0x2fe   : > { %v4219_v10 = vadd.f32 %v6336_v3, %v4161_v19  ;;  %v4221_v20 = vadd.f32 %v6346_v35, %v4163_v25  ;;  %4282 = vrot.lane.b32.xlu0 %v4204_v23, %s5094_s9  ;;  %v3782_v3 = vsub.f32 %v6020_v17, %v3652_v7  ;;  %v4206_v35 = vadd.f32 %v6322_v18, %v4148_v41  ;;  %v1989_v25 = vpop.xlane.xlu0 %1988 }
 0x2ff   : > { %v4150_v6 = vmul.f32 %v6325_v42, %v4092_v51  ;;  %v3680_v17 = vrot.slane %v6357_v48, %v6126_v32  ;;  %v4100_v48 = vmul.f32 %v4006_v15, %v3788_v22  ;;  %v4160_v62 = vmul.f32 %v6313_v8, %v4102_v53  ;;  %v1992_v2 = vpop.xlane.xlu1 %1991  ;;  %v6974_v53 = vld [vmem:[#allocation5_spill] sm:$0xff] }
 0x300   : > { %4312 = vrot.lane.b32.xlu1 %v4219_v10, %s5094_s9  ;;  %v4094_v54 = vmul.f32 %v3964_v26, %v3782_v3  ;;  %v4104_v50 = vmul.f32 %v4034_v30, %v3792_v5  ;;  %v2012_v46 = vmul.f32 0.125, %v1989_v25  ;;  %v2268_v23 = vmul.f32 0.125, %v2246_v56 }
 0x301   : > { %v4208_v59 = vadd.f32 %v6330_v11, %v4150_v6  ;;  %v3786_v61 = vsub.f32 %v6084_v57, %v3680_v17  ;;  %v4212_v57 = vadd.f32 %v6330_v11, %v4154_v21  ;;  %v4158_v44 = vmul.f32 %v6325_v42, %v4100_v48 }
 0x302   : > { %4286 = vrot.lane.b32.xlu0 %v4206_v35, %s5094_s9  ;;  %v4152_v13 = vmul.f32 %v6313_v8, %v4094_v54  ;;  %v4218_v34 = vadd.f32 %v6322_v18, %v4160_v62  ;;  %v4162_v19 = vmul.f32 %v6325_v42, %v4104_v50  ;;  %v2249_v37 = vpop.xlane.xlu0 %2248  ;;  %v6560_v51 = vmul.f32 0.125, %v1992_v2 }
 0x303   : > { %v4098_v45 = vmul.f32 %v3992_v55, %v3786_v61  ;;  %v4216_v1 = vadd.f32 %v6330_v11, %v4158_v44  ;;  %v2252_v9 = vpop.xlane.xlu1 %2251  ;;  %v2269_v33 = vmul.f32 0.125, %v2249_v37  ;;  %v2313_v22 = vrot.slane %v2012_v46, %v6120_v38 }
 0x304   : > { %4316 = vrot.lane.b32.xlu1 %v4221_v20, %s5094_s9  ;;  %v4210_v60 = vadd.f32 %v6322_v18, %v4152_v13  ;;  %v4220_v63 = vadd.f32 %v6330_v11, %v4162_v19  ;;  %v2277_v35 = vmul.f32 %v6560_v51, %v6560_v51  ;;  %v2270_v61 = vmul.f32 0.125, %v2252_v9  ;;  %v6978_v9 = vld [vmem:[#allocation19_spill] sm:$0xff] }
 0x305   : > { %v4156_v43 = vmul.f32 %v6313_v8, %v4098_v45  ;;  %v2327_v39 = vrot.slane %v2012_v46, %v6123_v24  ;;  %v2320_v48 = vrot.slane %v2012_v46, %v6129_v36 }
 0x306   : > { %4290 = vrot.lane.b32.xlu0 %v4208_v59, %s5094_s9  ;;  %v1995_v8 = vpop.xlane.xlu0 %1994  ;;  %v2285_v17 = vsub.f32 %v2269_v33, %v2277_v35 }
 0x307   : > { %v4214_v47 = vadd.f32 %v6322_v18, %v4156_v43  ;;  %v2001_v10 = vpop.xlane.xlu1 %2000  ;;  %v2276_v18 = vmul.f32 %v2012_v46, %v2012_v46  ;;  %v2014_v13 = vmul.f32 0.125, %v1995_v8  ;;  %v2559_v30 = vsub.f32 %v6974_v53, %v2327_v39 }
 0x308   : > { %v2589_v55 = vadd.f32 1e-05, %v2285_v17  ;;  %v6587_v50 = vmul.f32 0.125, %v2001_v10 }
 0x309   : > { %v2284_v42 = vsub.f32 %v2268_v23, %v2276_v18  ;;  %v2369_v29 = vrot.slane %v2014_v13, %v6120_v38  ;;  %v2383_v49 = vrot.slane %v2014_v13, %v6123_v24  ;;  %v2362_v8 = vrot.slane %v2014_v13, %v6126_v32 }
 0x30a   : > { %4294 = vrot.lane.b32.xlu0 %v4210_v60, %s5094_s9  ;;  %v1998_v7 = vpop.xlane.xlu0 %1997  ;;  %v2278_v60 = vmul.f32 %v2014_v13, %v2014_v13 }
 0x30b   : > { %v2258_v20 = vpop.xlane.xlu1 %2257  ;;  %v6564_v3 = vmul.f32 0.125, %v1998_v7  ;;  %v2588_v12 = vadd.f32 1e-05, %v2284_v42  ;;  %v6595_v37 = vsub.f32 %v6978_v9, %v2383_v49 }
 0x30c   : > { %v2286_v21 = vsub.f32 %v2270_v61, %v2278_v60  ;;  %v2272_v7 = vmul.f32 0.125, %v2258_v20  ;;  %v2280_v20 = vmul.f32 %v6587_v50, %v6587_v50  ;;  %v6979_v61 = vld [vmem:[#allocation22_spill] sm:$0xff]  ;;  %v6980_v60 = vld [vmem:[#allocation21_spill] sm:$0xff] }
 0x30d   : > { %v2279_v4 = vmul.f32 %v6564_v3, %v6564_v3  ;;  %5067 = vrsqrt.f32 %v2588_v12  ;;  %v2397_v10 = vrot.slane %v6564_v3, %v6120_v38  ;;  %v2411_v18 = vrot.slane %v6564_v3, %v6123_v24 }
 0x30e   : > { %4298 = vrot.lane.b32.xlu0 %v4212_v57, %s5094_s9  ;;  %v2255_v11 = vpop.xlane.xlu0 %2254  ;;  %5069 = vrsqrt.f32 %v2589_v55  ;;  %v2306_v57 = vrot.slane %v2012_v46, %v6126_v32  ;;  %v2590_v43 = vadd.f32 1e-05, %v2286_v21  ;;  %v2376_v46 = vrot.slane %v2014_v13, %v6129_v36 }
 0x30f   : > { %v2271_v6 = vmul.f32 0.125, %v2255_v11  ;;  %v2341_v11 = vrot.slane %v6560_v51, %v6120_v38  ;;  %v2390_v12 = vrot.slane %v6564_v3, %v6126_v32  ;;  %v2404_v35 = vrot.slane %v6564_v3, %v6129_v36 }
 0x310   : > { %v2334_v55 = vrot.slane %v6560_v51, %v6126_v32  ;;  %v2348_v3 = vrot.slane %v6560_v51, %v6129_v36  ;;  %v6628_v21 = vsub.f32 %v6980_v60, %v2376_v46  ;;  %v2288_v39 = vsub.f32 %v2272_v7, %v2280_v20 }
 0x311   : > { %v2287_v59 = vsub.f32 %v2271_v6, %v2279_v4  ;;  %v2355_v6 = vrot.slane %v6560_v51, %v6123_v24  ;;  %v6985_v51 = vld [vmem:[#allocation23_spill] sm:$0xff] }
 0x312   : > { %4302 = vrot.lane.b32.xlu0 %v4214_v47, %s5094_s9  ;;  %v6973_v47 = vld [vmem:[#allocation3_spill] sm:$0xff] }
 0x313   : > { %v2591_v27 = vadd.f32 1e-05, %v2287_v59  ;;  %v2557_v44 = vsub.f32 %v6973_v47, %v2313_v22  ;;  %v6983_v47 = vld [vmem:[#allocation13_spill] sm:$0xff] }
 0x314   : > { %v2004_v15 = vpop.xlane.xlu0 %2003  ;;  %v2561_v53 = vsub.f32 %v6983_v47, %v2341_v11  ;;  %v2592_v11 = vadd.f32 1e-05, %v2288_v39 }
 0x315   : > { %5071 = vrsqrt.f32 %v2591_v27  ;;  %v6625_v27 = vsub.f32 %v6979_v61, %v2362_v8  ;;  %v6644_v46 = vmul.f32 0.125, %v2004_v15 }
 0x316   : > { %4306 = vrot.lane.b32.xlu0 %v4216_v1, %s5094_s9  ;;  %v6975_v1 = vld [vmem:[#allocation2_spill] sm:$0xff]  ;;  %5073 = vrsqrt.f32 %v2590_v43 }
 0x317   : > { %v2556_v62 = vsub.f32 %v6975_v1, %v2306_v57  ;;  %v6981_v43 = vld [vmem:[#allocation6_spill] sm:$0xff]  ;;  %v6984_v1 = vld [vmem:[#allocation25_spill] sm:$0xff]  ;;  %5075 = vrsqrt.f32 %v2592_v11 }
 0x318   : > { %v2261_v2 = vpop.xlane.xlu0 %2260 }
 0x319   : > { %v2273_v20 = vmul.f32 0.125, %v2261_v2  ;;  %v2281_v2 = vmul.f32 %v6644_v46, %v6644_v46 }
 0x31a   : > { %4310 = vrot.lane.b32.xlu0 %v4218_v34, %s5094_s9  ;;  %v5068_v58 = vpop.eup %5067  ;;  %v6976_v34 = vld [vmem:[#allocation4_spill] sm:$0xff] }
 0x31b   : > { %v2618_v56 = vrot.slane %v5068_v58, %v6126_v32  ;;  %v2558_v19 = vsub.f32 %v6976_v34, %v2320_v48  ;;  %v2625_v23 = vrot.slane %v5068_v58, %v6120_v38  ;;  %v2639_v42 = vrot.slane %v5068_v58, %v6123_v24  ;;  %v5070_v17 = vpop.eup %5069  ;;  %v6986_v34 = vld [vmem:[#allocation10_spill] sm:$0xff] }
 0x31c   : > { %v2632_v4 = vrot.slane %v5068_v58, %v6129_v36  ;;  %v2569_v48 = vsub.f32 %v6981_v43, %v2397_v10  ;;  %v6982_v58 = vld [vmem:[#allocation24_spill] sm:$0xff] }
 0x31d   : > { %v2868_v33 = vmul.f32 %v2618_v56, %v2556_v62  ;;  %v2869_v57 = vmul.f32 %v2625_v23, %v2557_v44  ;;  %v2871_v49 = vmul.f32 %v2639_v42, %v2559_v30  ;;  %v6636_v62 = vsub.f32 %v6984_v1, %v2390_v12  ;;  %v6987_v23 = vld [vmem:[#allocation12_spill] sm:$0xff]  ;;  %v6991_v1 = vld [vmem:[#allocation35_spill] sm:$0xff] }
 0x31e   : > { %4314 = vrot.lane.b32.xlu0 %v4220_v63, %s5094_s9  ;;  %v6977_v63 = vld [vmem:[#allocation20_spill] sm:$0xff]  ;;  %v6639_v56 = vsub.f32 %v6985_v51, %v2404_v35  ;;  %v2870_v8 = vmul.f32 %v2632_v4, %v2558_v19  ;;  %v2646_v44 = vrot.slane %v5070_v17, %v6126_v32  ;;  %v2560_v10 = vsub.f32 %v6987_v23, %v2334_v55 }
 0x31f   : > { %v6592_v25 = vsub.f32 %v6977_v63, %v2369_v29  ;;  %v2571_v29 = vsub.f32 %v6982_v58, %v2411_v18  ;;  %v2563_v63 = vsub.f32 %v6986_v34, %v2355_v6  ;;  %v2934_v9 = vmul.f32 %v5990_v28, %v2868_v33  ;;  %v6988_v18 = vld [vmem:[#allocation9_spill] sm:$0xff]  ;;  %v6989_v55 = vld [vmem:[#allocation36_spill] sm:$0xff] }
 0x320   : > { %v2562_v42 = vsub.f32 %v6988_v18, %v2348_v3  ;;  %v2935_v12 = vmul.f32 %v6036_v16, %v2869_v57  ;;  %v2653_v35 = vrot.slane %v5070_v17, %v6120_v38  ;;  %v2937_v15 = vmul.f32 %v6034_v52, %v2871_v49  ;;  %v6990_v3 = vld [vmem:[#allocation34_spill] sm:$0xff] }
 0x321   : > { %v2667_v6 = vrot.slane %v5070_v17, %v6123_v24  ;;  %v2660_v4 = vrot.slane %v5070_v17, %v6129_v36  ;;  %v3000_v61 = vadd.f32 %v6989_v55, %v2934_v9  ;;  %v2936_v60 = vmul.f32 %v6990_v3, %v2870_v8 }
 0x322   : > { %v6630_v22 = vpop.eup %5071  ;;  %v2872_v39 = vmul.f32 %v2646_v44, %v2560_v10  ;;  %v3001_v51 = vadd.f32 %v6991_v1, %v2935_v12  ;;  %v2873_v34 = vmul.f32 %v2653_v35, %v2561_v53  ;;  %v2289_v8 = vsub.f32 %v2273_v20, %v2281_v2  ;;  %v6992_v44 = vld [vmem:[#allocation37_spill] sm:$0xff] }
 0x323   : > { %v2709_v30 = vrot.slane %v6630_v22, %v6120_v38  ;;  %v2723_v19 = vrot.slane %v6630_v22, %v6123_v24  ;;  %v2702_v57 = vrot.slane %v6630_v22, %v6126_v32  ;;  %v5074_v43 = vpop.eup %5073  ;;  %v2716_v17 = vrot.slane %v6630_v22, %v6129_v36 }
 0x324   : > { %v3003_v23 = vadd.f32 %v6992_v44, %v2937_v15  ;;  %v2875_v10 = vmul.f32 %v2667_v6, %v2563_v63  ;;  %v2874_v18 = vmul.f32 %v2660_v4, %v2562_v42  ;;  %v2938_v14 = vmul.f32 %v5990_v28, %v2872_v39 }
 0x325   : > { %v2881_v58 = vmul.f32 %v2709_v30, %v2569_v48  ;;  %v6993_v48 = vld [vmem:[#allocation38_spill] sm:$0xff]  ;;  %v2674_v47 = vrot.slane %v5074_v43, %v6126_v32  ;;  %v2681_v11 = vrot.slane %v5074_v43, %v6120_v38  ;;  %v2695_v53 = vrot.slane %v5074_v43, %v6123_v24 }
 0x326   : > { %v3002_v30 = vadd.f32 %v6993_v48, %v2936_v60  ;;  %v2883_v35 = vmul.f32 %v2723_v19, %v2571_v29  ;;  %v2593_v6 = vadd.f32 1e-05, %v2289_v8  ;;  %v3004_v39 = vadd.f32 %v6989_v55, %v2938_v14 }
 0x327   : > { %v2876_v2 = vmul.f32 %v2674_v47, %v6625_v27  ;;  %v2688_v29 = vrot.slane %v5074_v43, %v6129_v36  ;;  %v2879_v19 = vmul.f32 %v2695_v53, %v6595_v37  ;;  %v2880_v53 = vmul.f32 %v2702_v57, %v6636_v62 }
 0x328   : > { %5077 = vrsqrt.f32 %v2593_v6 }
 0x329   : > { %v2945_v6 = vmul.f32 %v6034_v52, %v2879_v19 }
 0x335   : > { %v6558_v41 = vpop.xlane.xlu1 %2006 }
 0x336   : > { %v6678_v22 = vmul.f32 0.125, %v6558_v41  ;;  %v2941_v41 = vmul.f32 %v6034_v52, %v2875_v10  ;;  %v2878_v10 = vmul.f32 %v2688_v29, %v6628_v21 }
 0x338   : > { %v3007_v47 = vadd.f32 %v6992_v44, %v2941_v41 }
 0x339   : > { %v6562_v26 = vpop.xlane.xlu1 %2263 }
 0x33a   : > { %v2274_v4 = vmul.f32 0.125, %v6562_v26  ;;  %v2439_v26 = vrot.slane %v6587_v50, %v6123_v24 }
 0x33d   : > { %v6568_v54 = vpop.permute.xlu1 %4256 }
 0x33e   : > { %v4351_v40 = vadd.f32 %v6568_v54, %v3001_v51  ;;  %v2939_v54 = vmul.f32 %v6036_v16, %v2873_v34 }
 0x340   : > { %v3005_v51 = vadd.f32 %v6991_v1, %v2939_v54 }
 0x341   : > { %v6572_v31 = vpop.permute.xlu1 %4260 }
 0x342   : > { %v4353_v42 = vadd.f32 %v6572_v31, %v3003_v23  ;;  %v2282_v31 = vmul.f32 %v6678_v22, %v6678_v22  ;;  %v2942_v23 = vmul.f32 %v5990_v28, %v2876_v2 }
 0x344   : > { %v2290_v43 = vsub.f32 %v2274_v4, %v2282_v31  ;;  %v6995_v4 = vld [vmem:[#allocation8_spill] sm:$0xff]  ;;  %v3008_v57 = vadd.f32 %v6989_v55, %v2942_v23  ;;  %v2946_v31 = vmul.f32 %v5990_v28, %v2880_v53 }
 0x345   : > { %v6574_v45 = vpop.permute.xlu1 %4264 }
 0x346   : > { %v4355_v37 = vadd.f32 %v6574_v45, %v3005_v51  ;;  %v2594_v21 = vadd.f32 1e-05, %v2290_v43  ;;  %v3011_v51 = vadd.f32 %v6992_v44, %v2945_v6 }
 0x348   : > { %5079 = vrsqrt.f32 %v2594_v21 }
 0x349   : > { %v6584_v5 = vpop.permute.xlu1 %4268 }
 0x34d   : > { %v6616_v59 = vpop.permute.xlu1 %4272 }
 0x351   : > { %v6618_v13 = vpop.xlane.xlu0 %2009  ;;  %v6658_v33 = vpop.permute.xlu1 %4276 }
 0x352   : > { %v6714_v54 = vmul.f32 0.125, %v6618_v13 }
 0x355   : > { %v6646_v7 = vpop.xlane.xlu0 %2266  ;;  %v6682_v12 = vpop.permute.xlu1 %4280 }
 0x359   : > { %v4255_v49 = vpop.permute.xlu0 %4254 }
 0x35a   : > { %v4350_v9 = vadd.f32 %v4255_v49, %v3000_v61  ;;  %v2940_v61 = vmul.f32 %v6990_v3, %v2874_v18 }
 0x35c   : > { %v4414_v20 = vcombine.low %v4350_v9, %v4351_v40  ;;  %v2877_v40 = vmul.f32 %v2681_v11, %v6592_v25  ;;  %v6702_v9 = vpop.permute.xlu1 %4284  ;;  %v3006_v25 = vadd.f32 %v6993_v48, %v2940_v61  ;;  %v2949_v61 = vmul.f32 %v6034_v52, %v2883_v35 }
 0x35d   : > { %v4259_v63 = vpop.permute.xlu0 %4258 }
 0x35e   : > { %v4352_v15 = vadd.f32 %v4259_v63, %v3002_v30  ;;  %v4422_v34 = vrot.slane %v4414_v20, %v5361_v0  ;;  %v2943_v18 = vmul.f32 %v6036_v16, %v2877_v40  ;;  %v2947_v30 = vmul.f32 %v6036_v16, %v2881_v58 }
 0x35f   : > { %v2882_v63 = vmul.f32 %v2716_v17, %v6639_v56  ;;  %v6994_v58 = vrot.slane %v6587_v50, %v6120_v38  ;;  %v2418_v56 = vrot.slane %v6587_v50, %v6126_v32  ;;  %v2944_v17 = vmul.f32 %v6990_v3, %v2878_v10 }
 0x360   : > { %v4415_v60 = vcombine.low %v4352_v15, %v4353_v42  ;;  %v4357_v42 = vadd.f32 %v6584_v5, %v3007_v47  ;;  %v5076_v15 = vpop.eup %5075  ;;  %v2275_v5 = vmul.f32 0.125, %v6646_v7  ;;  %v3009_v41 = vadd.f32 %v6991_v1, %v2943_v18 }
 0x361   : > { %v4263_v49 = vpop.permute.xlu0 %4262  ;;  %v2573_v62 = vsub.f32 %v6995_v4, %v6994_v58  ;;  %v2283_v40 = vmul.f32 %v6714_v54, %v6714_v54  ;;  %v2948_v35 = vmul.f32 %v6990_v3, %v2882_v63  ;;  %v2737_v47 = vrot.slane %v5076_v15, %v6120_v38  ;;  %v5078_v6 = vpop.eup %5077 }
 0x362   : > { %v4429_v14 = vrot.slane %v4415_v60, %v5361_v0  ;;  %v4354_v27 = vadd.f32 %v4263_v49, %v3004_v39  ;;  %v6729_v60 = vpop.permute.xlu1 %4288  ;;  %v6996_v39 = vld [vmem:[#allocation28_spill] sm:$0xff]  ;;  %v2432_v10 = vrot.slane %v6587_v50, %v6129_v36  ;;  %v4361_v18 = vadd.f32 %v6658_v33, %v3011_v51 }
 0x363   : > { %v2575_v2 = vsub.f32 %v6996_v39, %v2439_v26  ;;  %v4359_v26 = vadd.f32 %v6616_v59, %v3009_v41  ;;  %v3013_v63 = vadd.f32 %v6991_v1, %v2947_v30  ;;  %v2744_v21 = vrot.slane %v5076_v15, %v6129_v36  ;;  %v6999_v41 = vld [vmem:[#allocation11_spill] sm:$0xff] }
 0x364   : > { %v4430_v8 = vcombine.low %v4422_v34, %v4429_v14  ;;  %v4431_v45 = vcombine.low %v4354_v27, %v4355_v37  ;;  %v2730_v34 = vrot.slane %v5076_v15, %v6126_v32  ;;  %v2291_v14 = vsub.f32 %v2275_v5, %v2283_v40 }
 0x365   : > { %v4267_v11 = vpop.permute.xlu0 %4266  ;;  %v3010_v27 = vadd.f32 %v6993_v48, %v2944_v17  ;;  %v3012_v33 = vadd.f32 %v6989_v55, %v2946_v31  ;;  %v3014_v4 = vadd.f32 %v6993_v48, %v2948_v35  ;;  %v2446_v30 = vrot.slane %v6644_v46, %v6126_v32 }
 0x366   : > { %v4356_v20 = vadd.f32 %v4267_v11, %v3006_v25  ;;  %4550 = vrot.lane.b32.xlu0 %v4430_v8, %s5095_s20  ;;  %v4439_v7 = vrot.slane %v4431_v45, %v5361_v0  ;;  %v2751_v25 = vrot.slane %v5076_v15, %v6123_v24  ;;  %v6997_v8 = vld [vmem:[#allocation30_spill] sm:$0xff]  ;;  %v2453_v11 = vrot.slane %v6644_v46, %v6120_v38  ;;  %v6753_v45 = vpop.permute.xlu1 %4292 }
 0x367   : > { %v2572_v23 = vsub.f32 %v6997_v8, %v2418_v56  ;;  %v2595_v50 = vadd.f32 1e-05, %v2291_v14  ;;  %v2885_v56 = vmul.f32 %v2737_v47, %v2573_v62  ;;  %v2765_v40 = vrot.slane %v5078_v6, %v6120_v38  ;;  %v7000_v14 = vld [vmem:[#allocation33_spill] sm:$0xff]  ;;  %v7001_v8 = vld [vmem:[#allocation32_spill] sm:$0xff] }
 0x368   : > { %v4432_v13 = vcombine.low %v4356_v20, %v4357_v42  ;;  %v3015_v42 = vadd.f32 %v6992_v44, %v2949_v61  ;;  %v2887_v5 = vmul.f32 %v2751_v25, %v2575_v2  ;;  %v2577_v61 = vsub.f32 %v6999_v41, %v2453_v11  ;;  %v5080_v11 = vpop.eup %5079 }
 0x369   : > { %v4271_v29 = vpop.permute.xlu0 %4270  ;;  %v2884_v20 = vmul.f32 %v2730_v34, %v2572_v23  ;;  %v2467_v31 = vrot.slane %v6644_v46, %v6123_v24  ;;  %5081 = vrsqrt.f32 %v2595_v50  ;;  %v2951_v51 = vmul.f32 %v6036_v16, %v2885_v56 }
 0x36a   : > { %v4446_v19 = vrot.slane %v4432_v13, %v5361_v0  ;;  %v4358_v49 = vadd.f32 %v4271_v29, %v3008_v57  ;;  %v6998_v57 = vld [vmem:[#allocation29_spill] sm:$0xff]  ;;  %v2953_v35 = vmul.f32 %v6034_v52, %v2887_v5  ;;  %v6772_v34 = vpop.permute.xlu1 %4296  ;;  %v4365_v47 = vadd.f32 %v6702_v9, %v3015_v42 }
 0x36b   : > { %v2574_v17 = vsub.f32 %v6998_v57, %v2432_v10  ;;  %v2950_v62 = vmul.f32 %v5990_v28, %v2884_v20  ;;  %v2779_v25 = vrot.slane %v5078_v6, %v6123_v24  ;;  %v2579_v23 = vsub.f32 %v7001_v8, %v2467_v31 }
 0x36c   : > { %v4447_v43 = vcombine.low %v4439_v7, %v4446_v19  ;;  %v4448_v59 = vcombine.low %v4358_v49, %v4359_v26  ;;  %v4363_v7 = vadd.f32 %v6682_v12, %v3013_v63  ;;  %v2758_v49 = vrot.slane %v5078_v6, %v6126_v32 }
 0x36d   : > { %v4275_v37 = vpop.permute.xlu0 %4274  ;;  %v2886_v2 = vmul.f32 %v2744_v21, %v2574_v17  ;;  %v3016_v63 = vadd.f32 %v6989_v55, %v2950_v62  ;;  %v3017_v9 = vadd.f32 %v6991_v1, %v2951_v51  ;;  %v3019_v42 = vadd.f32 %v6992_v44, %v2953_v35  ;;  %v7002_v21 = vld [vmem:[#allocation31_spill] sm:$0xff]  ;;  %v7003_v62 = vld [vmem:[#allocation41_spill] sm:$0xff] }
 0x36e   : > { %v4360_v53 = vadd.f32 %v4275_v37, %v3010_v27  ;;  %4552 = vrot.lane.b32.xlu1 %v4447_v43, %s5095_s20  ;;  %v4456_v39 = vrot.slane %v4448_v59, %v5361_v0  ;;  %v2576_v27 = vsub.f32 %v7000_v14, %v2446_v30  ;;  %v2460_v43 = vrot.slane %v6644_v46, %v6129_v36  ;;  %v4301_v5 = vpop.permute.xlu1 %4300  ;;  %v7004_v35 = vld [vmem:[#allocation15_spill] sm:$0xff] }
 0x36f   : > { %v2952_v10 = vmul.f32 %v6990_v3, %v2886_v2  ;;  %v2889_v59 = vmul.f32 %v2765_v40, %v2577_v61  ;;  %v2786_v30 = vrot.slane %v5080_v11, %v6126_v32  ;;  %v4367_v41 = vadd.f32 %v6729_v60, %v3017_v9 }
 0x370   : > { %v4449_v58 = vcombine.low %v4360_v53, %v4361_v18  ;;  %v2772_v18 = vrot.slane %v5078_v6, %v6129_v36  ;;  %v2888_v46 = vmul.f32 %v2758_v49, %v2576_v27  ;;  %v2578_v50 = vsub.f32 %v7002_v21, %v2460_v43 }
 0x371   : > { %v4279_v13 = vpop.permute.xlu0 %4278  ;;  %v3018_v57 = vadd.f32 %v6993_v48, %v2952_v10  ;;  %v2955_v61 = vmul.f32 %v6036_v16, %v2889_v59  ;;  %v2495_v40 = vrot.slane %v6678_v22, %v6123_v24  ;;  %v2807_v14 = vrot.slane %v5080_v11, %v6123_v24  ;;  %v7006_v59 = vld [vmem:[#allocation40_spill] sm:$0xff] }
 0x372   : > { %v4463_v15 = vrot.slane %v4449_v58, %v5361_v0  ;;  %v4362_v29 = vadd.f32 %v4279_v13, %v3012_v33  ;;  %v2474_v58 = vrot.slane %v6678_v22, %v6126_v32  ;;  %v2891_v33 = vmul.f32 %v2779_v25, %v2579_v23  ;;  %v4305_v8 = vpop.permute.xlu1 %4304  ;;  %v7005_v23 = vld [vmem:[#allocation39_spill] sm:$0xff] }
 0x373   : > { %v2481_v13 = vrot.slane %v6678_v22, %v6120_v38  ;;  %v2890_v17 = vmul.f32 %v2772_v18, %v2578_v50  ;;  %v2800_v43 = vrot.slane %v5080_v11, %v6129_v36  ;;  %v2583_v10 = vsub.f32 %v7005_v23, %v2495_v40 }
 0x374   : > { %v4464_v19 = vcombine.low %v4456_v39, %v4463_v15  ;;  %v4465_v12 = vcombine.low %v4362_v29, %v4363_v7  ;;  %v2954_v15 = vmul.f32 %v5990_v28, %v2888_v46  ;;  %v2793_v29 = vrot.slane %v5080_v11, %v6120_v38 }
 0x375   : > { %v4283_v26 = vpop.permute.xlu0 %4282  ;;  %v2580_v2 = vsub.f32 %v7003_v62, %v2474_v58  ;;  %v2488_v7 = vrot.slane %v6678_v22, %v6129_v36  ;;  %v2957_v60 = vmul.f32 %v6034_v52, %v2891_v33  ;;  %v2509_v21 = vrot.slane %v6714_v54, %v6120_v38 }
 0x376   : > { %v4364_v37 = vadd.f32 %v4283_v26, %v3014_v4  ;;  %4554 = vrot.lane.b32.xlu0 %v4464_v19, %s5095_s20  ;;  %v4473_v4 = vrot.slane %v4465_v12, %v5361_v0  ;;  %v4369_v19 = vadd.f32 %v6753_v45, %v3019_v42  ;;  %v2581_v26 = vsub.f32 %v7004_v35, %v2481_v13  ;;  %v5082_v12 = vpop.eup %5081  ;;  %v4309_v40 = vpop.permute.xlu1 %4308 }
 0x377   : > { %v2892_v27 = vmul.f32 %v2786_v30, %v2580_v2  ;;  %v3020_v22 = vadd.f32 %v6989_v55, %v2954_v15  ;;  %v2956_v45 = vmul.f32 %v6990_v3, %v2890_v17  ;;  %v3023_v11 = vadd.f32 %v6992_v44, %v2957_v60  ;;  %v7007_v30 = vld [vmem:[#allocation44_spill] sm:$0xff] }
 0x378   : > { %v4466_v53 = vcombine.low %v4364_v37, %v4365_v47  ;;  %v3021_v47 = vadd.f32 %v6991_v1, %v2955_v61  ;;  %v2893_v37 = vmul.f32 %v2793_v29, %v2581_v26  ;;  %v2516_v61 = vrot.slane %v6714_v54, %v6129_v36  ;;  %v7010_v26 = vld [vmem:[#allocation42_spill] sm:$0xff] }
 0x379   : > { %v4287_v20 = vpop.permute.xlu0 %4286  ;;  %v2958_v50 = vmul.f32 %v5990_v28, %v2892_v27  ;;  %v2821_v15 = vrot.slane %v5082_v12, %v6120_v38 }
 0x37a   : > { %v4480_v6 = vrot.slane %v4466_v53, %v5361_v0  ;;  %v4366_v56 = vadd.f32 %v4287_v20, %v3016_v63  ;;  %v2582_v53 = vsub.f32 %v7006_v59, %v2488_v7  ;;  %v2502_v63 = vrot.slane %v6714_v54, %v6126_v32 }
 0x37b   : > { %v2895_v20 = vmul.f32 %v2807_v14, %v2583_v10  ;;  %v4371_v33 = vadd.f32 %v6772_v34, %v3021_v47  ;;  %v2959_v13 = vmul.f32 %v6036_v16, %v2893_v37  ;;  %v3024_v2 = vadd.f32 %v6989_v55, %v2958_v50  ;;  %v4313_v10 = vpop.permute.xlu1 %4312 }
 0x37c   : > { %v4481_v39 = vcombine.low %v4473_v4, %v4480_v6  ;;  %v4482_v49 = vcombine.low %v4366_v56, %v4367_v41  ;;  %v2894_v58 = vmul.f32 %v2800_v43, %v2582_v53  ;;  %v3022_v4 = vadd.f32 %v6993_v48, %v2956_v45 }
 0x37d   : > { %v4291_v31 = vpop.permute.xlu0 %4290  ;;  %v2814_v56 = vrot.slane %v5082_v12, %v6126_v32  ;;  %v2584_v41 = vsub.f32 %v7007_v30, %v2502_v63  ;;  %v2961_v32 = vmul.f32 %v6034_v52, %v2895_v20  ;;  %v3025_v38 = vadd.f32 %v6991_v1, %v2959_v13 }
 0x37e   : > { %v4368_v51 = vadd.f32 %v4291_v31, %v3018_v57  ;;  %4556 = vrot.lane.b32.xlu1 %v4481_v39, %s5095_s20  ;;  %v4490_v46 = vrot.slane %v4482_v49, %v5361_v0  ;;  %v2523_v57 = vrot.slane %v6714_v54, %v6123_v24  ;;  %v4373_v39 = vadd.f32 %v4301_v5, %v3023_v11  ;;  %v7008_v31 = vld [vmem:[#allocation17_spill] sm:$0xff]  ;;  %v7009_v49 = vld [vmem:[#allocation43_spill] sm:$0xff] }
 0x37f   : > { %v2585_v62 = vsub.f32 %v7008_v31, %v2509_v21  ;;  %v2960_v7 = vmul.f32 %v6990_v3, %v2894_v58  ;;  %v2896_v54 = vmul.f32 %v2814_v56, %v2584_v41  ;;  %v2828_v5 = vrot.slane %v5082_v12, %v6129_v36 }
 0x380   : > { %v4483_v25 = vcombine.low %v4368_v51, %v4369_v19  ;;  %v2835_v19 = vrot.slane %v5082_v12, %v6123_v24  ;;  %v2587_v51 = vsub.f32 %v7009_v49, %v2523_v57  ;;  %v2586_v14 = vsub.f32 %v7010_v26, %v2516_v61 }
 0x381   : > { %v4295_v18 = vpop.permute.xlu0 %4294  ;;  %v2897_v27 = vmul.f32 %v2821_v15, %v2585_v62  ;;  %v3027_v24 = vadd.f32 %v6992_v44, %v2961_v32  ;;  %v3026_v45 = vadd.f32 %v6993_v48, %v2960_v7  ;;  %v2962_v12 = vmul.f32 %v5990_v28, %v2896_v54 }
 0x382   : > { %v4497_v9 = vrot.slane %v4483_v25, %v5361_v0  ;;  %v4370_v42 = vadd.f32 %v4295_v18, %v3020_v22  ;;  %v4375_v22 = vadd.f32 %v4305_v8, %v3025_v38  ;;  %v2899_v37 = vmul.f32 %v2835_v19, %v2587_v51 }
 0x383   : > { %v2898_v23 = vmul.f32 %v2828_v5, %v2586_v14  ;;  %v4377_v59 = vadd.f32 %v4309_v40, %v3027_v24  ;;  %v2963_v53 = vmul.f32 %v6036_v16, %v2897_v27  ;;  %v4317_v16 = vpop.permute.xlu1 %4316 }
 0x384   : > { %v4498_v6 = vcombine.low %v4490_v46, %v4497_v9  ;;  %v4499_v34 = vcombine.low %v4370_v42, %v4371_v33  ;;  %v2965_v8 = vmul.f32 %v6034_v52, %v2899_v37  ;;  %v3028_v9 = vadd.f32 %v6989_v55, %v2962_v12 }
 0x385   : > { %v4299_v17 = vpop.permute.xlu0 %4298  ;;  %v2964_v42 = vmul.f32 %v6990_v3, %v2898_v23  ;;  %v3029_v28 = vadd.f32 %v6991_v1, %v2963_v53 }
 0x386   : > { %v4372_v29 = vadd.f32 %v4299_v17, %v3022_v4  ;;  %4558 = vrot.lane.b32.xlu0 %v4498_v6, %s5095_s20  ;;  %v4507_v43 = vrot.slane %v4499_v34, %v5361_v0  ;;  %v3031_v4 = vadd.f32 %v6992_v44, %v2965_v8 }
 0x387   : > { %v4379_v33 = vadd.f32 %v4313_v10, %v3029_v28  ;;  %v3030_v52 = vadd.f32 %v6993_v48, %v2964_v42 }
 0x388   : > { %v4500_v60 = vcombine.low %v4372_v29, %v4373_v39  ;;  %v4381_v55 = vadd.f32 %v4317_v16, %v3031_v4 }
 0x389   : > { %v4303_v35 = vpop.permute.xlu0 %4302 }
 0x38a   : > { %v4514_v47 = vrot.slane %v4500_v60, %v5361_v0  ;;  %v4374_v25 = vadd.f32 %v4303_v35, %v3024_v2 }
 0x38c   : > { %v4515_v36 = vcombine.low %v4507_v43, %v4514_v47  ;;  %v4516_v63 = vcombine.low %v4374_v25, %v4375_v22 }
 0x38d   : > { %v4307_v18 = vpop.permute.xlu0 %4306 }
 0x38e   : > { %v4376_v11 = vadd.f32 %v4307_v18, %v3026_v45  ;;  %4560 = vrot.lane.b32.xlu1 %v4515_v36, %s5095_s20  ;;  %v4524_v21 = vrot.slane %v4516_v63, %v5361_v0 }
 0x390   : > { %v4517_v46 = vcombine.low %v4376_v11, %v4377_v59 }
 0x391   : > { %v4311_v20 = vpop.permute.xlu0 %4310 }
 0x392   : > { %v4531_v50 = vrot.slane %v4517_v46, %v5361_v0  ;;  %v4378_v58 = vadd.f32 %v4311_v20, %v3028_v9 }
 0x394   : > { %v4532_v6 = vcombine.low %v4524_v21, %v4531_v50  ;;  %v4533_v13 = vcombine.low %v4378_v58, %v4379_v33 }
 0x395   : > { %v4315_v56 = vpop.permute.xlu0 %4314 }
 0x396   : > { %v4380_v3 = vadd.f32 %v4315_v56, %v3030_v52  ;;  %4562 = vrot.lane.b32.xlu0 %v4532_v6, %s5095_s20  ;;  %v4541_v57 = vrot.slane %v4533_v13, %v5361_v0 }
 0x398   : > { %v4534_v1 = vcombine.low %v4380_v3, %v4381_v55 }
 0x39a   : > { %v4548_v17 = vrot.slane %v4534_v1, %v5361_v0 }
 0x39c   : > { %v4549_v30 = vcombine.low %v4541_v57, %v4548_v17 }
 0x39e   : > { %4564 = vrot.lane.b32.xlu1 %v4549_v30, %s5095_s20 }
 0x3d8   : > { %v4551_v44 = vpop.permute.xlu0 %4550 }
 0x3d9   : > { %4574 = vst.msk [vmem:[%s170_s28] sm:$0xff] %vm1986_vm8, %v4551_v44 }
 0x3e0   : > { %v4553_v48 = vpop.permute.xlu1 %4552 }
 0x3e1   : > { %4575 = vst.msk [vmem:[%s170_s28 + $0x8] sm:$0xff] %vm1986_vm8, %v4553_v48 }
 0x3e8   : > { %v4555_v41 = vpop.permute.xlu0 %4554 }
 0x3e9   : > { %4576 = vst.msk [vmem:[%s170_s28 + $0x10] sm:$0xff] %vm1986_vm8, %v4555_v41 }
 0x3f0   : > { %v4557_v61 = vpop.permute.xlu1 %4556 }
 0x3f1   : > { %4577 = vst.msk [vmem:[%s170_s28 + $0x18] sm:$0xff] %vm1986_vm8, %v4557_v61 }
 0x3f8   : > { %v4559_v0 = vpop.permute.xlu0 %4558 }
 0x3f9   : > { %4578 = vst.msk [vmem:[%s170_s28 + $0x20] sm:$0xff] %vm1986_vm8, %v4559_v0 }
 0x400   : > { %v4561_v39 = vpop.permute.xlu1 %4560 }
 0x401   : > { %4579 = vst.msk [vmem:[%s170_s28 + $0x28] sm:$0xff] %vm1986_vm8, %v4561_v39 }
 0x408   : > { %v4563_v15 = vpop.permute.xlu0 %4562 }
 0x409   : > { %4580 = vst.msk [vmem:[%s170_s28 + $0x30] sm:$0xff] %vm1986_vm8, %v4563_v15 }
 0x410   : > { %v4565_v34 = vpop.permute.xlu1 %4564 }
 0x411   : > { %4581 = vst.msk [vmem:[%s170_s28 + $0x38] sm:$0xff] %vm1986_vm8, %v4565_v34 }
 0x412 PF: > { %s13_s12 = sadd.s32 1, %s5089_s12  }
 0x413   : > { %p10_p4 = scmp.ge.s32.totalorder %s13_s12, 6  }
 0x415   :  { %12 = sbr.rel (!%p10_p4) target bundleno = 1 (0x1), region = 70 }

</bundles_post_ra>
